<compile_context>
chip_gen: v7x
topology: tpu7x:2x2x1
jax: 0.10.0
libtpu: 0.0.40
codegen_flags: <defaults>
</compile_context>

<pallas_src>
import functools

import jax
import jax.numpy as jnp
from jax import lax
from jax.experimental import pallas as pl
from jax.experimental.pallas import tpu as pltpu


def _minigrid_kernel(x_ref, w1_ref, b1_ref, w2_ref, b2_ref, w3_ref, b3_ref,
                     out_ref, *, S):
    """One batch-block.

    x_ref: (1, N, 12) conv1 im2col patches, flattened with row stride S
    (= input width).  Every activation stays flattened at stride S; the value
    for spatial position (h, w) lives at flat row h*S + w (plus the image
    offset), and only those rows are read back by the wrapper.
    """
    x = x_ref[0]                                      # (N, 4*3)
    N = x.shape[0]

    # conv1 + ReLU: a single (N,12) @ (12,16) matmul (im2col done in wrapper).
    y1 = jnp.dot(x, w1_ref[...], preferred_element_type=jnp.float32)
    y1 = jnp.maximum(y1 + b1_ref[...], 0.0)           # (N, 16)

    # 2x2 / stride-2 max pool, stride-preserving: the pooled value whose
    # window top-left is flat row r lands at row r.  Only even (h, w) rows
    # are real pool outputs; the rest are never read downstream.
    Lp = N - (S + 1)
    p = jnp.maximum(jnp.maximum(y1[0:Lp], y1[1:Lp + 1]),
                    jnp.maximum(y1[S:Lp + S], y1[S + 1:Lp + S + 1]))

    # conv2 + ReLU: neighbouring pooled positions are 2 apart in the original
    # grid, so the 2x2 taps are at flat offsets {0, 2, 2S, 2S+2}.
    d = 2 * S + 2
    L2 = Lp - d
    p2 = jnp.concatenate(
        [p[0:L2], p[2:L2 + 2], p[2 * S:L2 + 2 * S], p[d:L2 + d]], axis=-1)
    y2 = jnp.dot(p2, w2_ref[...], preferred_element_type=jnp.float32)
    y2 = jnp.maximum(y2 + b2_ref[...], 0.0)           # (L2, 32)

    # conv3 + ReLU: same tap offsets, K = 4*32 = 128 (a full MXU K pass).
    L3 = L2 - d
    p3 = jnp.concatenate(
        [y2[0:L3], y2[2:L3 + 2], y2[2 * S:L3 + 2 * S], y2[d:L3 + d]], axis=-1)
    y3 = jnp.dot(p3, w3_ref[...], preferred_element_type=jnp.float32)
    y3 = jnp.maximum(y3 + b3_ref[...], 0.0)           # (L3, 64)

    out_ref[0, :, :] = y3.astype(out_ref.dtype)


def minigrid_cnn_forward(x_nchw, params, *, block_b=16):
    """x_nchw: (B, 3, H, W) float32. Returns (B, 64, H3, W3) NCHW like PyTorch."""
    w1, b1, w2, b2, w3, b3 = params      # PyTorch layouts: OIHW weights, (Cout,) bias
    B, Cin, H, W = x_nchw.shape
    S = W
    H1, W1 = H - 1, W - 1
    Hp, Wp = H1 // 2, W1 // 2
    H3, W3 = Hp - 2, Wp - 2
    Cfin = w3.shape[0]

    # ---- conv1 im2col in plain JAX (fused with the NCHW->NHWC transpose).
    # Wrap-around rows are garbage only at invalid output positions.
    x_nhwc = jnp.transpose(x_nchw, (0, 2, 3, 1))              # (B, H, W, 3)
    taps = [jnp.roll(jnp.roll(x_nhwc, -dy, axis=1), -dx, axis=2)
            for dy in (0, 1) for dx in (0, 1)]
    x_patch = jnp.concatenate(taps, axis=-1)                  # (B, H, W, 12)

    # ---- batch blocking: Bblk images folded into the matmul M dimension.
    Bblk = max(1, min(B, block_b))
    G = pl.cdiv(B, Bblk)
    Bp = G * Bblk
    if Bp > B:
        x_patch = jnp.pad(x_patch, ((0, Bp - B), (0, 0), (0, 0), (0, 0)))
    N = Bblk * H * W
    x_patch = x_patch.reshape(G, N, 4 * Cin)

    # Rows discarded per stage (pool: S+1, conv2 and conv3: 2S+2 each).
    shrink = (S + 1) + 2 * (2 * S + 2)
    L3 = N - shrink
    # Highest flat row any valid output needs inside a block must still exist.
    assert L3 > (Bblk - 1) * H * W + 2 * (H3 - 1) * W + 2 * (W3 - 1)

    def mat(w):   # OIHW -> (4*Cin, Cout); tap-major rows match the patch lanes
        return jnp.transpose(w, (2, 3, 1, 0)).reshape(-1, w.shape[0])

    args = (x_patch,
            mat(w1), b1.reshape(1, -1),
            mat(w2), b2.reshape(1, -1),
            mat(w3), b3.reshape(1, -1))

    def const_spec(a):  # weights/biases: full-array block, constant over grid
        return pl.BlockSpec(a.shape, lambda g, _nd=a.ndim: (0,) * _nd)

    kern = functools.partial(_minigrid_kernel, S=S)
    out_blocks = pl.pallas_call(
        kern,
        out_shape=jax.ShapeDtypeStruct((G, L3, Cfin), jnp.float32),
        grid=(G,),
        in_specs=[pl.BlockSpec((1, N, 4 * Cin), lambda g: (g, 0, 0))]
                 + [const_spec(a) for a in args[1:]],
        out_specs=pl.BlockSpec((1, L3, Cfin), lambda g: (g, 0, 0)),
        compiler_params=pltpu.CompilerParams(
            dimension_semantics=("parallel",)),
    )(*args)

    # ---- extract valid rows: image i of block g, output (i3, j3) lives at
    #      flat row i*H*W + 2*i3*W + 2*j3.
    pad_rows = Bblk * H * W - L3
    y3 = jnp.pad(out_blocks, ((0, 0), (0, pad_rows), (0, 0)))
    y3 = y3.reshape(G * Bblk, H, W, Cfin)[:B, 0:2 * H3:2, 0:2 * W3:2, :]
    return jnp.transpose(y3, (0, 3, 1, 2))                    # (B, 64, H3, W3)


def reference_forward(x, params):
    """Pure-JAX (XLA) reference matching PyTorch semantics, for verification."""
    w1, b1, w2, b2, w3, b3 = params
    dn = ('NCHW', 'OIHW', 'NCHW')

    def conv(x, w, b):
        y = lax.conv_general_dilated(x, w, (1, 1), 'VALID',
                                     dimension_numbers=dn)
        return y + b[None, :, None, None]

    y = jnp.maximum(conv(x, w1, b1), 0.0)
    y = lax.reduce_window(y, -jnp.inf, lax.max,
                          (1, 1, 2, 2), (1, 1, 2, 2), 'VALID')
    y = jnp.maximum(conv(y, w2, b2), 0.0)
    y = jnp.maximum(conv(y, w3, b3), 0.0)
    return y


def init_params(key):
    """Deterministic PyTorch-Conv2d-style init (uniform +- 1/sqrt(fan_in))."""
    def conv_init(k, cout, cin, kh, kw):
        k1, k2 = jax.random.split(k)
        bound = 1.0 / float((cin * kh * kw) ** 0.5)
        w = jax.random.uniform(k1, (cout, cin, kh, kw), jnp.float32, -bound, bound)
        b = jax.random.uniform(k2, (cout,), jnp.float32, -bound, bound)
        return w, b

    k1, k2, k3 = jax.random.split(key, 3)
    w1, b1 = conv_init(k1, 16, 3, 2, 2)
    w2, b2 = conv_init(k2, 32, 16, 2, 2)
    w3, b3 = conv_init(k3, 64, 32, 2, 2)
    return (w1, b1, w2, b2, w3, b3)


if __name__ == "__main__":
    key = jax.random.PRNGKey(0)
    kp, kx = jax.random.split(key)
    params = init_params(kp)

    B, H, W = 2, 16, 16  # env.observation_space HxW = 16x16, 3 channels
    x = jax.random.uniform(kx, (B, 3, H, W), dtype=jnp.float32)

    out = jax.block_until_ready(minigrid_cnn_forward(x, params))
    ref = jax.block_until_ready(reference_forward(x, params))

    # image_embedding_size = ((H-1)//2 - 2) * ((W-1)//2 - 2) * 64 = 5*5*64
    assert out.shape == (B, 64, 5, 5), out.shape
    max_err = float(jnp.max(jnp.abs(out - ref)))
    assert max_err < 1e-4, f"mismatch vs reference: {max_err}"

    print("KERNEL_OK")
</pallas_src>

<mosaic_0001>
module attributes {stable_mosaic.version = 11 : i64} {
  func.func @_minigrid_kernel(%arg0: i32, %arg1: memref<1x512x12xf32, #tpu.memory_space<vmem>>, %arg2: memref<12x16xf32, #tpu.memory_space<vmem>>, %arg3: memref<1x16xf32, #tpu.memory_space<vmem>>, %arg4: memref<64x32xf32, #tpu.memory_space<vmem>>, %arg5: memref<1x32xf32, #tpu.memory_space<vmem>>, %arg6: memref<128x64xf32, #tpu.memory_space<vmem>>, %arg7: memref<1x64xf32, #tpu.memory_space<vmem>>, %arg8: memref<1x427x64xf32, #tpu.memory_space<vmem>>) attributes {dimension_semantics = [#tpu.dimension_semantics<parallel>], iteration_bounds = array<i64: 1>, scalar_prefetch = 0 : i64, scratch_operands = 0 : i64, tpu.core_type = #tpu.core_type<tc>, window_params = [{transform_indices = @transform_0, window_bounds = array<i64: 1, 512, 12>}, {pipeline_mode = #tpu.pipeline_mode<synchronous>, transform_indices = @transform_1, window_bounds = array<i64: 12, 16>}, {pipeline_mode = #tpu.pipeline_mode<synchronous>, transform_indices = @transform_2, window_bounds = array<i64: 1, 16>}, {pipeline_mode = #tpu.pipeline_mode<synchronous>, transform_indices = @transform_3, window_bounds = array<i64: 64, 32>}, {pipeline_mode = #tpu.pipeline_mode<synchronous>, transform_indices = @transform_4, window_bounds = array<i64: 1, 32>}, {pipeline_mode = #tpu.pipeline_mode<synchronous>, transform_indices = @transform_5, window_bounds = array<i64: 128, 64>}, {pipeline_mode = #tpu.pipeline_mode<synchronous>, transform_indices = @transform_6, window_bounds = array<i64: 1, 64>}, {transform_indices = @transform_7, window_bounds = array<i64: 1, 427, 64>}]} {
    %c0 = arith.constant 0 : index
    %c0_0 = arith.constant 0 : index
    %c0_1 = arith.constant 0 : index
    %0 = vector.load %arg1[%c0, %c0_0, %c0_1] : memref<1x512x12xf32, #tpu.memory_space<vmem>>, vector<1x512x12xf32>
    %1 = vector.shape_cast %0 : vector<1x512x12xf32> to vector<512x12xf32>
    %c0_2 = arith.constant 0 : index
    %c0_3 = arith.constant 0 : index
    %2 = vector.load %arg2[%c0_2, %c0_3] : memref<12x16xf32, #tpu.memory_space<vmem>>, vector<12x16xf32>
    %cst = arith.constant dense<0.000000e+00> : vector<512x16xf32>
    %3 = tpu.matmul %1, %2, %cst {dimension_numbers = #tpu.dot_dimension_numbers<[1], [0], [0], [1], [0, 0, 1, 1], [], []>} : vector<512x12xf32>, vector<12x16xf32>, vector<512x16xf32> -> vector<512x16xf32>
    %c0_4 = arith.constant 0 : index
    %c0_5 = arith.constant 0 : index
    %4 = vector.load %arg3[%c0_4, %c0_5] : memref<1x16xf32, #tpu.memory_space<vmem>>, vector<1x16xf32>
    %5 = vector.broadcast %4 : vector<1x16xf32> to vector<512x16xf32>
    %6 = arith.addf %3, %5 : vector<512x16xf32>
    %cst_6 = arith.constant 0.000000e+00 : f32
    %7 = vector.broadcast %cst_6 : f32 to vector<512x16xf32>
    %8 = arith.maximumf %6, %7 : vector<512x16xf32>
    %9 = vector.extract_strided_slice %8 {offsets = [0, 0], sizes = [495, 16], strides = [1, 1]} : vector<512x16xf32> to vector<495x16xf32>
    %10 = vector.extract_strided_slice %8 {offsets = [1, 0], sizes = [495, 16], strides = [1, 1]} : vector<512x16xf32> to vector<495x16xf32>
    %11 = arith.maximumf %9, %10 : vector<495x16xf32>
    %12 = vector.extract_strided_slice %8 {offsets = [16, 0], sizes = [495, 16], strides = [1, 1]} : vector<512x16xf32> to vector<495x16xf32>
    %13 = vector.extract_strided_slice %8 {offsets = [17, 0], sizes = [495, 16], strides = [1, 1]} : vector<512x16xf32> to vector<495x16xf32>
    %14 = arith.maximumf %12, %13 : vector<495x16xf32>
    %15 = arith.maximumf %11, %14 : vector<495x16xf32>
    %16 = vector.extract_strided_slice %15 {offsets = [0, 0], sizes = [461, 16], strides = [1, 1]} : vector<495x16xf32> to vector<461x16xf32>
    %17 = vector.extract_strided_slice %15 {offsets = [2, 0], sizes = [461, 16], strides = [1, 1]} : vector<495x16xf32> to vector<461x16xf32>
    %18 = vector.extract_strided_slice %15 {offsets = [32, 0], sizes = [461, 16], strides = [1, 1]} : vector<495x16xf32> to vector<461x16xf32>
    %19 = vector.extract_strided_slice %15 {offsets = [34, 0], sizes = [461, 16], strides = [1, 1]} : vector<495x16xf32> to vector<461x16xf32>
    %20 = tpu.concatenate %16, %17, %18, %19 in 1 : vector<461x16xf32>, vector<461x16xf32>, vector<461x16xf32>, vector<461x16xf32> -> vector<461x64xf32>
    %c0_7 = arith.constant 0 : index
    %c0_8 = arith.constant 0 : index
    %21 = vector.load %arg4[%c0_7, %c0_8] : memref<64x32xf32, #tpu.memory_space<vmem>>, vector<64x32xf32>
    %cst_9 = arith.constant dense<0.000000e+00> : vector<461x32xf32>
    %22 = tpu.matmul %20, %21, %cst_9 {dimension_numbers = #tpu.dot_dimension_numbers<[1], [0], [0], [1], [0, 0, 1, 1], [], []>} : vector<461x64xf32>, vector<64x32xf32>, vector<461x32xf32> -> vector<461x32xf32>
    %c0_10 = arith.constant 0 : index
    %c0_11 = arith.constant 0 : index
    %23 = vector.load %arg5[%c0_10, %c0_11] : memref<1x32xf32, #tpu.memory_space<vmem>>, vector<1x32xf32>
    %24 = vector.broadcast %23 : vector<1x32xf32> to vector<461x32xf32>
    %25 = arith.addf %22, %24 : vector<461x32xf32>
    %cst_12 = arith.constant 0.000000e+00 : f32
    %26 = vector.broadcast %cst_12 : f32 to vector<461x32xf32>
    %27 = arith.maximumf %25, %26 : vector<461x32xf32>
    %28 = vector.extract_strided_slice %27 {offsets = [0, 0], sizes = [427, 32], strides = [1, 1]} : vector<461x32xf32> to vector<427x32xf32>
    %29 = vector.extract_strided_slice %27 {offsets = [2, 0], sizes = [427, 32], strides = [1, 1]} : vector<461x32xf32> to vector<427x32xf32>
    %30 = vector.extract_strided_slice %27 {offsets = [32, 0], sizes = [427, 32], strides = [1, 1]} : vector<461x32xf32> to vector<427x32xf32>
    %31 = vector.extract_strided_slice %27 {offsets = [34, 0], sizes = [427, 32], strides = [1, 1]} : vector<461x32xf32> to vector<427x32xf32>
    %32 = tpu.concatenate %28, %29, %30, %31 in 1 : vector<427x32xf32>, vector<427x32xf32>, vector<427x32xf32>, vector<427x32xf32> -> vector<427x128xf32>
    %c0_13 = arith.constant 0 : index
    %c0_14 = arith.constant 0 : index
    %33 = vector.load %arg6[%c0_13, %c0_14] : memref<128x64xf32, #tpu.memory_space<vmem>>, vector<128x64xf32>
    %cst_15 = arith.constant dense<0.000000e+00> : vector<427x64xf32>
    %34 = tpu.matmul %32, %33, %cst_15 {dimension_numbers = #tpu.dot_dimension_numbers<[1], [0], [0], [1], [0, 0, 1, 1], [], []>} : vector<427x128xf32>, vector<128x64xf32>, vector<427x64xf32> -> vector<427x64xf32>
    %c0_16 = arith.constant 0 : index
    %c0_17 = arith.constant 0 : index
    %35 = vector.load %arg7[%c0_16, %c0_17] : memref<1x64xf32, #tpu.memory_space<vmem>>, vector<1x64xf32>
    %36 = vector.broadcast %35 : vector<1x64xf32> to vector<427x64xf32>
    %37 = arith.addf %34, %36 : vector<427x64xf32>
    %cst_18 = arith.constant 0.000000e+00 : f32
    %38 = vector.broadcast %cst_18 : f32 to vector<427x64xf32>
    %39 = arith.maximumf %37, %38 : vector<427x64xf32>
    %c0_19 = arith.constant 0 : index
    %c0_20 = arith.constant 0 : index
    %c0_21 = arith.constant 0 : index
    %40 = vector.load %arg8[%c0_19, %c0_20, %c0_21] : memref<1x427x64xf32, #tpu.memory_space<vmem>>, vector<1x427x64xf32>
    %41 = vector.shape_cast %40 : vector<1x427x64xf32> to vector<427x64xf32>
    %42 = vector.shape_cast %39 : vector<427x64xf32> to vector<1x427x64xf32>
    tpu.vector_store %arg8[%c0_19, %c0_20, %c0_21], %42 {strides = array<i32>} : memref<1x427x64xf32, #tpu.memory_space<vmem>>, vector<1x427x64xf32>,
    return
  }
  func.func @transform_0(%arg0: i32) -> (i32, i32, i32) {
    %c0_i32 = arith.constant 0 : i32
    %c0_i32_0 = arith.constant 0 : i32
    %c0_i32_1 = arith.constant 0 : i32
    return %arg0, %c0_i32, %c0_i32_0 : i32, i32, i32
  }
  func.func @transform_1(%arg0: i32) -> (i32, i32) {
    %c0_i32 = arith.constant 0 : i32
    %c0_i32_0 = arith.constant 0 : i32
    %c0_i32_1 = arith.constant 0 : i32
    return %c0_i32, %c0_i32_0 : i32, i32
  }
  func.func @transform_2(%arg0: i32) -> (i32, i32) {
    %c0_i32 = arith.constant 0 : i32
    %c0_i32_0 = arith.constant 0 : i32
    %c0_i32_1 = arith.constant 0 : i32
    return %c0_i32, %c0_i32_0 : i32, i32
  }
  func.func @transform_3(%arg0: i32) -> (i32, i32) {
    %c0_i32 = arith.constant 0 : i32
    %c0_i32_0 = arith.constant 0 : i32
    %c0_i32_1 = arith.constant 0 : i32
    return %c0_i32, %c0_i32_0 : i32, i32
  }
  func.func @transform_4(%arg0: i32) -> (i32, i32) {
    %c0_i32 = arith.constant 0 : i32
    %c0_i32_0 = arith.constant 0 : i32
    %c0_i32_1 = arith.constant 0 : i32
    return %c0_i32, %c0_i32_0 : i32, i32
  }
  func.func @transform_5(%arg0: i32) -> (i32, i32) {
    %c0_i32 = arith.constant 0 : i32
    %c0_i32_0 = arith.constant 0 : i32
    %c0_i32_1 = arith.constant 0 : i32
    return %c0_i32, %c0_i32_0 : i32, i32
  }
  func.func @transform_6(%arg0: i32) -> (i32, i32) {
    %c0_i32 = arith.constant 0 : i32
    %c0_i32_0 = arith.constant 0 : i32
    %c0_i32_1 = arith.constant 0 : i32
    return %c0_i32, %c0_i32_0 : i32, i32
  }
  func.func @transform_7(%arg0: i32) -> (i32, i32, i32) {
    %c0_i32 = arith.constant 0 : i32
    %c0_i32_0 = arith.constant 0 : i32
    %c0_i32_1 = arith.constant 0 : i32
    return %arg0, %c0_i32, %c0_i32_0 : i32, i32, i32
  }
}

</mosaic_0001>

<bundles_post_ra>
// kernel: tpu_custom_call.1
= control target key start
LH: loop header
LB: loop body
LE: loop exit
PB: predicated region body
PF: predicated region fallthrough
CT: control target
= control target key end

     0   :  { %vm292_vm0 = vcmask 1043456   ;;  %vm99_vm1 = vcmask 97280   ;;  %vm5023_vm2 = vmmov 1   ;;  %vm807_vm4 = vcmask 1046528   ;;  %s5025_s14 = smov 48   ;;  %s5026_s15 = smov 16   ;;  %s8080_s1 = inlined_call_operand.vmem [shape: f32[12,16], index: 1, kind: input, shape index: {}]   ;;  %s8081_s0 = inlined_call_operand.vmem [shape: f32[1,512,12], index: 0, kind: input, shape index: {}]   ;;  %s8082_s2 = inlined_call_operand.vmem [shape: f32[1,16], index: 2, kind: input, shape index: {}]   ;;  %s8083_s3 = inlined_call_operand.vmem [shape: f32[64,32], index: 3, kind: input, shape index: {}]   ;;  %s8084_s4 = inlined_call_operand.vmem [shape: f32[1,32], index: 4, kind: input, shape index: {}]   ;;  %s8085_s5 = inlined_call_operand.vmem [shape: f32[128,64], index: 5, kind: input, shape index: {}]   ;;  %s8086_s6 = inlined_call_operand.vmem [shape: f32[1,64], index: 6, kind: input, shape index: {}]   ;;  %s8087_s7 = inlined_call_operand.vmem [shape: f32[1,427,64], index: 7, kind: output, shape index: {}]  }
   0x1   :  { %v90_v0 = vld [vmem:[%s8080_s1] sm:$0xff]  ;;  %v91_v1 = vld [vmem:[%s8080_s1 + $0x8] sm:$0xf]  ;;  %vm4555_vm3 = vmpackc.low %vm292_vm0, %vm5023_vm2  ;;  %vm1187_vm5 = vcmask 1045504   ;;  %vm1837_vm6 = vcmask 130048   ;;  %vm1896_vm7 = vcmask 261120  }
   0x2   :  { %v4554_v2 = vpack.c.bf16 %v91_v1, %v90_v0  ;;  %v26_v3 = vld [vmem:[%s8081_s0] sm:$0xff]  ;;  %v60_v4 = vld [vmem:[%s8081_s0 + $0x110] sm:$0xff]  ;;  %v27_v5 = vld [vmem:[%s8081_s0 + $0x8] sm:$0xff]  ;;  %vm1955_vm8 = vcmask 392192   ;;  %vm2029_vm9 = vcmask 523264   ;;  %s5027_s26 = smov 64  }
   0x3   :  { %4242 = vmatprep.mubr.msk.f32.mxu0 %vm99_vm1, %v26_v3  ;;  %4293 = vmatprep.mubr.msk.f32.mxu1 %vm99_vm1, %v60_v4  ;;  %v61_v6 = vld [vmem:[%s8081_s0 + $0x118] sm:$0xff]  ;;  %v28_v7 = vld [vmem:[%s8081_s0 + $0x10] sm:$0xff]  ;;  %v62_v8 = vld [vmem:[%s8081_s0 + $0x120] sm:$0xff]  ;;  %vm3384_vm10 = vcmask 785408   ;;  %vm3904_vm11 = vcmask 518144  }
   0x4   :  { %4556 = vmatprep.subr.msk.bf16.mxu0 %vm4555_vm3, %v4554_v2  ;;  %4608 = vmatprep.subr.msk.bf16.mxu1 %vm4555_vm3, %v4554_v2  ;;  %v29_v9 = vld [vmem:[%s8081_s0 + $0x18] sm:$0xff]  ;;  %v63_v10 = vld [vmem:[%s8081_s0 + $0x128] sm:$0xff]  ;;  %v30_v11 = vld [vmem:[%s8081_s0 + $0x20] sm:$0xff] }
   0x5   :  { %4559 = vmatpush3.bf16.msk.msra.mxu0 %vm4555_vm3, %v4554_v2  ;;  %4609 = vmatpush3.bf16.msk.msra.mxu1 %vm4555_vm3, %v4554_v2  ;;  %v64_v12 = vld [vmem:[%s8081_s0 + $0x130] sm:$0xff]  ;;  %v31_v13 = vld [vmem:[%s8081_s0 + $0x28] sm:$0xff]  ;;  %v65_v14 = vld [vmem:[%s8081_s0 + $0x138] sm:$0xff] }
   0x6   :  { %v32_v15 = vld [vmem:[%s8081_s0 + $0x30] sm:$0xff]  ;;  %v66_v16 = vld [vmem:[%s8081_s0 + $0x140] sm:$0xff]  ;;  %v33_v17 = vld [vmem:[%s8081_s0 + $0x38] sm:$0xff] }
   0x7   :  { %v67_v18 = vld [vmem:[%s8081_s0 + $0x148] sm:$0xff]  ;;  %v34_v19 = vld [vmem:[%s8081_s0 + $0x40] sm:$0xff]  ;;  %v68_v20 = vld [vmem:[%s8081_s0 + $0x150] sm:$0xff] }
   0x8   :  { %4243 = vmatmul.mubr.msk.f32.vlgmr.msra.gmra.mrb[0].mxu0 %vm99_vm1, %v27_v5  ;;  %4294 = vmatmul.mubr.msk.f32.vlgmr.msra.gmra.mrb[0].mxu1 %vm99_vm1, %v61_v6  ;;  %v35_v21 = vld [vmem:[%s8081_s0 + $0x48] sm:$0xff]  ;;  %v69_v22 = vld [vmem:[%s8081_s0 + $0x158] sm:$0xff]  ;;  %v36_v23 = vld [vmem:[%s8081_s0 + $0x50] sm:$0xff] }
   0x9   :  { %4245 = vmatprep.mubr.msk.f32.mxu0 %vm99_vm1, %v28_v7  ;;  %4296 = vmatprep.mubr.msk.f32.mxu1 %vm99_vm1, %v62_v8  ;;  %v70_v24 = vld [vmem:[%s8081_s0 + $0x160] sm:$0xff]  ;;  %v37_v25 = vld [vmem:[%s8081_s0 + $0x58] sm:$0xff]  ;;  %v71_v26 = vld [vmem:[%s8081_s0 + $0x168] sm:$0xff] }
   0xa   :  { %v38_v27 = vld [vmem:[%s8081_s0 + $0x60] sm:$0xff]  ;;  %v72_v28 = vld [vmem:[%s8081_s0 + $0x170] sm:$0xff]  ;;  %v39_v29 = vld [vmem:[%s8081_s0 + $0x68] sm:$0xff] }
   0xb   :  { %v73_v30 = vld [vmem:[%s8081_s0 + $0x178] sm:$0xff]  ;;  %v40_v31 = vld [vmem:[%s8081_s0 + $0x70] sm:$0xff]  ;;  %v74_v32 = vld [vmem:[%s8081_s0 + $0x180] sm:$0xff] }
   0xc   :  { %4246 = vmatmul.mubr.msk.f32.gmra.mrb[2].mxu0 %vm99_vm1, %v29_v9  ;;  %4297 = vmatmul.mubr.msk.f32.gmra.mrb[2].mxu1 %vm99_vm1, %v63_v10  ;;  %v41_v33 = vld [vmem:[%s8081_s0 + $0x78] sm:$0xff]  ;;  %v75_v34 = vld [vmem:[%s8081_s0 + $0x188] sm:$0xff]  ;;  %v42_v35 = vld [vmem:[%s8081_s0 + $0x80] sm:$0xff] }
   0xd   :  { %4248 = vmatprep.mubr.msk.f32.mxu0 %vm99_vm1, %v30_v11  ;;  %4299 = vmatprep.mubr.msk.f32.mxu1 %vm99_vm1, %v64_v12  ;;  %v76_v36 = vld [vmem:[%s8081_s0 + $0x190] sm:$0xff]  ;;  %v43_v37 = vld [vmem:[%s8081_s0 + $0x88] sm:$0xff]  ;;  %v77_v38 = vld [vmem:[%s8081_s0 + $0x198] sm:$0xff] }
   0xe   :  { %v44_v39 = vld [vmem:[%s8081_s0 + $0x90] sm:$0xff]  ;;  %v78_v40 = vld [vmem:[%s8081_s0 + $0x1a0] sm:$0xff]  ;;  %v45_v41 = vld [vmem:[%s8081_s0 + $0x98] sm:$0xff] }
   0xf   :  { %v79_v42 = vld [vmem:[%s8081_s0 + $0x1a8] sm:$0xff]  ;;  %v46_v43 = vld [vmem:[%s8081_s0 + $0xa0] sm:$0xff]  ;;  %v80_v44 = vld [vmem:[%s8081_s0 + $0x1b0] sm:$0xff] }
  0x10   :  { %4249 = vmatmul.mubr.msk.f32.gmra.mrb[4].mxu0 %vm99_vm1, %v31_v13  ;;  %4300 = vmatmul.mubr.msk.f32.gmra.mrb[4].mxu1 %vm99_vm1, %v65_v14  ;;  %v47_v45 = vld [vmem:[%s8081_s0 + $0xa8] sm:$0xff]  ;;  %v81_v46 = vld [vmem:[%s8081_s0 + $0x1b8] sm:$0xff]  ;;  %v48_v47 = vld [vmem:[%s8081_s0 + $0xb0] sm:$0xff] }
  0x11   :  { %4251 = vmatprep.mubr.msk.f32.mxu0 %vm99_vm1, %v32_v15  ;;  %4302 = vmatprep.mubr.msk.f32.mxu1 %vm99_vm1, %v66_v16  ;;  %v82_v48 = vld [vmem:[%s8081_s0 + $0x1c0] sm:$0xff]  ;;  %v49_v49 = vld [vmem:[%s8081_s0 + $0xb8] sm:$0xff]  ;;  %v83_v50 = vld [vmem:[%s8081_s0 + $0x1c8] sm:$0xff] }
  0x12   :  { %v50_v51 = vld [vmem:[%s8081_s0 + $0xc0] sm:$0xff]  ;;  %v84_v52 = vld [vmem:[%s8081_s0 + $0x1d0] sm:$0xff]  ;;  %v51_v53 = vld [vmem:[%s8081_s0 + $0xc8] sm:$0xff] }
  0x13   :  { %v85_v54 = vld [vmem:[%s8081_s0 + $0x1d8] sm:$0xff]  ;;  %v52_v55 = vld [vmem:[%s8081_s0 + $0xd0] sm:$0xff]  ;;  %v54_v57 = vld [vmem:[%s8081_s0 + $0xe0] sm:$0xff] }
  0x14   :  { %4252 = vmatmul.mubr.msk.f32.gmra.mrb[6].mxu0 %vm99_vm1, %v33_v17  ;;  %4303 = vmatmul.mubr.msk.f32.gmra.mrb[6].mxu1 %vm99_vm1, %v67_v18  ;;  %v53_v56 = vld [vmem:[%s8081_s0 + $0xd8] sm:$0xff]  ;;  %v55_v58 = vld [vmem:[%s8081_s0 + $0xe8] sm:$0xff]  ;;  %v56_v59 = vld [vmem:[%s8081_s0 + $0xf0] sm:$0xff] }
  0x15   :  { %4254 = vmatprep.mubr.msk.f32.mxu0 %vm99_vm1, %v34_v19  ;;  %4305 = vmatprep.mubr.msk.f32.mxu1 %vm99_vm1, %v68_v20  ;;  %v57_v60 = vld [vmem:[%s8081_s0 + $0xf8] sm:$0xff]  ;;  %v58_v61 = vld [vmem:[%s8081_s0 + $0x100] sm:$0xff]  ;;  %v59_v62 = vld [vmem:[%s8081_s0 + $0x108] sm:$0xff] }
  0x16   :  { %v86_v63 = vld [vmem:[%s8081_s0 + $0x1e0] sm:$0xff]  ;;  %v87_v0 = vld [vmem:[%s8081_s0 + $0x1e8] sm:$0xff]  ;;  %v88_v2 = vld [vmem:[%s8081_s0 + $0x1f0] sm:$0xff] }
  0x17   :  { %v5326_v1 = vld [vmem:[%s8082_s2] ss:$0 sm:$0xff]  ;;  %v89_v13 = vld [vmem:[%s8081_s0 + $0x1f8] sm:$0xff]  ;;  %s5024_s0 = smov 32  }
  0x18   :  { %4255 = vmatmul.mubr.msk.f32.gmra.mrb[8].mxu0 %vm99_vm1, %v35_v21  ;;  %4306 = vmatmul.mubr.msk.f32.gmra.mrb[8].mxu1 %vm99_vm1, %v69_v22 }
  0x19   :  { %4257 = vmatprep.mubr.msk.f32.mxu0 %vm99_vm1, %v36_v23  ;;  %4308 = vmatprep.mubr.msk.f32.mxu1 %vm99_vm1, %v70_v24 }
  0x1c   :  { %4258 = vmatmul.mubr.msk.f32.gmra.mrb[10].mxu0 %vm99_vm1, %v37_v25  ;;  %4309 = vmatmul.mubr.msk.f32.gmra.mrb[10].mxu1 %vm99_vm1, %v71_v26 }
  0x1d   :  { %4260 = vmatprep.mubr.msk.f32.mxu0 %vm99_vm1, %v38_v27  ;;  %4311 = vmatprep.mubr.msk.f32.mxu1 %vm99_vm1, %v72_v28 }
  0x20   :  { %4261 = vmatmul.mubr.msk.f32.gmra.mrb[12].mxu0 %vm99_vm1, %v39_v29  ;;  %4312 = vmatmul.mubr.msk.f32.gmra.mrb[12].mxu1 %vm99_vm1, %v73_v30 }
  0x21   :  { %4263 = vmatprep.mubr.msk.f32.mxu0 %vm99_vm1, %v40_v31  ;;  %4314 = vmatprep.mubr.msk.f32.mxu1 %vm99_vm1, %v74_v32 }
  0x24   :  { %4264 = vmatmul.mubr.msk.f32.gmra.mrb[14].mxu0 %vm99_vm1, %v41_v33  ;;  %4315 = vmatmul.mubr.msk.f32.gmra.mrb[14].mxu1 %vm99_vm1, %v75_v34 }
  0x25   :  { %4266 = vmatprep.mubr.msk.f32.mxu0 %vm99_vm1, %v42_v35  ;;  %4317 = vmatprep.mubr.msk.f32.mxu1 %vm99_vm1, %v76_v36 }
  0x28   :  { %4267 = vmatmul.mubr.msk.f32.gmra.mrb[16].mxu0 %vm99_vm1, %v43_v37  ;;  %4318 = vmatmul.mubr.msk.f32.gmra.mrb[16].mxu1 %vm99_vm1, %v77_v38 }
  0x29   :  { %4269 = vmatprep.mubr.msk.f32.mxu0 %vm99_vm1, %v44_v39  ;;  %4320 = vmatprep.mubr.msk.f32.mxu1 %vm99_vm1, %v78_v40 }
  0x2c   :  { %4270 = vmatmul.mubr.msk.f32.gmra.mrb[18].mxu0 %vm99_vm1, %v45_v41  ;;  %4321 = vmatmul.mubr.msk.f32.gmra.mrb[18].mxu1 %vm99_vm1, %v79_v42 }
  0x2d   :  { %4272 = vmatprep.mubr.msk.f32.mxu0 %vm99_vm1, %v46_v43  ;;  %4323 = vmatprep.mubr.msk.f32.mxu1 %vm99_vm1, %v80_v44 }
  0x30   :  { %4273 = vmatmul.mubr.msk.f32.gmra.mrb[20].mxu0 %vm99_vm1, %v47_v45  ;;  %4324 = vmatmul.mubr.msk.f32.gmra.mrb[20].mxu1 %vm99_vm1, %v81_v46 }
  0x31   :  { %4275 = vmatprep.mubr.msk.f32.mxu0 %vm99_vm1, %v48_v47  ;;  %4326 = vmatprep.mubr.msk.f32.mxu1 %vm99_vm1, %v82_v48 }
  0x34   :  { %4276 = vmatmul.mubr.msk.f32.gmra.mrb[22].mxu0 %vm99_vm1, %v49_v49  ;;  %4327 = vmatmul.mubr.msk.f32.gmra.mrb[22].mxu1 %vm99_vm1, %v83_v50 }
  0x35   :  { %4278 = vmatprep.mubr.msk.f32.mxu0 %vm99_vm1, %v50_v51  ;;  %4329 = vmatprep.mubr.msk.f32.mxu1 %vm99_vm1, %v84_v52 }
  0x38   :  { %4279 = vmatmul.mubr.msk.f32.gmra.mrb[24].mxu0 %vm99_vm1, %v51_v53  ;;  %4330 = vmatmul.mubr.msk.f32.gmra.mrb[24].mxu1 %vm99_vm1, %v85_v54 }
  0x39   :  { %4281 = vmatprep.mubr.msk.f32.mxu0 %vm99_vm1, %v52_v55  ;;  %4332 = vmatprep.mubr.msk.f32.mxu1 %vm99_vm1, %v86_v63 }
  0x3c   :  { %4282 = vmatmul.mubr.msk.f32.gmra.mrb[26].mxu0 %vm99_vm1, %v53_v56  ;;  %4333 = vmatmul.mubr.msk.f32.gmra.mrb[26].mxu1 %vm99_vm1, %v87_v0 }
  0x3d   :  { %4284 = vmatprep.mubr.msk.f32.mxu0 %vm99_vm1, %v54_v57  ;;  %4335 = vmatprep.mubr.msk.f32.mxu1 %vm99_vm1, %v88_v2 }
  0x40   :  { %4285 = vmatmul.mubr.msk.f32.gmra.mrb[28].mxu0 %vm99_vm1, %v55_v58  ;;  %4336 = vmatmul.mubr.msk.f32.gmra.mrb[28].mxu1 %vm99_vm1, %v89_v13 }
  0x41   :  { %4287 = vmatprep.mubr.msk.f32.mxu0 %vm99_vm1, %v56_v59 }
  0x44   :  { %4288 = vmatmul.mubr.msk.f32.gmra.mrb[30].mxu0 %vm99_vm1, %v57_v60 }
  0x45   :  { %4290 = vmatprep.mubr.msk.f32.mxu0 %vm99_vm1, %v58_v61 }
  0x48   :  { %4291 = vmatmul.mubr.msk.f32.gmra.mrb[32].mxu0 %vm99_vm1, %v59_v62 }
  0xdb   :  { %v4295_v3 = vpop.f32.mrb[0].mxu1  ;;  %v4244_v4 = vpop.f32.mrb[0].mxu0 }
  0xdc   :  { %v5333_v5 = vadd.f32 %v4295_v3, %v5326_v1  ;;  %v532_v6 = vpop.f32.mrb[1].mxu1  ;;  %v368_v7 = vadd.f32 %v4244_v4, %v5326_v1  ;;  %v362_v8 = vpop.f32.mrb[1].mxu0 }
  0xdd   :  { %v533_v9 = vadd.f32 %v5326_v1, %v532_v6  ;;  %v363_v10 = vadd.f32 %v5326_v1, %v362_v8 }
  0xde   :  { %v716_v11 = vmax.f32 %v5333_v5, 0.0  ;;  %v682_v12 = vmax.f32 %v368_v7, 0.0 }
  0xdf   :  { %v715_v14 = vmax.f32 %v533_v9, 0.0  ;;  %v681_v15 = vmax.f32 %v363_v10, 0.0  ;;  %v4247_v16 = vpop.f32.mrb[2].mxu0  ;;  %v4298_v17 = vpop.f32.mrb[2].mxu1 }
  0xe0   :  { %v5345_v18 = vrot.slane %v716_v11, 1  ;;  %v809_v19 = vrot.slane %v682_v12, 1  ;;  %v5348_v20 = vadd.f32 %v4247_v16, %v5326_v1  ;;  %v5351_v21 = vadd.f32 %v4298_v17, %v5326_v1  ;;  %v372_v22 = vpop.f32.mrb[3].mxu0  ;;  %v542_v23 = vpop.f32.mrb[3].mxu1 }
  0xe1   :  { %v5353_v24 = vrot.slane %v715_v14, 1  ;;  %v808_v25 = vrot.slane %v681_v15, 1  ;;  %v373_v26 = vadd.f32 %v5326_v1, %v372_v22  ;;  %v543_v27 = vadd.f32 %v5326_v1, %v542_v23 }
  0xe2   :  { %v684_v28 = vmax.f32 %v5348_v20, 0.0  ;;  %v718_v29 = vmax.f32 %v5351_v21, 0.0 }
  0xe3   :  { %v878_v30 = vsel %vm807_vm4, %v5353_v24, %v5345_v18  ;;  %v810_v31 = vsel %vm807_vm4, %v808_v25, %v809_v19  ;;  %v683_v32 = vmax.f32 %v373_v26, 0.0  ;;  %v717_v33 = vmax.f32 %v543_v27, 0.0  ;;  %v4250_v34 = vpop.f32.mrb[4].mxu0  ;;  %v4301_v35 = vpop.f32.mrb[4].mxu1 }
  0xe4   :  { %v5363_v36 = vmax.f32 %v715_v14, %v878_v30  ;;  %v993_v37 = vmax.f32 %v681_v15, %v810_v31  ;;  %v813_v38 = vrot.slane %v684_v28, 1  ;;  %v5367_v39 = vrot.slane %v718_v29, 1  ;;  %v382_v40 = vpop.f32.mrb[5].mxu0  ;;  %v552_v41 = vpop.f32.mrb[5].mxu1 }
  0xe5   :  { %v811_v42 = vrot.slane %v683_v32, 1  ;;  %v5369_v43 = vrot.slane %v717_v33, 1  ;;  %v388_v44 = vadd.f32 %v4250_v34, %v5326_v1  ;;  %v5373_v45 = vadd.f32 %v4301_v35, %v5326_v1 }
  0xe6   :  { %v383_v46 = vadd.f32 %v5326_v1, %v382_v40  ;;  %v553_v47 = vadd.f32 %v5326_v1, %v552_v41 }
  0xe7   :  { %v812_v48 = vsel %vm807_vm4, %v809_v19, %v811_v42  ;;  %v814_v49 = vsel %vm807_vm4, %v811_v42, %v813_v38  ;;  %v882_v50 = vsel %vm807_vm4, %v5369_v43, %v5367_v39  ;;  %v686_v51 = vmax.f32 %v388_v44, 0.0  ;;  %v4253_v52 = vpop.f32.mrb[6].mxu0  ;;  %v4304_v53 = vpop.f32.mrb[6].mxu1 }
  0xe8   :  { %v5382_v54 = vmax.f32 %v682_v12, %v812_v48  ;;  %v995_v55 = vmax.f32 %v683_v32, %v814_v49  ;;  %v5384_v56 = vmax.f32 %v717_v33, %v882_v50  ;;  %v720_v57 = vmax.f32 %v5373_v45, 0.0  ;;  %v392_v58 = vpop.f32.mrb[7].mxu0  ;;  %v562_v59 = vpop.f32.mrb[7].mxu1 }
  0xe9   :  { %v817_v60 = vrot.slane %v686_v51, 1  ;;  %v685_v61 = vmax.f32 %v383_v46, 0.0  ;;  %v719_v62 = vmax.f32 %v553_v47, 0.0  ;;  %v5388_v63 = vadd.f32 %v4253_v52, %v5326_v1 }
  0xea   :  { %v5390_v0 = vmax.f32 %v993_v37, %v995_v55  ;;  %v5394_v2 = vrot.slane %v720_v57, 1  ;;  %v5397_v3 = vadd.f32 %v4304_v53, %v5326_v1  ;;  %v393_v4 = vadd.f32 %v5326_v1, %v392_v58 }
  0xeb   :  { %v815_v6 = vrot.slane %v685_v61, 1  ;;  %v883_v7 = vrot.slane %v719_v62, 1  ;;  %v8093_v8 = vmax.f32 %v5388_v63, 0.0  ;;  %v563_v9 = vadd.f32 %v5326_v1, %v562_v59  ;;  %v4256_v10 = vpop.f32.mrb[8].mxu0  ;;  %v4307_v12 = vpop.f32.mrb[8].mxu1 }
  0xec   :  { %8165 = vst [vmem:[#allocation2_spill] sm:$0xff] %v5390_v0  ;;  %v8092_v13 = vmax.f32 %v5397_v3, 0.0  ;;  %v687_v14 = vmax.f32 %v393_v4, 0.0  ;;  %v5404_v15 = vadd.f32 %v4256_v10, %v5326_v1  ;;  %v5407_v16 = vadd.f32 %v4307_v12, %v5326_v1  ;;  %v572_v17 = vpop.f32.mrb[9].mxu1  ;;  %v402_v19 = vpop.f32.mrb[9].mxu0 }
  0xed   :  { %v816_v20 = vsel %vm807_vm4, %v813_v38, %v815_v6  ;;  %v818_v22 = vsel %vm807_vm4, %v815_v6, %v817_v60  ;;  %v886_v23 = vsel %vm807_vm4, %v883_v7, %v5394_v2  ;;  %v5415_v25 = vrot.slane %v8093_v8, 1 }
  0xee   :  { %v5417_v26 = vmax.f32 %v684_v28, %v816_v20  ;;  %v5419_v27 = vmax.f32 %v685_v61, %v818_v22  ;;  %v5421_v30 = vmax.f32 %v719_v62, %v886_v23  ;;  %v5425_v31 = vrot.slane %v8092_v13, 1 }
  0xef   :  { %v819_v32 = vrot.slane %v687_v14, 1  ;;  %v721_v33 = vmax.f32 %v563_v9, 0.0  ;;  %v8091_v34 = vmax.f32 %v5404_v15, 0.0  ;;  %v8090_v35 = vmax.f32 %v5407_v16, 0.0  ;;  %v4259_v37 = vpop.f32.mrb[10].mxu0  ;;  %v4310_v38 = vpop.f32.mrb[10].mxu1 }
  0xf0   :  { %v5430_v40 = vmax.f32 %v995_v55, %v5419_v27  ;;  %v573_v28 = vadd.f32 %v5326_v1, %v572_v17  ;;  %v5435_v41 = vmax.f32 %v5363_v36, %v5384_v56  ;;  %v403_v42 = vadd.f32 %v5326_v1, %v402_v19  ;;  %v582_v44 = vpop.f32.mrb[11].mxu1  ;;  %v412_v46 = vpop.f32.mrb[11].mxu0 }
  0xf1   :  { %v820_v47 = vsel %vm807_vm4, %v817_v60, %v819_v32  ;;  %v822_v48 = vsel %vm807_vm4, %v819_v32, %v5415_v25  ;;  %v887_v49 = vrot.slane %v721_v33, 1  ;;  %v5443_v50 = vrot.slane %v8091_v34, 1 }
  0xf2   :  { %8166 = vst [vmem:[#allocation3_spill] sm:$0xff] %v5430_v40  ;;  %8167 = vst [vmem:[#allocation4_spill] sm:$0xff] %v5435_v41  ;;  %v5445_v52 = vmax.f32 %v686_v51, %v820_v47  ;;  %v5447_v53 = vmax.f32 %v687_v14, %v822_v48  ;;  %v5451_v55 = vrot.slane %v8090_v35, 1  ;;  %v723_v58 = vmax.f32 %v573_v28, 0.0  ;;  %1541 = vrot.lane.b32.xlu0 %v5435_v41, %s5024_s0 }
  0xf3   :  { %v890_v59 = vsel %vm807_vm4, %v887_v49, %v5425_v31  ;;  %v689_v60 = vmax.f32 %v403_v42, 0.0  ;;  %v5458_v61 = vadd.f32 %v4259_v37, %v5326_v1  ;;  %v5461_v51 = vadd.f32 %v4310_v38, %v5326_v1  ;;  %v4262_v62 = vpop.f32.mrb[12].mxu0  ;;  %v4313_v4 = vpop.f32.mrb[12].mxu1 }
  0xf4   :  { %v5463_v6 = vmax.f32 %v721_v33, %v890_v59  ;;  %v5465_v9 = vrot.slane %v723_v58, 1  ;;  %v583_v10 = vadd.f32 %v5326_v1, %v582_v44  ;;  %v880_v12 = vsel %vm807_vm4, %v5345_v18, %v5369_v43  ;;  %v422_v14 = vpop.f32.mrb[13].mxu0  ;;  %v592_v17 = vpop.f32.mrb[13].mxu1 }
  0xf5   :  { %v5471_v19 = vrot.slane %v689_v60, 1  ;;  %v8089_v20 = vmax.f32 %v5458_v61, 0.0  ;;  %v8088_v22 = vmax.f32 %v5461_v51, 0.0  ;;  %v884_v23 = vsel %vm807_vm4, %v5367_v39, %v883_v7 }
  0xf6   :  { %v894_v32 = vsel %vm807_vm4, %v5465_v9, %v5451_v55  ;;  %v725_v33 = vmax.f32 %v583_v10, 0.0  ;;  %v5482_v37 = vmax.f32 %v716_v11, %v880_v12  ;;  %v1030_v18 = vmax.f32 %v718_v29, %v884_v23 }
  0xf7   :  { %v5486_v43 = vmax.f32 %v723_v58, %v894_v32  ;;  %v826_v38 = vsel %vm807_vm4, %v5471_v19, %v5443_v50  ;;  %v5493_v39 = vrot.slane %v8088_v22, 1  ;;  %v4265_v7 = vpop.f32.mrb[14].mxu0  ;;  %v5495_v28 = vpop.f32.mrb[14].mxu1  ;;  %v5506_v29 = vmax.f32 %v5384_v56, %v5421_v30 }
  0xf8   :  { %v5497_v5 = vmax.f32 %v689_v60, %v826_v38  ;;  %v5499_v11 = vrot.slane %v725_v33, 1  ;;  %v5502_v21 = vmax.f32 %v5482_v37, %v1030_v18  ;;  %v432_v42 = vpop.f32.mrb[15].mxu0  ;;  %v5508_v44 = vpop.f32.mrb[15].mxu1  ;;  %v5512_v47 = vrot.slane %v8089_v20, 1 }
  0xf9   :  { %8169 = vst [vmem:[#allocation6_spill] sm:$0xff] %v5506_v29  ;;  %v413_v48 = vadd.f32 %v5326_v1, %v412_v46  ;;  %v5517_v58 = vmax.f32 %v5382_v54, %v5417_v26  ;;  %v8095_v59 = vrot.slane %v5430_v40, 2  ;;  %1545 = vrot.lane.b32.xlu0 %v5506_v29, %s5024_s0  ;;  %v8094_v46 = vrot.slane %v5506_v29, 2 }
  0xfa   :  { %8168 = vst [vmem:[#allocation5_spill] sm:$0xff] %v5502_v21  ;;  %v898_v56 = vsel %vm807_vm4, %v5499_v11, %v5493_v39  ;;  %1543 = vrot.lane.b32.xlu1 %v5502_v21, %s5024_s0  ;;  %v1257_v60 = vrot.slane %v5502_v21, 2  ;;  %v5531_v54 = vmax.f32 %v5419_v27, %v5447_v53  ;;  %v1188_v23 = vrot.slane %v5390_v0, 2 }
  0xfb   :  { %8170 = vst [vmem:[#allocation7_spill] sm:$0xff] %v5517_v58  ;;  %v5533_v10 = vmax.f32 %v725_v33, %v898_v56  ;;  %v691_v12 = vmax.f32 %v413_v48, 0.0  ;;  %v1189_v32 = vrot.slane %v5517_v58, 2  ;;  %v4268_v38 = vpop.f32.mrb[16].mxu0  ;;  %v5537_v22 = vpop.f32.mrb[16].mxu1  ;;  %v5543_v35 = vadd.f32 %v4262_v62, %v5326_v1 }
  0xfc   :  { %8171 = vst [vmem:[#allocation8_spill] sm:$0xff] %v5531_v54  ;;  %v1260_v20 = vsel %vm1187_vm5, %v1257_v60, %v8094_v46  ;;  %v423_v27 = vadd.f32 %v5326_v1, %v422_v14  ;;  %v888_v33 = vsel %vm807_vm4, %v5394_v2, %v887_v49  ;;  %v442_v48 = vpop.f32.mrb[17].mxu0  ;;  %v5548_v56 = vpop.f32.mrb[17].mxu1  ;;  %v5565_v14 = vadd.f32 %v4313_v4, %v5326_v1 }
  0xfd   :  { %8172 = vst [vmem:[#allocation9_spill] sm:$0xff] %v5543_v35  ;;  %v5550_v34 = vrot.slane %v691_v12, 1  ;;  %v1190_v13 = vsel %vm1187_vm5, %v1188_v23, %v1189_v32  ;;  %v1192_v8 = vsel %vm1187_vm5, %v1189_v32, %v8095_v59  ;;  %v8098_v2 = vmax.f32 %v5543_v35, 0.0 }
  0xfe   :  { %1725 = vrot.lane.b32.xlu1 %v1260_v20, %s5025_s14  ;;  %1303 = vrot.lane.b32.xlu0 %v1190_v13, %s5026_s15  ;;  %v693_v49 = vmax.f32 %v423_v27, 0.0  ;;  %v5562_v62 = vmax.f32 %v720_v57, %v888_v33  ;;  %8173 = vst [vmem:[#allocation10_spill] sm:$0xff] %v5565_v14  ;;  %v593_v32 = vadd.f32 %v5326_v1, %v592_v17 }
  0xff   :  { %v830_v23 = vsel %vm807_vm4, %v5550_v34, %v5512_v47  ;;  %v5573_v59 = vmax.f32 %v5417_v26, %v5445_v52  ;;  %v4271_v27 = vpop.f32.mrb[18].mxu0  ;;  %v5576_v46 = vpop.f32.mrb[18].mxu1  ;;  %v5582_v57 = vrot.slane %v8098_v2, 1  ;;  %v5604_v2 = vadd.f32 %v4265_v7, %v5326_v1 }
 0x100   :  { %8175 = vst [vmem:[#allocation12_spill] sm:$0xff] %v5576_v46  ;;  %v5578_v45 = vmax.f32 %v691_v12, %v830_v23  ;;  %v5584_v4 = vrot.slane %v693_v49, 1  ;;  %v5587_v33 = vmax.f32 %v1030_v18, %v5562_v62  ;;  %v452_v17 = vpop.f32.mrb[19].mxu0  ;;  %v5589_v21 = vpop.f32.mrb[19].mxu1  ;;  %v727_v13 = vmax.f32 %v593_v32, 0.0 }
 0x101   :  { %8174 = vst [vmem:[#allocation11_spill] sm:$0xff] %v5573_v59  ;;  %8176 = vst [vmem:[#allocation13_spill] sm:$0xff] %v5582_v57  ;;  %v1193_v58 = vrot.slane %v5573_v59, 2  ;;  %v5595_v12 = vmax.f32 %v5421_v30, %v5463_v6  ;;  %v433_v32 = vadd.f32 %v5326_v1, %v432_v42  ;;  %v8181_v26 = vrot.slane %v5435_v41, 2 }
 0x102   :  { %8177 = vst [vmem:[#allocation14_spill] sm:$0xff] %v5587_v33  ;;  %8178 = vst [vmem:[#allocation15_spill] sm:$0xff] %v5589_v21  ;;  %1373 = vrot.lane.b32.xlu1 %v1260_v20, %s5026_s15  ;;  %1305 = vrot.lane.b32.xlu0 %v1192_v8, %s5026_s15  ;;  %v834_v18 = vsel %vm807_vm4, %v5584_v4, %v5582_v57  ;;  %v8182_v20 = vmax.f32 %v5565_v14, 0.0  ;;  %v5616_v0 = vrot.slane %v727_v13, 1  ;;  %v8185_v7 = vrot.slane %v5531_v54, 2 }
 0x103   :  { %8179 = vst [vmem:[#allocation16_spill] sm:$0xff] %v5595_v12  ;;  %8180 = vst [vmem:[#allocation17_spill] sm:$0xff] %v5604_v2  ;;  %v1258_v30 = vsel %vm1187_vm5, %v8181_v26, %v1257_v60  ;;  %v5610_v59 = vmax.f32 %v693_v49, %v834_v18  ;;  %v4274_v35 = vpop.f32.mrb[20].mxu0  ;;  %v5618_v57 = vpop.f32.mrb[20].mxu1  ;;  %v8108_v42 = vrot.slane %v5595_v12, 2  ;;  %v695_v60 = vmax.f32 %v433_v32, 0.0 }
 0x104   :  { %v5614_v8 = vrot.slane %v8182_v20, 1  ;;  %8184 = vst [vmem:[#allocation19_spill] sm:$0xff] %v5618_v57  ;;  %v1196_v23 = vsel %vm1187_vm5, %v1193_v58, %v8185_v7  ;;  %v462_v49 = vpop.f32.mrb[21].mxu0  ;;  %v5625_v26 = vpop.f32.mrb[21].mxu1  ;;  %v8187_v20 = vrot.slane %v5430_v40, 2  ;;  %v5636_v14 = vadd.f32 %v4268_v38, %v5326_v1 }
 0x105   :  { %8186 = vst [vmem:[#allocation20_spill] sm:$0xff] %v5625_v26  ;;  %v443_v7 = vadd.f32 %v5326_v1, %v442_v48  ;;  %v8189_v41 = vrot.slane %v5587_v33, 2 }
 0x106   :  { %8183 = vst [vmem:[#allocation18_spill] sm:$0xff] %v5614_v8  ;;  %v902_v18 = vsel %vm807_vm4, %v5616_v0, %v5614_v8  ;;  %v5633_v57 = vsel %vm1187_vm5, %v8187_v20, %v1193_v58  ;;  %8188 = vst [vmem:[#allocation21_spill] sm:$0xff] %v5636_v14  ;;  %1481 = vrot.lane.b32.xlu1 %v5531_v54, %s5024_s0  ;;  %1723 = vrot.lane.b32.xlu0 %v1258_v30, %s5025_s14  ;;  %v8190_v58 = vmax.f32 %v5604_v2, 0.0 }
 0x107   :  { %v5642_v32 = vmax.f32 %v727_v13, %v902_v18  ;;  %v5649_v40 = vsel %vm1187_vm5, %v8189_v41, %v8108_v42  ;;  %v5655_v20 = vrot.slane %v695_v60, 1  ;;  %v697_v26 = vmax.f32 %v443_v7, 0.0  ;;  %v4277_v18 = vpop.f32.mrb[22].mxu0  ;;  %v5662_v21 = vpop.f32.mrb[22].mxu1 }
 0x108   :  { %v5653_v38 = vrot.slane %v8190_v58, 1  ;;  %v5659_v8 = vadd.f32 %v4271_v27, %v5326_v1  ;;  %v453_v13 = vadd.f32 %v5326_v1, %v452_v17  ;;  %8193 = vst [vmem:[#allocation24_spill] sm:$0xff] %v5662_v21  ;;  %v468_v58 = vadd.f32 %v4274_v35, %v5326_v1  ;;  %v472_v48 = vpop.f32.mrb[23].mxu0  ;;  %v5672_v27 = vpop.f32.mrb[23].mxu1 }
 0x109   :  { %v463_v42 = vadd.f32 %v5326_v1, %v462_v49  ;;  %v824_v7 = vsel %vm807_vm4, %v5415_v25, %v5471_v19  ;;  %8194 = vst [vmem:[#allocation25_spill] sm:$0xff] %v5672_v27  ;;  %v8195_v17 = vmax.f32 %v5636_v14, 0.0  ;;  %v5680_v46 = vrot.slane %v697_v26, 1 }
 0x10a   :  { %8191 = vst [vmem:[#allocation22_spill] sm:$0xff] %v5653_v38  ;;  %8192 = vst [vmem:[#allocation23_spill] sm:$0xff] %v5659_v8  ;;  %v838_v41 = vsel %vm807_vm4, %v5655_v20, %v5653_v38  ;;  %v8113_v38 = vmax.f32 %v5659_v8, 0.0  ;;  %1547 = vrot.lane.b32.xlu1 %v5587_v33, %s5024_s0  ;;  %1371 = vrot.lane.b32.xlu0 %v1258_v30, %s5026_s15  ;;  %v699_v35 = vmax.f32 %v453_v13, 0.0  ;;  %v702_v25 = vmax.f32 %v468_v58, 0.0 }
 0x10b   :  { %v5674_v2 = vmax.f32 %v695_v60, %v838_v41  ;;  %v5678_v21 = vrot.slane %v8195_v17, 1  ;;  %8197 = vst [vmem:[#allocation27_spill] sm:$0xff] %v5680_v46  ;;  %v701_v19 = vmax.f32 %v463_v42, 0.0  ;;  %v8198_v49 = vmax.f32 %v5388_v63, 0.0  ;;  %v4280_v30 = vpop.f32.mrb[24].mxu0 }
 0x10c   :  { %v5695_v17 = vrot.slane %v8113_v38, 1  ;;  %v478_v14 = vadd.f32 %v4277_v18, %v5326_v1  ;;  %v473_v27 = vadd.f32 %v5326_v1, %v472_v48  ;;  %v5701_v42 = vrot.slane %v699_v35, 1 }
 0x10d   :  { %8196 = vst [vmem:[#allocation26_spill] sm:$0xff] %v5678_v21  ;;  %v5688_v60 = vmax.f32 %v8198_v49, %v824_v7  ;;  %v842_v41 = vsel %vm807_vm4, %v5680_v46, %v5678_v21  ;;  %v849_v63 = vrot.slane %v702_v25, 1  ;;  %v5703_v58 = vrot.slane %v701_v19, 1  ;;  %v482_v7 = vpop.f32.mrb[25].mxu0 }
 0x10e   :  { %8199 = vst [vmem:[#allocation28_spill] sm:$0xff] %v5695_v17  ;;  %v5699_v13 = vmax.f32 %v697_v26, %v842_v41  ;;  %v704_v8 = vmax.f32 %v478_v14, 0.0  ;;  %v703_v38 = vmax.f32 %v473_v27, 0.0  ;;  %v5710_v21 = vadd.f32 %v4280_v30, %v5326_v1  ;;  %1309 = vrot.lane.b32.xlu1 %v1196_v23, %s5026_s15  ;;  %1549 = vrot.lane.b32.xlu0 %v5595_v12, %s5024_s0 }
 0x10f   :  { %8201 = vst [vmem:[#allocation30_spill] sm:$0xff] %v5703_v58  ;;  %v5707_v49 = vmax.f32 %v5445_v52, %v5688_v60  ;;  %v846_v26 = vsel %vm807_vm4, %v5701_v42, %v5695_v17  ;;  %v850_v48 = vsel %vm807_vm4, %v5703_v58, %v849_v63  ;;  %v483_v52 = vadd.f32 %v5326_v1, %v482_v7  ;;  %v4283_v30 = vpop.f32.mrb[26].mxu0 }
 0x110   :  { %8200 = vst [vmem:[#allocation29_spill] sm:$0xff] %v5699_v13  ;;  %v5721_v18 = vmax.f32 %v699_v35, %v846_v26  ;;  %v5723_v14 = vmax.f32 %v701_v19, %v850_v48  ;;  %v853_v27 = vrot.slane %v704_v8, 1  ;;  %v851_v41 = vrot.slane %v703_v38, 1  ;;  %v492_v58 = vpop.f32.mrb[27].mxu0 }
 0x111   :  { %8202 = vst [vmem:[#allocation31_spill] sm:$0xff] %v5707_v49  ;;  %v706_v23 = vmax.f32 %v5710_v21, 0.0  ;;  %v705_v13 = vmax.f32 %v483_v52, 0.0  ;;  %v892_v46 = vsel %vm807_vm4, %v5425_v31, %v5465_v9  ;;  %v5731_v17 = vmax.f32 %v5447_v53, %v5497_v5 }
 0x112   :  { %8203 = vst [vmem:[#allocation32_spill] sm:$0xff] %v5723_v14  ;;  %v852_v35 = vsel %vm807_vm4, %v849_v63, %v851_v41  ;;  %v854_v19 = vsel %vm807_vm4, %v851_v41, %v853_v27  ;;  %v8204_v7 = vmax.f32 %v5397_v3, 0.0  ;;  %v498_v21 = vadd.f32 %v4283_v30, %v5326_v1  ;;  %1729 = vrot.lane.b32.xlu1 %v5649_v40, %s5025_s14 }
 0x113   :  { %1307 = vrot.lane.b32.xlu0 %v5633_v57, %s5026_s15  ;;  %v5744_v31 = vmax.f32 %v702_v25, %v852_v35  ;;  %v1015_v53 = vmax.f32 %v703_v38, %v854_v19  ;;  %v857_v9 = vrot.slane %v706_v23, 1  ;;  %v855_v48 = vrot.slane %v705_v13, 1 }
 0x114   :  { %v5737_v26 = vmax.f32 %v8204_v7, %v892_v46  ;;  %v8206_v63 = vrot.slane %v5587_v33, 2  ;;  %v8207_v52 = vrot.slane %v5506_v29, 2  ;;  %v708_v41 = vmax.f32 %v498_v21, 0.0  ;;  %v4286_v7 = vpop.f32.mrb[28].mxu0 }
 0x115   :  { %8205 = vst [vmem:[#allocation33_spill] sm:$0xff] %v5744_v31  ;;  %v493_v30 = vadd.f32 %v5326_v1, %v492_v58  ;;  %v5757_v57 = vmax.f32 %v5723_v14, %v1015_v53  ;;  %v856_v38 = vsel %vm807_vm4, %v853_v27, %v855_v48  ;;  %v858_v25 = vsel %vm807_vm4, %v855_v48, %v857_v9  ;;  %v502_v19 = vpop.f32.mrb[29].mxu0 }
 0x116   :  { %v1262_v3 = vsel %vm1187_vm5, %v8207_v52, %v8206_v63  ;;  %v5753_v46 = vmax.f32 %v5562_v62, %v5737_v26  ;;  %v508_v35 = vadd.f32 %v4286_v7, %v5326_v1  ;;  %v5762_v33 = vmax.f32 %v704_v8, %v856_v38  ;;  %1377 = vrot.lane.b32.xlu1 %v5649_v40, %s5026_s15 }
 0x117   :  { %8209 = vst [vmem:[#allocation35_spill] sm:$0xff] %v5757_v57  ;;  %v1017_v63 = vmax.f32 %v705_v13, %v858_v25  ;;  %v861_v52 = vrot.slane %v708_v41, 1  ;;  %v707_v62 = vmax.f32 %v493_v30, 0.0  ;;  %1727 = vrot.lane.b32.xlu0 %v1262_v3, %s5025_s14  ;;  %v503_v21 = vadd.f32 %v5326_v1, %v502_v19  ;;  %v4289_v13 = vpop.f32.mrb[30].mxu0 }
 0x118   :  { %8208 = vst [vmem:[#allocation34_spill] sm:$0xff] %v5753_v46  ;;  %8210 = vst [vmem:[#allocation36_spill] sm:$0xff] %v5762_v33  ;;  %v710_v58 = vmax.f32 %v508_v35, 0.0  ;;  %v1197_v27 = vrot.slane %v5707_v49, 2  ;;  %v5771_v48 = vmax.f32 %v5463_v6, %v5486_v43  ;;  %v5777_v30 = vadd.f32 %v5495_v28, %v5326_v1  ;;  %v512_v29 = vpop.f32.mrb[31].mxu0 }
 0x119   :  { %v5773_v7 = vmax.f32 %v1015_v53, %v1017_v63  ;;  %v859_v8 = vrot.slane %v707_v62, 1  ;;  %v603_v40 = vadd.f32 %v5326_v1, %v5508_v44  ;;  %v709_v25 = vmax.f32 %v503_v21, 0.0 }
 0x11a   :  { %8211 = vst [vmem:[#allocation37_spill] sm:$0xff] %v5771_v48  ;;  %v865_v38 = vrot.slane %v710_v58, 1  ;;  %v518_v19 = vadd.f32 %v4289_v13, %v5326_v1  ;;  %v8127_v57 = vmax.f32 %v5777_v30, 0.0  ;;  %1483 = vrot.lane.b32.xlu1 %v5707_v49, %s5024_s0 }
 0x11b   :  { %8212 = vst [vmem:[#allocation38_spill] sm:$0xff] %v5773_v7  ;;  %v860_v6 = vsel %vm807_vm4, %v857_v9, %v859_v8  ;;  %v862_v53 = vsel %vm807_vm4, %v859_v8, %v861_v52  ;;  %v513_v7 = vadd.f32 %v5326_v1, %v512_v29  ;;  %1375 = vrot.lane.b32.xlu0 %v1262_v3, %s5026_s15  ;;  %v863_v21 = vrot.slane %v709_v25, 1  ;;  %v4292_v33 = vpop.f32.mrb[32].mxu0 }
 0x11c   :  { %v5790_v28 = vmax.f32 %v706_v23, %v860_v6  ;;  %v1019_v44 = vmax.f32 %v707_v62, %v862_v53  ;;  %v712_v35 = vmax.f32 %v518_v19, 0.0  ;;  %v5794_v9 = vrot.slane %v8127_v57, 1  ;;  %v522_v3 = vpop.f32.mrb[33].mxu0  ;;  %v5803_v19 = vpop.f32.mrb[24].mxu1 }
 0x11d   :  { %v711_v13 = vmax.f32 %v513_v7, 0.0  ;;  %v729_v8 = vmax.f32 %v603_v40, 0.0  ;;  %v864_v31 = vsel %vm807_vm4, %v861_v52, %v863_v21  ;;  %v866_v49 = vsel %vm807_vm4, %v863_v21, %v865_v38 }
 0x11e   :  { %8213 = vst [vmem:[#allocation39_spill] sm:$0xff] %v5790_v28  ;;  %v5796_v29 = vmax.f32 %v1017_v63, %v1019_v44  ;;  %v869_v14 = vrot.slane %v712_v35, 1  ;;  %v5800_v23 = vmax.f32 %v708_v41, %v864_v31  ;;  %v1021_v62 = vmax.f32 %v709_v25, %v866_v49  ;;  %1551 = vrot.lane.b32.xlu1 %v5753_v46, %s5024_s0  ;;  %v5818_v41 = vpop.f32.mrb[25].mxu1 }
 0x11f   :  { %v867_v6 = vrot.slane %v711_v13, 1  ;;  %v528_v7 = vadd.f32 %v4292_v33, %v5326_v1  ;;  %1485 = vrot.lane.b32.xlu0 %v5731_v17, %s5024_s0  ;;  %v8216_v63 = vrot.slane %v5731_v17, 2  ;;  %v523_v40 = vadd.f32 %v5326_v1, %v522_v3 }
 0x120   :  { %8214 = vst [vmem:[#allocation40_spill] sm:$0xff] %v5796_v29  ;;  %8215 = vst [vmem:[#allocation41_spill] sm:$0xff] %v5800_v23  ;;  %v5813_v31 = vrot.slane %v729_v8, 1  ;;  %v8217_v49 = vrot.slane %v5531_v54, 2  ;;  %v5820_v25 = vmax.f32 %v1019_v44, %v1021_v62  ;;  %v8134_v44 = vrot.slane %v5771_v48, 2 }
 0x121   :  { %v1200_v52 = vsel %vm1187_vm5, %v1197_v27, %v8216_v63  ;;  %v868_v53 = vsel %vm807_vm4, %v865_v38, %v867_v6  ;;  %v870_v21 = vsel %vm807_vm4, %v867_v6, %v869_v14  ;;  %v714_v57 = vmax.f32 %v528_v7, 0.0 }
 0x122   :  { %v1198_v33 = vsel %vm1187_vm5, %v8217_v49, %v1197_v27  ;;  %v5824_v29 = vmax.f32 %v710_v58, %v868_v53  ;;  %v1023_v63 = vmax.f32 %v711_v13, %v870_v21  ;;  %v713_v23 = vmax.f32 %v523_v40, 0.0  ;;  %1665 = vrot.lane.b32.xlu1 %v1200_v52, %s5025_s14 }
 0x123   :  { %v906_v3 = vsel %vm807_vm4, %v5813_v31, %v5794_v9  ;;  %v873_v54 = vrot.slane %v714_v57, 1  ;;  %v1265_v27 = vrot.slane %v5753_v46, 2  ;;  %1553 = vrot.lane.b32.xlu0 %v5771_v48, %s5024_s0  ;;  %v828_v13 = vsel %vm807_vm4, %v5443_v50, %v5550_v34 }
 0x124   :  { %v5829_v28 = vmax.f32 %v729_v8, %v906_v3  ;;  %v5836_v58 = vmax.f32 %v1021_v62, %v1023_v63  ;;  %v871_v38 = vrot.slane %v713_v23, 1  ;;  %v896_v8 = vsel %vm807_vm4, %v5451_v55, %v5499_v11 }
 0x125   :  { %v876_v6 = vsel %vm807_vm4, %v873_v54, %v5353_v24  ;;  %v8218_v7 = vmax.f32 %v5404_v15, 0.0  ;;  %v8219_v49 = vmax.f32 %v5407_v16, 0.0  ;;  %v5852_v62 = vmax.f32 %v5497_v5, %v5578_v45 }
 0x126   :  { %v5854_v21 = vmax.f32 %v714_v57, %v876_v6  ;;  %v872_v34 = vsel %vm807_vm4, %v869_v14, %v871_v38  ;;  %v874_v50 = vsel %vm807_vm4, %v871_v38, %v873_v54  ;;  %v5860_v55 = vmax.f32 %v5486_v43, %v5533_v10  ;;  %1313 = vrot.lane.b32.xlu1 %v1200_v52, %s5026_s15  ;;  %v8227_v38 = vld [vmem:[#allocation12_spill] sm:$0xff] }
 0x127   :  { %v1002_v40 = vmax.f32 %v8218_v7, %v828_v13  ;;  %v1036_v53 = vmax.f32 %v8219_v49, %v896_v8  ;;  %v5862_v24 = vmax.f32 %v712_v35, %v872_v34  ;;  %v1025_v15 = vmax.f32 %v713_v23, %v874_v50  ;;  %1663 = vrot.lane.b32.xlu0 %v1198_v33, %s5025_s14  ;;  %v8232_v34 = vld [vmem:[#allocation9_spill] sm:$0xff] }
 0x128   :  { %8220 = vst [vmem:[#allocation42_spill] sm:$0xff] %v5860_v55  ;;  %v5872_v5 = vmax.f32 %v5854_v21, %v5482_v37  ;;  %v5878_v43 = vadd.f32 %v5537_v22, %v5326_v1  ;;  %v613_v54 = vadd.f32 %v5326_v1, %v5548_v56  ;;  %v832_v57 = vsel %vm807_vm4, %v5512_v47, %v5584_v4 }
 0x129   :  { %v5865_v16 = vmax.f32 %v5688_v60, %v1002_v40  ;;  %v5868_v11 = vmax.f32 %v5737_v26, %v1036_v53  ;;  %v5882_v60 = vmax.f32 %v1023_v63, %v1025_v15  ;;  %v5885_v14 = vmax.f32 %v1025_v15, %v5363_v36 }
 0x12a   :  { %v8135_v26 = vmax.f32 %v5878_v43, 0.0  ;;  %v731_v37 = vmax.f32 %v613_v54, 0.0  ;;  %v1268_v22 = vsel %vm1187_vm5, %v1265_v27, %v8134_v44  ;;  %v8224_v35 = vmax.f32 %v5458_v61, 0.0 }
 0x12b   :  { %8221 = vst [vmem:[#allocation43_spill] sm:$0xff] %v5868_v11  ;;  %8222 = vst [vmem:[#allocation44_spill] sm:$0xff] %v5882_v60  ;;  %1733 = vrot.lane.b32.xlu1 %v1268_v22, %s5025_s14  ;;  %1311 = vrot.lane.b32.xlu0 %v1198_v33, %s5026_s15  ;;  %v900_v47 = vsel %vm807_vm4, %v5493_v39, %v5616_v0  ;;  %v8225_v52 = vmax.f32 %v5461_v51, 0.0  ;;  %v5911_v61 = vmax.f32 %v5578_v45, %v5610_v59  ;;  %v8228_v0 = vld [vmem:[#allocation15_spill] sm:$0xff]  ;;  %v8229_v51 = vld [vmem:[#allocation13_spill] sm:$0xff] }
 0x12c   :  { %8223 = vst [vmem:[#allocation45_spill] sm:$0xff] %v5885_v14  ;;  %v1004_v23 = vmax.f32 %v8224_v35, %v832_v57  ;;  %v5900_v36 = vrot.slane %v8135_v26, 1  ;;  %v907_v56 = vrot.slane %v731_v37, 1  ;;  %v5915_v33 = vmax.f32 %v5533_v10, %v5642_v32  ;;  %v8235_v57 = vld [vmem:[#allocation10_spill] sm:$0xff] }
 0x12d   :  { %v1038_v63 = vmax.f32 %v8225_v52, %v900_v47  ;;  %v5921_v13 = vadd.f32 %v8227_v38, %v5326_v1  ;;  %v623_v39 = vadd.f32 %v5326_v1, %v8228_v0  ;;  %v836_v8 = vsel %vm807_vm4, %v8229_v51, %v5655_v20  ;;  %v8234_v20 = vld [vmem:[#allocation18_spill] sm:$0xff] }
 0x12e   :  { %v5905_v4 = vmax.f32 %v1002_v40, %v1004_v23  ;;  %8226 = vst [vmem:[#allocation46_spill] sm:$0xff] %v5915_v33  ;;  %v910_v3 = vsel %vm807_vm4, %v907_v56, %v5900_v36  ;;  %v8230_v45 = vrot.slane %v5595_v12, 2  ;;  %v8233_v50 = vmax.f32 %v8232_v34, 0.0  ;;  %v8242_v34 = vld [vmem:[#allocation22_spill] sm:$0xff]  ;;  %v8253_v12 = vld [vmem:[#allocation21_spill] sm:$0xff] }
 0x12f   :  { %v5931_v10 = vmax.f32 %v731_v37, %v910_v3  ;;  %v5933_v7 = vmax.f32 %v1036_v53, %v1038_v63  ;;  %1381 = vrot.lane.b32.xlu1 %v1268_v22, %s5026_s15  ;;  %v8132_v40 = vmax.f32 %v5921_v13, 0.0  ;;  %v733_v49 = vmax.f32 %v623_v39, 0.0  ;;  %v8239_v3 = vld [vmem:[#allocation19_spill] sm:$0xff] }
 0x130   :  { %v1266_v6 = vsel %vm1187_vm5, %v8230_v45, %v1265_v27  ;;  %v1006_v15 = vmax.f32 %v8233_v50, %v836_v8  ;;  %v904_v54 = vsel %vm807_vm4, %v8234_v20, %v5813_v31  ;;  %v8236_v22 = vmax.f32 %v8235_v57, 0.0  ;;  %v2015_v20 = vld [vmem:[%s8083_s3 + $0x8] sm:$0xff]  ;;  %v8243_v57 = vld [vmem:[#allocation17_spill] sm:$0xff] }
 0x131   :  { %8231 = vst [vmem:[#allocation12_spill] sm:$0xff] %v5933_v7  ;;  %1731 = vrot.lane.b32.xlu0 %v1266_v6, %s5025_s14  ;;  %v5945_v27 = vrot.slane %v8132_v40, 1  ;;  %v911_v53 = vrot.slane %v733_v49, 1  ;;  %v5953_v47 = vmax.f32 %v5610_v59, %v5674_v2  ;;  %v5957_v52 = vmax.f32 %v5642_v32, %v5829_v28  ;;  %v8240_v59 = vld [vmem:[#allocation20_spill] sm:$0xff] }
 0x132   :  { %v5947_v37 = vmax.f32 %v1004_v23, %v1006_v15  ;;  %v1040_v35 = vmax.f32 %v8236_v22, %v904_v54  ;;  %v638_v38 = vadd.f32 %v8239_v3, %v5326_v1  ;;  %v633_v39 = vadd.f32 %v5326_v1, %v8240_v59 }
 0x133   :  { %8237 = vst [vmem:[#allocation15_spill] sm:$0xff] %v5957_v52  ;;  %1487 = vrot.lane.b32.xlu1 %v5865_v16, %s5024_s0  ;;  %v914_v31 = vsel %vm807_vm4, %v911_v53, %v5945_v27  ;;  %v8133_v32 = vrot.slane %v5852_v62, 2  ;;  %v1201_v8 = vrot.slane %v5865_v16, 2  ;;  %v8244_v22 = vmax.f32 %v8243_v57, 0.0  ;;  %v8249_v57 = vld [vmem:[#allocation25_spill] sm:$0xff] }
 0x134   :  { %v5964_v23 = vmax.f32 %v1038_v63, %v1040_v35  ;;  %v5968_v0 = vmax.f32 %v733_v49, %v914_v31  ;;  %v736_v51 = vmax.f32 %v638_v38, 0.0  ;;  %v735_v45 = vmax.f32 %v633_v39, 0.0  ;;  %v2014_v49 = vld [vmem:[%s8083_s3] sm:$0xff]  ;;  %v8246_v38 = vld [vmem:[#allocation29_spill] sm:$0xff] }
 0x135   :  { %1379 = vrot.lane.b32.xlu0 %v1266_v6, %s5026_s15  ;;  %v8241_v6 = vld [vmem:[#allocation27_spill] sm:$0xff]  ;;  %v908_v63 = vsel %vm807_vm4, %v5794_v9, %v907_v56  ;;  %v8245_v9 = vmax.f32 %v5777_v30, 0.0  ;;  %v5995_v59 = vmax.f32 %v5674_v2, %v8246_v38  ;;  %v5999_v39 = vmax.f32 %v5829_v28, %v5931_v10  ;;  %v2016_v30 = vld [vmem:[%s8083_s3 + $0x10] sm:$0xff]  ;;  %v2017_v2 = vld [vmem:[%s8083_s3 + $0x18] sm:$0xff] }
 0x136   :  { %8238 = vst [vmem:[#allocation13_spill] sm:$0xff] %v5964_v23  ;;  %v840_v50 = vsel %vm807_vm4, %v8242_v34, %v8241_v6  ;;  %v917_v54 = vrot.slane %v736_v51, 1  ;;  %v915_v3 = vrot.slane %v735_v45, 1  ;;  %v8248_v34 = vld [vmem:[#allocation24_spill] sm:$0xff]  ;;  %v1204_v28 = vsel %vm1187_vm5, %v1201_v8, %v8133_v32  ;;  %v8251_v32 = vld [vmem:[#allocation26_spill] sm:$0xff] }
 0x137   :  { %1555 = vrot.lane.b32.xlu1 %v5868_v11, %s5024_s0  ;;  %v1008_v31 = vmax.f32 %v8244_v22, %v840_v50  ;;  %v1042_v56 = vmax.f32 %v8245_v9, %v908_v63  ;;  %8247 = vst [vmem:[#allocation9_spill] sm:$0xff] %v5999_v39  ;;  %v6005_v40 = vadd.f32 %v8248_v34, %v5326_v1  ;;  %v2018_v34 = vld [vmem:[%s8083_s3 + $0x20] sm:$0xff]  ;;  %v1269_v26 = vrot.slane %v5868_v11, 2 }
 0x138   :  { %v643_v50 = vadd.f32 %v5326_v1, %v8249_v57  ;;  %v4560_v22 = vpack.c.bf16 %v2015_v20, %v2014_v49  ;;  %v2019_v57 = vld [vmem:[%s8083_s3 + $0x28] sm:$0xff]  ;;  %v844_v44 = vsel %vm807_vm4, %v8251_v32, %v5701_v42  ;;  %v8254_v14 = vmax.f32 %v8253_v12, 0.0  ;;  %v2021_v12 = vld [vmem:[%s8083_s3 + $0x38] sm:$0xff] }
 0x139   :  { %1489 = vrot.lane.b32.xlu0 %v5852_v62, %s5024_s0  ;;  %v6001_v6 = vmax.f32 %v1006_v15, %v1008_v31  ;;  %v918_v15 = vsel %vm807_vm4, %v915_v3, %v917_v54  ;;  %v6019_v63 = vmax.f32 %v1040_v35, %v1042_v56  ;;  %v738_v20 = vmax.f32 %v6005_v40, 0.0 }
 0x13a   :  { %v1047_v49 = vmax.f32 %v735_v45, %v918_v15  ;;  %v737_v9 = vmax.f32 %v643_v50, 0.0  ;;  %4561 = vmatprep.subr.bf16.mxu1 %v4560_v22  ;;  %v4564_v35 = vpack.c.bf16 %v2017_v2, %v2016_v30  ;;  %v1271_v45 = vrot.slane %v5860_v55, 2 }
 0x13b   :  { %8250 = vst [vmem:[#allocation18_spill] sm:$0xff] %v6019_v63  ;;  %1669 = vrot.lane.b32.xlu1 %v1204_v28, %s5025_s14  ;;  %v921_v40 = vrot.slane %v738_v20, 1  ;;  %4563 = vmatpush3.bf16.msra.mxu1 %v4560_v22  ;;  %v8252_v15 = vrot.slane %v5731_v17, 2  ;;  %v1010_v60 = vmax.f32 %v8254_v14, %v844_v44  ;;  %v4568_v30 = vpack.c.bf16 %v2019_v57, %v2018_v34 }
 0x13c   :  { %v919_v50 = vrot.slane %v737_v9, 1  ;;  %4565 = vmatprep.subr.bf16.mxu1 %v4564_v35  ;;  %v912_v22 = vsel %vm807_vm4, %v5900_v36, %v911_v53  ;;  %v1272_v34 = vsel %vm1187_vm5, %v1269_v26, %v1271_v45  ;;  %v6062_v36 = vmax.f32 %v8246_v38, %v5721_v18  ;;  %v8259_v38 = vld [vmem:[#allocation30_spill] sm:$0xff] }
 0x13d   :  { %1557 = vrot.lane.b32.xlu0 %v5860_v55, %s5024_s0  ;;  %v1202_v46 = vsel %vm1187_vm5, %v8252_v15, %v1201_v8  ;;  %v2020_v8 = vld [vmem:[%s8083_s3 + $0x30] sm:$0xff]  ;;  %v6053_v2 = vmax.f32 %v1008_v31, %v1010_v60  ;;  %v6066_v53 = vmax.f32 %v5931_v10, %v5968_v0  ;;  %v653_v57 = vadd.f32 %v5326_v1, %v5818_v41  ;;  %v8261_v15 = vld [vmem:[#allocation23_spill] sm:$0xff] }
 0x13e   :  { %v920_v42 = vsel %vm807_vm4, %v917_v54, %v919_v50  ;;  %v922_v32 = vsel %vm807_vm4, %v919_v50, %v921_v40  ;;  %v8263_v41 = vld [vmem:[#allocation32_spill] sm:$0xff] }
 0x13f   :  { %1317 = vrot.lane.b32.xlu1 %v1204_v28, %s5026_s15  ;;  %v1048_v44 = vmax.f32 %v736_v51, %v920_v42  ;;  %v1049_v14 = vmax.f32 %v737_v9, %v922_v32  ;;  %v8255_v28 = vmax.f32 %v5878_v43, 0.0  ;;  %4567 = vmatpush3.bf16.msra.mxu1 %v4564_v35  ;;  %8256 = vst [vmem:[#allocation10_spill] sm:$0xff] %v6066_v53  ;;  %v8260_v35 = vld [vmem:[#allocation28_spill] sm:$0xff]  ;;  %v739_v50 = vmax.f32 %v653_v57, 0.0 }
 0x140   :  { %v6070_v51 = vadd.f32 %v5803_v19, %v5326_v1  ;;  %4569 = vmatprep.subr.bf16.mxu1 %v4568_v30  ;;  %v4572_v9 = vpack.c.bf16 %v2021_v12, %v2020_v8  ;;  %v848_v19 = vsel %vm807_vm4, %v8260_v35, %v8259_v38  ;;  %v8262_v42 = vmax.f32 %v8261_v15, 0.0 }
 0x141   :  { %1667 = vrot.lane.b32.xlu0 %v1202_v46, %s5025_s14  ;;  %v1044_v54 = vmax.f32 %v8255_v28, %v912_v22  ;;  %v6072_v31 = vmax.f32 %v1047_v49, %v1049_v14  ;;  %v916_v1 = vsel %vm807_vm4, %v5945_v27, %v915_v3  ;;  %v8264_v22 = vrot.slane %v5771_v48, 2 }
 0x142   :  { %v8140_v10 = vmax.f32 %v6070_v51, 0.0  ;;  %v1012_v32 = vmax.f32 %v8262_v42, %v848_v19  ;;  %v923_v12 = vrot.slane %v739_v50, 1  ;;  %v6106_v27 = vmax.f32 %v5968_v0, %v1047_v49 }
 0x143   :  { %8257 = vst [vmem:[#allocation19_spill] sm:$0xff] %v6072_v31  ;;  %v6074_v43 = vmax.f32 %v1042_v56, %v1044_v54  ;;  %1737 = vrot.lane.b32.xlu1 %v1272_v34, %s5025_s14  ;;  %4571 = vmatpush3.bf16.msra.mxu1 %v4568_v30  ;;  %v1270_v8 = vsel %vm1187_vm5, %v8264_v22, %v1269_v26  ;;  %v8265_v30 = vmax.f32 %v5921_v13, 0.0  ;;  %v8268_v13 = vld [vmem:[#allocation36_spill] sm:$0xff]  ;;  %v1273_v15 = vrot.slane %v5933_v7, 2  ;;  %v8271_v22 = vld [vmem:[#allocation41_spill] sm:$0xff] }
 0x144   :  { %v6088_v56 = vrot.slane %v8140_v10, 1  ;;  %4573 = vmatprep.subr.bf16.mxu1 %v4572_v9  ;;  %v6099_v28 = vmax.f32 %v1010_v60, %v1012_v32  ;;  %v924_v38 = vsel %vm807_vm4, %v921_v40, %v923_v12  ;;  %v6132_v49 = vmax.f32 %v5862_v24, %v5854_v21 }
 0x145   :  { %8258 = vst [vmem:[#allocation20_spill] sm:$0xff] %v6074_v43  ;;  %1315 = vrot.lane.b32.xlu0 %v1202_v46, %s5026_s15  ;;  %v6094_v46 = vmax.f32 %v5721_v18, %v8263_v41  ;;  %v1046_v57 = vmax.f32 %v8265_v30, %v916_v1  ;;  %v8266_v18 = vld [vmem:[#allocation33_spill] sm:$0xff]  ;;  %v6114_v60 = vmax.f32 %v738_v20, %v924_v38  ;;  %v1205_v20 = vrot.slane %v5905_v4, 2 }
 0x146   :  { %v6109_v3 = vmax.f32 %v1012_v32, %v8266_v18  ;;  %v926_v26 = vsel %vm807_vm4, %v923_v12, %v6088_v56  ;;  %v6122_v19 = vmax.f32 %v8266_v18, %v8268_v13  ;;  %v1207_v40 = vrot.slane %v5911_v61, 2  ;;  %v8270_v32 = vld [vmem:[#allocation39_spill] sm:$0xff] }
 0x147   :  { %1385 = vrot.lane.b32.xlu1 %v1272_v34, %s5026_s15  ;;  %4575 = vmatpush3.bf16.msra.mxu1 %v4572_v9  ;;  %v6116_v34 = vmax.f32 %v739_v50, %v926_v26  ;;  %v6118_v35 = vmax.f32 %v1044_v54, %v1046_v57  ;;  %v6140_v54 = vmax.f32 %v1046_v57, %v1048_v44  ;;  %v8269_v21 = vrot.slane %v5852_v62, 2 }
 0x148   :  { %v6143_v9 = vmax.f32 %v1048_v44, %v6114_v60  ;;  %v1275_v42 = vrot.slane %v5915_v33, 2  ;;  %v6156_v1 = vmax.f32 %v8268_v13, %v8270_v32  ;;  %v1274_v41 = vsel %vm1187_vm5, %v1271_v45, %v1273_v15 }
 0x149   :  { %1735 = vrot.lane.b32.xlu0 %v1270_v8, %s5025_s14  ;;  %8267 = vst [vmem:[#allocation27_spill] sm:$0xff] %v6118_v35  ;;  %v6128_v0 = vmax.f32 %v1049_v14, %v6116_v34  ;;  %v1208_v14 = vsel %vm1187_vm5, %v1205_v20, %v1207_v40  ;;  %v1206_v50 = vsel %vm1187_vm5, %v8269_v21, %v1205_v20  ;;  %v1209_v12 = vrot.slane %v5947_v37, 2 }
 0x14a   :  { %v1276_v44 = vsel %vm1187_vm5, %v1273_v15, %v1275_v42  ;;  %v1211_v30 = vrot.slane %v5953_v47, 2  ;;  %v1277_v13 = vrot.slane %v5964_v23, 2  ;;  %v1279_v20 = vrot.slane %v5957_v52, 2 }
 0x14b   :  { %1491 = vrot.lane.b32.xlu1 %v5905_v4, %s5024_s0  ;;  %v1210_v26 = vsel %vm1187_vm5, %v1207_v40, %v1209_v12 }
 0x14c   :  { %v1212_v57 = vsel %vm1187_vm5, %v1209_v12, %v1211_v30  ;;  %v1280_v15 = vsel %vm1187_vm5, %v1277_v13, %v1279_v20 }
 0x14d   :  { %1383 = vrot.lane.b32.xlu0 %v1270_v8, %s5026_s15  ;;  %v6170_v8 = vmax.f32 %v8270_v32, %v8271_v22 }
 0x14f   :  { %1559 = vrot.lane.b32.xlu1 %v5933_v7, %s5024_s0 }
 0x151   :  { %1493 = vrot.lane.b32.xlu0 %v5911_v61, %s5024_s0 }
 0x153   :  { %1673 = vrot.lane.b32.xlu1 %v1208_v14, %s5025_s14 }
 0x155   :  { %1561 = vrot.lane.b32.xlu0 %v5915_v33, %s5024_s0  ;;  %v1283_v33 = vrot.slane %v5999_v39, 2 }
 0x157   :  { %1321 = vrot.lane.b32.xlu1 %v1208_v14, %s5026_s15  ;;  %v6196_v14 = vmax.f32 %v8271_v22, %v5824_v29 }
 0x159   :  { %1671 = vrot.lane.b32.xlu0 %v1206_v50, %s5025_s14 }
 0x15b   :  { %1741 = vrot.lane.b32.xlu1 %v1276_v44, %s5025_s14 }
 0x15d   :  { %1319 = vrot.lane.b32.xlu0 %v1206_v50, %s5026_s15 }
 0x15f   :  { %1389 = vrot.lane.b32.xlu1 %v1276_v44, %s5026_s15  ;;  %v1278_v44 = vsel %vm1187_vm5, %v1275_v42, %v1277_v13  ;;  %v1215_v42 = vrot.slane %v5995_v59, 2  ;;  %v6223_v13 = vmax.f32 %v5824_v29, %v5862_v24 }
 0x161   :  { %1739 = vrot.lane.b32.xlu0 %v1274_v41, %s5025_s14 }
 0x163   :  { %1495 = vrot.lane.b32.xlu1 %v5947_v37, %s5024_s0 }
 0x164   :  { %v6181_v45 = vpop.permute.xlu0 %1541 }
 0x165   :  { %1387 = vrot.lane.b32.xlu0 %v1274_v41, %s5026_s15 }
 0x167   :  { %1563 = vrot.lane.b32.xlu1 %v5964_v23, %s5024_s0  ;;  %v1281_v23 = vrot.slane %v6019_v63, 2 }
 0x169   :  { %1497 = vrot.lane.b32.xlu0 %v5953_v47, %s5024_s0  ;;  %v1284_v11 = vsel %vm1187_vm5, %v1281_v23, %v1283_v33 }
 0x16b   :  { %1677 = vrot.lane.b32.xlu1 %v1212_v57, %s5025_s14  ;;  %v6189_v38 = vpop.permute.xlu0 %1545 }
 0x16c   :  { %v6187_v18 = vpop.permute.xlu1 %1543  ;;  %8272 = vst [vmem:[#allocation22_spill] sm:$0xff] %v6189_v38 }
 0x16d   :  { %1565 = vrot.lane.b32.xlu0 %v5957_v52, %s5024_s0 }
 0x16f   :  { %1325 = vrot.lane.b32.xlu1 %v1212_v57, %s5026_s15 }
 0x170   :  { %v6200_v21 = vpop.permute.xlu1 %1725  ;;  %v1304_v50 = vpop.permute.xlu0 %1303 }
 0x171   :  { %1675 = vrot.lane.b32.xlu0 %v1210_v26, %s5025_s14  ;;  %8273 = vst [vmem:[#allocation17_spill] sm:$0xff] %v6200_v21  ;;  %v8296_v21 = vrot.slane %v6094_v46, 2 }
 0x173   :  { %1745 = vrot.lane.b32.xlu1 %v1280_v15, %s5025_s14 }
 0x174   :  { %v6205_v40 = vpop.permute.xlu1 %1373  ;;  %v1306_v32 = vpop.permute.xlu0 %1305 }
 0x175   :  { %1323 = vrot.lane.b32.xlu0 %v1210_v26, %s5026_s15  ;;  %8274 = vst [vmem:[#allocation29_spill] sm:$0xff] %v6205_v40  ;;  %v1213_v26 = vrot.slane %v6001_v6, 2 }
 0x177   :  { %1393 = vrot.lane.b32.xlu1 %v1280_v15, %s5026_s15  ;;  %v1216_v10 = vsel %vm1187_vm5, %v1213_v26, %v1215_v42  ;;  %v1214_v24 = vsel %vm1187_vm5, %v1211_v30, %v1213_v26  ;;  %v1282_v26 = vsel %vm1187_vm5, %v1279_v20, %v1281_v23  ;;  %v1217_v23 = vrot.slane %v6053_v2, 2  ;;  %v8284_v20 = vld [vmem:[#allocation2_spill] sm:$0xff] }
 0x178   :  { %v1482_v41 = vpop.permute.xlu1 %1481  ;;  %v6210_v22 = vpop.permute.xlu0 %1723 }
 0x179   :  { %1743 = vrot.lane.b32.xlu0 %v1278_v44, %s5025_s14 }
 0x17b   :  { %1499 = vrot.lane.b32.xlu1 %v6001_v6, %s5024_s0 }
 0x17c   :  { %v6215_v12 = vpop.permute.xlu1 %1547  ;;  %v6217_v57 = vpop.permute.xlu0 %1371 }
 0x17d   :  { %1391 = vrot.lane.b32.xlu0 %v1278_v44, %s5026_s15  ;;  %8275 = vst [vmem:[#allocation24_spill] sm:$0xff] %v6215_v12  ;;  %8276 = vst [vmem:[#allocation25_spill] sm:$0xff] %v6217_v57  ;;  %v8295_v12 = vld [vmem:[#allocation11_spill] sm:$0xff] }
 0x17f   :  { %1567 = vrot.lane.b32.xlu1 %v6019_v63, %s5024_s0 }
 0x180   :  { %v6229_v15 = vpop.permute.xlu1 %1309  ;;  %v6231_v44 = vpop.permute.xlu0 %1549 }
 0x181   :  { %1501 = vrot.lane.b32.xlu0 %v5995_v59, %s5024_s0  ;;  %8277 = vst [vmem:[#allocation26_spill] sm:$0xff] %v6231_v44 }
 0x183   :  { %1681 = vrot.lane.b32.xlu1 %v1216_v10, %s5025_s14 }
 0x184   :  { %v6237_v52 = vpop.permute.xlu1 %1729 }
 0x185   :  { %1569 = vrot.lane.b32.xlu0 %v5999_v39, %s5024_s0  ;;  %8278 = vst [vmem:[#allocation21_spill] sm:$0xff] %v6237_v52  ;;  %v6239_v29 = vpop.permute.xlu0 %1307  ;;  %v8286_v52 = vrot.slane %v6062_v36, 2 }
 0x187   :  { %1329 = vrot.lane.b32.xlu1 %v1216_v10, %s5026_s15  ;;  %v1220_v44 = vsel %vm1187_vm5, %v1217_v23, %v8286_v52  ;;  %v1285_v52 = vrot.slane %v6074_v43, 2 }
 0x188   :  { %v6246_v7 = vpop.permute.xlu1 %1377 }
 0x189   :  { %1679 = vrot.lane.b32.xlu0 %v1214_v24, %s5025_s14  ;;  %8279 = vst [vmem:[#allocation30_spill] sm:$0xff] %v6246_v7  ;;  %v6248_v55 = vpop.permute.xlu0 %1727  ;;  %v1838_v7 = vsel %vm1837_vm6, %v8284_v20, %v1304_v50 }
 0x18a   :  { %8280 = vst [vmem:[#allocation28_spill] sm:$0xff] %v6248_v55 }
 0x18b   :  { %1749 = vrot.lane.b32.xlu1 %v1284_v11, %s5025_s14 }
 0x18c   :  { %v1484_v48 = vpop.permute.xlu1 %1483 }
 0x18d   :  { %1327 = vrot.lane.b32.xlu0 %v1214_v24, %s5026_s15  ;;  %v6253_v30 = vpop.permute.xlu0 %1375 }
 0x18e   :  { %8281 = vst [vmem:[#allocation23_spill] sm:$0xff] %v6253_v30  ;;  %v8285_v30 = vld [vmem:[#allocation7_spill] sm:$0xff] }
 0x18f   :  { %1397 = vrot.lane.b32.xlu1 %v1284_v11, %s5026_s15  ;;  %v1839_v40 = vsel %vm1837_vm6, %v8285_v30, %v1306_v32  ;;  %v1218_v32 = vsel %vm1187_vm5, %v1215_v42, %v1217_v23  ;;  %v5021_v23 = vld [vmem:[%s8082_s2] ss:$0 sm:$0xff] }
 0x190   :  { %v6258_v10 = vpop.permute.xlu1 %1551  ;;  %v1898_v57 = vsel %vm1896_vm7, %v1839_v40, %v1484_v48  ;;  %v8150_v48 = vrot.slane %v6066_v53, 2 }
 0x191   :  { %1747 = vrot.lane.b32.xlu0 %v1282_v26, %s5025_s14  ;;  %8282 = vst [vmem:[#allocation32_spill] sm:$0xff] %v6258_v10  ;;  %v6260_v39 = vpop.permute.xlu0 %1485 }
 0x193   :  { %1503 = vrot.lane.b32.xlu1 %v6053_v2, %s5024_s0 }
 0x194   :  { %v1666_v24 = vpop.permute.xlu1 %1665 }
 0x195   :  { %1395 = vrot.lane.b32.xlu0 %v1282_v26, %s5026_s15  ;;  %v6265_v63 = vpop.permute.xlu0 %1553  ;;  %v1897_v26 = vsel %vm1896_vm7, %v1838_v7, %v1482_v41  ;;  %v1957_v7 = vsel %vm1955_vm8, %v1898_v57, %v1666_v24  ;;  %v1288_v57 = vsel %vm1187_vm5, %v1285_v52, %v8150_v48  ;;  %v1286_v24 = vsel %vm1187_vm5, %v1283_v33, %v1285_v52 }
 0x196   :  { %8283 = vst [vmem:[#allocation33_spill] sm:$0xff] %v6265_v63 }
 0x197   :  { %1571 = vrot.lane.b32.xlu1 %v6074_v43, %s5024_s0 }
 0x198   :  { %v6276_v10 = vpop.permute.xlu1 %1313 }
 0x199   :  { %1505 = vrot.lane.b32.xlu0 %v6062_v36, %s5024_s0  ;;  %v1664_v63 = vpop.permute.xlu0 %1663 }
 0x19a   :  { %v1956_v11 = vsel %vm1955_vm8, %v1897_v26, %v1664_v63 }
 0x19b   :  { %1685 = vrot.lane.b32.xlu1 %v1220_v44, %s5025_s14  ;;  %4354 = vmatprep.mubr.msk.f32.mxu1 %vm2029_vm9, %v1956_v11 }
 0x19c   :  { %4355 = vmatmul.mubr.msk.f32.vlgmr.msra.gmra.mrb[30].mxu1 %vm2029_vm9, %v1957_v7 }
 0x19d   :  { %1573 = vrot.lane.b32.xlu0 %v6066_v53, %s5024_s0  ;;  %v6291_v50 = vpop.permute.xlu1 %1733  ;;  %v6293_v63 = vpop.permute.xlu0 %1311 }
 0x19e   :  { %8287 = vst [vmem:[#allocation36_spill] sm:$0xff] %v6291_v50 }
 0x19f   :  { %1333 = vrot.lane.b32.xlu1 %v1220_v44, %s5026_s15  ;;  %v4334_v44 = vpop.f32.mrb[26].mxu1 }
 0x1a0   :  { %v668_v11 = vadd.f32 %v5021_v23, %v4334_v44  ;;  %v662_v20 = vpop.f32.mrb[27].mxu1 }
 0x1a1   :  { %1683 = vrot.lane.b32.xlu0 %v1218_v32, %s5025_s14  ;;  %v6300_v40 = vpop.permute.xlu1 %1381 }
 0x1a2   :  { %8288 = vst [vmem:[#allocation39_spill] sm:$0xff] %v6300_v40  ;;  %v6321_v48 = vmax.f32 %v668_v11, 0.0  ;;  %v1221_v40 = vrot.slane %v6099_v28, 2 }
 0x1a3   :  { %v6302_v41 = vpop.permute.xlu0 %1731  ;;  %1753 = vrot.lane.b32.xlu1 %v1288_v57, %s5025_s14 }
 0x1a4   :  { %8289 = vst [vmem:[#allocation41_spill] sm:$0xff] %v6302_v41  ;;  %v929_v52 = vrot.slane %v6321_v48, 1 }
 0x1a5   :  { %1331 = vrot.lane.b32.xlu0 %v1218_v32, %s5026_s15  ;;  %v1488_v42 = vpop.permute.xlu1 %1487  ;;  %v663_v32 = vadd.f32 %v5021_v23, %v662_v20  ;;  %v8293_v20 = vld [vmem:[#allocation3_spill] sm:$0xff] }
 0x1a7   :  { %v6309_v30 = vpop.permute.xlu0 %1379  ;;  %1401 = vrot.lane.b32.xlu1 %v1288_v57, %s5026_s15  ;;  %v741_v33 = vmax.f32 %v663_v32, 0.0  ;;  %v1840_v32 = vsel %vm1837_vm6, %v8293_v20, %v6239_v29  ;;  %v1224_v29 = vsel %vm1187_vm5, %v1221_v40, %v8296_v21 }
 0x1a8   :  { %8290 = vst [vmem:[#allocation2_spill] sm:$0xff] %v6309_v30 }
 0x1a9   :  { %1751 = vrot.lane.b32.xlu0 %v1286_v24, %s5025_s14  ;;  %v6317_v26 = vpop.permute.xlu1 %1555  ;;  %v927_v44 = vrot.slane %v741_v33, 1 }
 0x1aa   :  { %8291 = vst [vmem:[#allocation7_spill] sm:$0xff] %v6317_v26  ;;  %v1899_v26 = vsel %vm1896_vm7, %v1840_v32, %v6260_v39  ;;  %v4337_v39 = vpop.f32.mrb[28].mxu1 }
 0x1ab   :  { %v6319_v7 = vpop.permute.xlu0 %1489  ;;  %1507 = vrot.lane.b32.xlu1 %v6099_v28, %s5024_s0  ;;  %v930_v11 = vsel %vm807_vm4, %v927_v44, %v929_v52 }
 0x1ac   :  { %v1053_v50 = vmax.f32 %v741_v33, %v930_v11  ;;  %v1289_v11 = vrot.slane %v6118_v35, 2 }
 0x1ad   :  { %1399 = vrot.lane.b32.xlu0 %v1286_v24, %s5026_s15  ;;  %v1670_v57 = vpop.permute.xlu1 %1669  ;;  %v928_v24 = vsel %vm807_vm4, %v6088_v56, %v927_v44  ;;  %v1841_v56 = vsel %vm1837_vm6, %v8295_v12, %v6229_v15  ;;  %v672_v12 = vpop.f32.mrb[29].mxu1  ;;  %v8153_v15 = vrot.slane %v6106_v27, 2 }
 0x1af   :  { %v6327_v43 = vpop.permute.xlu0 %1557  ;;  %1575 = vrot.lane.b32.xlu1 %v6118_v35, %s5024_s0 }
 0x1b0   :  { %8292 = vst [vmem:[#allocation47_spill] sm:$0xff] %v6327_v43  ;;  %v8294_v43 = vmax.f32 %v6070_v51, 0.0  ;;  %v6355_v51 = vmax.f32 %v6116_v34, %v1053_v50 }
 0x1b1   :  { %1509 = vrot.lane.b32.xlu0 %v6094_v46, %s5024_s0  ;;  %v6345_v41 = vpop.permute.xlu1 %1317 }
 0x1b2   :  { %v1052_v30 = vmax.f32 %v8294_v43, %v928_v24  ;;  %v1900_v43 = vsel %vm1896_vm7, %v1841_v56, %v1488_v42  ;;  %v673_v42 = vadd.f32 %v5021_v23, %v672_v12  ;;  %v1054_v56 = vmax.f32 %v6321_v48, %v929_v52 }
 0x1b3   :  { %v1668_v55 = vpop.permute.xlu0 %1667  ;;  %1689 = vrot.lane.b32.xlu1 %v1224_v29, %s5025_s14  ;;  %v1959_v33 = vsel %vm1955_vm8, %v1900_v43, %v1670_v57 }
 0x1b4   :  { %v1958_v44 = vsel %vm1955_vm8, %v1899_v26, %v1668_v55  ;;  %v678_v55 = vadd.f32 %v5021_v23, %v4337_v39  ;;  %v8298_v26 = vrot.slane %v6062_v36, 2  ;;  %v6374_v20 = vmax.f32 %v6114_v60, %v1052_v30 }
 0x1b5   :  { %1577 = vrot.lane.b32.xlu0 %v6106_v27, %s5024_s0  ;;  %4357 = vmatprep.mubr.msk.f32.mxu1 %vm2029_vm9, %v1958_v44  ;;  %v6364_v21 = vpop.permute.xlu1 %1737  ;;  %v743_v32 = vmax.f32 %v673_v42, 0.0 }
 0x1b6   :  { %4358 = vmatmul.mubr.msk.f32.gmra.mrb[32].mxu1 %vm2029_vm9, %v1959_v33  ;;  %8297 = vst [vmem:[#allocation3_spill] sm:$0xff] %v6364_v21  ;;  %v1222_v24 = vsel %vm1187_vm5, %v8298_v26, %v1221_v40  ;;  %v744_v57 = vmax.f32 %v678_v55, 0.0  ;;  %v6386_v40 = vsel %vm1187_vm5, %v1289_v11, %v8153_v15  ;;  %v8302_v15 = vrot.slane %v6066_v53, 2 }
 0x1b7   :  { %v6366_v34 = vpop.permute.xlu0 %1315  ;;  %1337 = vrot.lane.b32.xlu1 %v1224_v29, %s5026_s15  ;;  %v1057_v39 = vrot.slane %v743_v32, 1 }
 0x1b8   :  { %v1059_v44 = vrot.slane %v744_v57, 1 }
 0x1b9   :  { %1687 = vrot.lane.b32.xlu0 %v1222_v24, %s5025_s14  ;;  %v6379_v43 = vpop.permute.xlu1 %1385  ;;  %v1058_v29 = vsel %vm807_vm4, %v929_v52, %v1057_v39 }
 0x1ba   :  { %8299 = vst [vmem:[#allocation11_spill] sm:$0xff] %v6379_v43  ;;  %v1066_v60 = vmax.f32 %v744_v57, %v1059_v44  ;;  %v1060_v33 = vsel %vm807_vm4, %v1057_v39, %v1059_v44  ;;  %v1064_v12 = vmax.f32 %v6321_v48, %v1058_v29  ;;  %v6401_v57 = vsel %vm1187_vm5, %v8302_v15, %v1289_v11 }
 0x1bb   :  { %v6381_v23 = vpop.permute.xlu0 %1735  ;;  %1757 = vrot.lane.b32.xlu1 %v6386_v40, %s5025_s14  ;;  %v1065_v42 = vmax.f32 %v743_v32, %v1060_v33  ;;  %v1225_v43 = vrot.slane %v6109_v3, 2  ;;  %v8306_v29 = vrot.slane %v6094_v46, 2 }
 0x1bc   :  { %8300 = vst [vmem:[#allocation48_spill] sm:$0xff] %v6381_v23  ;;  %v6393_v55 = vmax.f32 %v1054_v56, %v1066_v60  ;;  %v6415_v11 = vmax.f32 %v1052_v30, %v1064_v12 }
 0x1bd   :  { %1335 = vrot.lane.b32.xlu0 %v1222_v24, %s5026_s15  ;;  %v1492_v26 = vpop.permute.xlu1 %1491  ;;  %v8303_v24 = vld [vmem:[#allocation35_spill] sm:$0xff]  ;;  %v6405_v52 = vmax.f32 %v1053_v50, %v1065_v42  ;;  %v8155_v50 = vrot.slane %v6355_v51, 2  ;;  %v1226_v33 = vsel %vm1187_vm5, %v8306_v29, %v1225_v43  ;;  %v8307_v42 = vld [vmem:[#allocation8_spill] sm:$0xff] }
 0x1be   :  { %v1227_v21 = vrot.slane %v8303_v24, 2  ;;  %v1657_v44 = vrot.slane %v6415_v11, 2  ;;  %v1842_v53 = vsel %vm1837_vm6, %v8307_v42, %v6293_v63  ;;  %v1233_v42 = vrot.slane %v6156_v1, 2 }
 0x1bf   :  { %v6396_v35 = vpop.permute.xlu0 %1383  ;;  %1511 = vrot.lane.b32.xlu1 %v6109_v3, %s5024_s0  ;;  %v1659_v15 = vrot.slane %v6405_v52, 2 }
 0x1c0   :  { %8301 = vst [vmem:[#allocation49_spill] sm:$0xff] %v6396_v35  ;;  %v1228_v56 = vsel %vm1187_vm5, %v1225_v43, %v1227_v21  ;;  %v6430_v30 = vsel %vm1187_vm5, %v8155_v50, %v1657_v44  ;;  %v8308_v50 = vld [vmem:[#allocation31_spill] sm:$0xff]  ;;  %v8309_v35 = vld [vmem:[#allocation38_spill] sm:$0xff] }
 0x1c1   :  { %1755 = vrot.lane.b32.xlu0 %v6401_v57, %s5025_s14  ;;  %v6411_v48 = vpop.permute.xlu1 %1559  ;;  %v6433_v12 = vsel %vm1187_vm5, %v1657_v44, %v1659_v15  ;;  %v1231_v23 = vrot.slane %v8309_v35, 2 }
 0x1c2   :  { %8304 = vst [vmem:[#allocation35_spill] sm:$0xff] %v6411_v48  ;;  %v1843_v48 = vsel %vm1837_vm6, %v8308_v50, %v6276_v10 }
 0x1c3   :  { %v1494_v32 = vpop.permute.xlu0 %1493  ;;  %1693 = vrot.lane.b32.xlu1 %v1228_v56, %s5025_s14  ;;  %v1902_v38 = vsel %vm1896_vm7, %v1843_v48, %v1492_v26 }
 0x1c5   :  { %1513 = vrot.lane.b32.xlu0 %v8303_v24, %s5024_s0  ;;  %v1674_v39 = vpop.permute.xlu1 %1673 }
 0x1c6   :  { %v1961_v63 = vsel %vm1955_vm8, %v1902_v38, %v1674_v39 }
 0x1c7   :  { %v6422_v60 = vpop.permute.xlu0 %1561  ;;  %1341 = vrot.lane.b32.xlu1 %v1228_v56, %s5026_s15  ;;  %v1229_v56 = vrot.slane %v6122_v19, 2 }
 0x1c8   :  { %8305 = vst [vmem:[#allocation50_spill] sm:$0xff] %v6422_v60  ;;  %v1901_v60 = vsel %vm1896_vm7, %v1842_v53, %v6319_v7  ;;  %v8156_v53 = vrot.slane %v6393_v55, 2 }
 0x1c9   :  { %1691 = vrot.lane.b32.xlu0 %v1226_v33, %s5025_s14  ;;  %v6442_v43 = vpop.permute.xlu1 %1321  ;;  %v1232_v50 = vsel %vm1187_vm5, %v1229_v56, %v1231_v23  ;;  %v1230_v39 = vsel %vm1187_vm5, %v1227_v21, %v1229_v56 }
 0x1ca   :  { %v6469_v26 = vsel %vm1187_vm5, %v1659_v15, %v8156_v53  ;;  %v1234_v53 = vsel %vm1187_vm5, %v1231_v23, %v1233_v42  ;;  %v1237_v23 = vrot.slane %v6170_v8, 2 }
 0x1cb   :  { %v1672_v29 = vpop.permute.xlu0 %1671  ;;  %1515 = vrot.lane.b32.xlu1 %v6122_v19, %s5024_s0 }
 0x1cc   :  { %v1960_v44 = vsel %vm1955_vm8, %v1901_v60, %v1672_v29  ;;  %v8314_v29 = vld [vmem:[#allocation40_spill] sm:$0xff] }
 0x1cd   :  { %1339 = vrot.lane.b32.xlu0 %v1226_v33, %s5026_s15  ;;  %4360 = vmatprep.mubr.msk.f32.mxu1 %vm2029_vm9, %v1960_v44  ;;  %v6458_v10 = vpop.permute.xlu1 %1741  ;;  %v1235_v44 = vrot.slane %v8314_v29, 2 }
 0x1ce   :  { %4361 = vmatmul.mubr.msk.f32.gmra.mrb[34].mxu1 %vm2029_vm9, %v1961_v63  ;;  %8310 = vst [vmem:[#allocation8_spill] sm:$0xff] %v6458_v10  ;;  %v1845_v10 = vsel %vm1837_vm6, %v5865_v16, %v6345_v41 }
 0x1cf   :  { %v6460_v7 = vpop.permute.xlu0 %1319  ;;  %1697 = vrot.lane.b32.xlu1 %v1232_v50, %s5025_s14  ;;  %v1236_v21 = vsel %vm1187_vm5, %v1233_v42, %v1235_v44  ;;  %v1239_v42 = vrot.slane %v5820_v25, 2 }
 0x1d1   :  { %1517 = vrot.lane.b32.xlu0 %v8309_v35, %s5024_s0  ;;  %v6471_v38 = vpop.permute.xlu1 %1389 }
 0x1d2   :  { %8311 = vst [vmem:[#allocation31_spill] sm:$0xff] %v6471_v38 }
 0x1d3   :  { %v6473_v48 = vpop.permute.xlu0 %1739  ;;  %1345 = vrot.lane.b32.xlu1 %v1232_v50, %s5026_s15 }
 0x1d4   :  { %8312 = vst [vmem:[#allocation38_spill] sm:$0xff] %v6473_v48 }
 0x1d5   :  { %1695 = vrot.lane.b32.xlu0 %v1230_v39, %s5025_s14  ;;  %v1496_v60 = vpop.permute.xlu1 %1495 }
 0x1d7   :  { %v6478_v33 = vpop.permute.xlu0 %1387  ;;  %1519 = vrot.lane.b32.xlu1 %v6156_v1, %s5024_s0 }
 0x1d8   :  { %8313 = vst [vmem:[#allocation51_spill] sm:$0xff] %v6478_v33 }
 0x1d9   :  { %1343 = vrot.lane.b32.xlu0 %v1230_v39, %s5026_s15  ;;  %v6485_v15 = vpop.permute.xlu1 %1563  ;;  %v1844_v39 = vsel %vm1837_vm6, %v5731_v17, %v6366_v34  ;;  %v1240_v34 = vsel %vm1187_vm5, %v1237_v23, %v1239_v42 }
 0x1da   :  { %8315 = vst [vmem:[#allocation40_spill] sm:$0xff] %v6485_v15  ;;  %v1903_v38 = vsel %vm1896_vm7, %v1844_v39, %v1494_v32 }
 0x1db   :  { %v1498_v63 = vpop.permute.xlu0 %1497  ;;  %1701 = vrot.lane.b32.xlu1 %v1236_v21, %s5025_s14 }
 0x1dd   :  { %1521 = vrot.lane.b32.xlu0 %v8314_v29, %s5024_s0  ;;  %v1678_v56 = vpop.permute.xlu1 %1677 }
 0x1df   :  { %v6491_v50 = vpop.permute.xlu0 %1565  ;;  %1349 = vrot.lane.b32.xlu1 %v1236_v21, %s5026_s15  ;;  %v1904_v21 = vsel %vm1896_vm7, %v1845_v10, %v1496_v60  ;;  %v1238_v10 = vsel %vm1187_vm5, %v1235_v44, %v1237_v23 }
 0x1e0   :  { %8316 = vst [vmem:[#allocation52_spill] sm:$0xff] %v6491_v50  ;;  %v1963_v17 = vsel %vm1955_vm8, %v1904_v21, %v1678_v56  ;;  %v1243_v56 = vrot.slane %v5836_v58, 2 }
 0x1e1   :  { %1699 = vrot.lane.b32.xlu0 %v1234_v53, %s5025_s14  ;;  %v6500_v15 = vpop.permute.xlu1 %1325 }
 0x1e3   :  { %v1676_v33 = vpop.permute.xlu0 %1675  ;;  %1523 = vrot.lane.b32.xlu1 %v6170_v8, %s5024_s0 }
 0x1e4   :  { %v1962_v50 = vsel %vm1955_vm8, %v1903_v38, %v1676_v33  ;;  %v1241_v33 = vrot.slane %v6196_v14, 2 }
 0x1e5   :  { %1347 = vrot.lane.b32.xlu0 %v1234_v53, %s5026_s15  ;;  %4363 = vmatprep.mubr.msk.f32.mxu1 %vm2029_vm9, %v1962_v50  ;;  %v6515_v16 = vpop.permute.xlu1 %1745 }
 0x1e6   :  { %4364 = vmatmul.mubr.msk.f32.gmra.mrb[36].mxu1 %vm2029_vm9, %v1963_v17  ;;  %8317 = vst [vmem:[#allocation53_spill] sm:$0xff] %v6515_v16  ;;  %v1244_v44 = vsel %vm1187_vm5, %v1241_v33, %v1243_v56  ;;  %v1242_v17 = vsel %vm1187_vm5, %v1239_v42, %v1241_v33  ;;  %v1245_v33 = vrot.slane %v6223_v13, 2 }
 0x1e7   :  { %v6517_v41 = vpop.permute.xlu0 %1323  ;;  %1705 = vrot.lane.b32.xlu1 %v1240_v34, %s5025_s14 }
 0x1e9   :  { %1525 = vrot.lane.b32.xlu0 %v5820_v25, %s5024_s0  ;;  %v6523_v32 = vpop.permute.xlu1 %1393 }
 0x1ea   :  { %8318 = vst [vmem:[#allocation54_spill] sm:$0xff] %v6523_v32 }
 0x1eb   :  { %v6525_v53 = vpop.permute.xlu0 %1743  ;;  %1353 = vrot.lane.b32.xlu1 %v1240_v34, %s5026_s15  ;;  %v1846_v34 = vsel %vm1837_vm6, %v5852_v62, %v6460_v7 }
 0x1ec   :  { %8319 = vst [vmem:[#allocation55_spill] sm:$0xff] %v6525_v53 }
 0x1ed   :  { %1703 = vrot.lane.b32.xlu0 %v1238_v10, %s5025_s14  ;;  %v1500_v38 = vpop.permute.xlu1 %1499 }
 0x1ef   :  { %v6530_v60 = vpop.permute.xlu0 %1391  ;;  %1527 = vrot.lane.b32.xlu1 %v6196_v14, %s5024_s0 }
 0x1f0   :  { %8320 = vst [vmem:[#allocation56_spill] sm:$0xff] %v6530_v60  ;;  %v1847_v60 = vsel %vm1837_vm6, %v5905_v4, %v6442_v43  ;;  %v8324_v4 = vld [vmem:[#allocation44_spill] sm:$0xff] }
 0x1f1   :  { %1351 = vrot.lane.b32.xlu0 %v1238_v10, %s5026_s15  ;;  %v6537_v50 = vpop.permute.xlu1 %1567  ;;  %v1905_v10 = vsel %vm1896_vm7, %v1846_v34, %v1498_v63  ;;  %v1906_v42 = vsel %vm1896_vm7, %v1847_v60, %v1500_v38  ;;  %v1253_v60 = vrot.slane %v5872_v5, 2 }
 0x1f2   :  { %8321 = vst [vmem:[#allocation57_spill] sm:$0xff] %v6537_v50 }
 0x1f3   :  { %v1502_v39 = vpop.permute.xlu0 %1501  ;;  %1709 = vrot.lane.b32.xlu1 %v1244_v44, %s5025_s14 }
 0x1f5   :  { %1529 = vrot.lane.b32.xlu0 %v5836_v58, %s5024_s0  ;;  %v1682_v23 = vpop.permute.xlu1 %1681 }
 0x1f6   :  { %v1965_v62 = vsel %vm1955_vm8, %v1906_v42, %v1682_v23  ;;  %v1247_v42 = vrot.slane %v8324_v4, 2 }
 0x1f7   :  { %v6543_v21 = vpop.permute.xlu0 %1569  ;;  %1357 = vrot.lane.b32.xlu1 %v1244_v44, %s5026_s15 }
 0x1f8   :  { %8322 = vst [vmem:[#allocation58_spill] sm:$0xff] %v6543_v21 }
 0x1f9   :  { %1707 = vrot.lane.b32.xlu0 %v1242_v17, %s5025_s14  ;;  %v6552_v32 = vpop.permute.xlu1 %1329 }
 0x1fb   :  { %v1680_v50 = vpop.permute.xlu0 %1679  ;;  %1539 = vrot.lane.b32.xlu1 %v5872_v5, %s5024_s0 }
 0x1fc   :  { %v1964_v21 = vsel %vm1955_vm8, %v1905_v10, %v1680_v50  ;;  %v8327_v50 = vld [vmem:[#allocation45_spill] sm:$0xff]  ;;  %v1246_v10 = vsel %vm1187_vm5, %v1243_v56, %v1245_v33  ;;  %v1248_v56 = vsel %vm1187_vm5, %v1245_v33, %v1247_v42 }
 0x1fd   :  { %1355 = vrot.lane.b32.xlu0 %v1242_v17, %s5026_s15  ;;  %4366 = vmatprep.mubr.msk.f32.mxu1 %vm2029_vm9, %v1964_v21  ;;  %v6565_v7 = vpop.permute.xlu1 %1749  ;;  %v8329_v21 = vld [vmem:[#allocation4_spill] sm:$0xff]  ;;  %v1251_v16 = vrot.slane %v8327_v50, 2 }
 0x1fe   :  { %4367 = vmatmul.mubr.msk.f32.gmra.mrb[38].mxu1 %vm2029_vm9, %v1965_v62  ;;  %8323 = vst [vmem:[#allocation59_spill] sm:$0xff] %v6565_v7  ;;  %v8330_v17 = vrot.slane %v8329_v21, 2  ;;  %v1249_v62 = vrot.slane %v6132_v49, 2 }
 0x1ff   :  { %v6567_v63 = vpop.permute.xlu0 %1327  ;;  %1531 = vrot.lane.b32.xlu1 %v6223_v13, %s5024_s0  ;;  %v1254_v21 = vsel %vm1187_vm5, %v1251_v16, %v1253_v60 }
 0x200   :  { %v1256_v34 = vsel %vm1187_vm5, %v1253_v60, %v8330_v17 }
 0x201   :  { %1533 = vrot.lane.b32.xlu0 %v8324_v4, %s5024_s0  ;;  %v6573_v43 = vpop.permute.xlu1 %1397 }
 0x202   :  { %8325 = vst [vmem:[#allocation44_spill] sm:$0xff] %v6573_v43 }
 0x203   :  { %v6575_v38 = vpop.permute.xlu0 %1747  ;;  %1535 = vrot.lane.b32.xlu1 %v6132_v49, %s5024_s0 }
 0x204   :  { %8326 = vst [vmem:[#allocation60_spill] sm:$0xff] %v6575_v38  ;;  %v1250_v38 = vsel %vm1187_vm5, %v1247_v42, %v1249_v62  ;;  %v1252_v42 = vsel %vm1187_vm5, %v1249_v62, %v1251_v16  ;;  %v1293_v16 = vrot.slane %v6140_v54, 2 }
 0x205   :  { %1537 = vrot.lane.b32.xlu0 %v8327_v50, %s5024_s0  ;;  %v1504_v44 = vpop.permute.xlu1 %1503 }
 0x207   :  { %v6583_v23 = vpop.permute.xlu0 %1395  ;;  %1721 = vrot.lane.b32.xlu1 %v1256_v34, %s5025_s14 }
 0x208   :  { %8328 = vst [vmem:[#allocation45_spill] sm:$0xff] %v6583_v23 }
 0x209   :  { %1711 = vrot.lane.b32.xlu0 %v1246_v10, %s5025_s14  ;;  %v6593_v43 = vpop.permute.xlu1 %1571 }
 0x20a   :  { %8331 = vst [vmem:[#allocation61_spill] sm:$0xff] %v6593_v43  ;;  %v1848_v43 = vsel %vm1837_vm6, %v5911_v61, %v6517_v41 }
 0x20b   :  { %v1506_v7 = vpop.permute.xlu0 %1505  ;;  %1369 = vrot.lane.b32.xlu1 %v1256_v34, %s5026_s15  ;;  %v1907_v53 = vsel %vm1896_vm7, %v1848_v43, %v1502_v39  ;;  %v8333_v43 = vrot.slane %v6106_v27, 2 }
 0x20d   :  { %1715 = vrot.lane.b32.xlu0 %v1250_v38, %s5025_s14  ;;  %v1686_v17 = vpop.permute.xlu1 %1685  ;;  %v1294_v60 = vsel %vm1187_vm5, %v8333_v43, %v1293_v16 }
 0x20f   :  { %v6598_v23 = vpop.permute.xlu0 %1573  ;;  %1713 = vrot.lane.b32.xlu1 %v1248_v56, %s5025_s14 }
 0x210   :  { %8332 = vst [vmem:[#allocation62_spill] sm:$0xff] %v6598_v23  ;;  %v1849_v23 = vsel %vm1837_vm6, %v5947_v37, %v6500_v15 }
 0x211   :  { %1359 = vrot.lane.b32.xlu0 %v1246_v10, %s5026_s15  ;;  %v6608_v34 = vpop.permute.xlu1 %1333  ;;  %v1908_v10 = vsel %vm1896_vm7, %v1849_v23, %v1504_v44  ;;  %v1295_v44 = vrot.slane %v6072_v31, 2 }
 0x212   :  { %v1967_v61 = vsel %vm1955_vm8, %v1908_v10, %v1686_v17 }
 0x213   :  { %v1684_v48 = vpop.permute.xlu0 %1683  ;;  %1717 = vrot.lane.b32.xlu1 %v1252_v42, %s5025_s14  ;;  %v1296_v62 = vsel %vm1187_vm5, %v1293_v16, %v1295_v44 }
 0x214   :  { %v1966_v33 = vsel %vm1955_vm8, %v1907_v53, %v1684_v48 }
 0x215   :  { %1719 = vrot.lane.b32.xlu0 %v1254_v21, %s5025_s14  ;;  %4369 = vmatprep.mubr.msk.f32.mxu1 %vm2029_vm9, %v1966_v33  ;;  %v6622_v41 = vpop.permute.xlu1 %1753  ;;  %v1850_v33 = vsel %vm1837_vm6, %v5953_v47, %v6567_v63  ;;  %v1301_v63 = vrot.slane %v6374_v20, 2 }
 0x216   :  { %4370 = vmatmul.mubr.msk.f32.gmra.mrb[40].mxu1 %vm2029_vm9, %v1967_v61 }
 0x217   :  { %v1332_v37 = vpop.permute.xlu0 %1331  ;;  %1361 = vrot.lane.b32.xlu1 %v1248_v56, %s5026_s15  ;;  %v1297_v56 = vrot.slane %v6143_v9, 2 }
 0x219   :  { %1363 = vrot.lane.b32.xlu0 %v1250_v38, %s5026_s15  ;;  %v6626_v48 = vpop.permute.xlu1 %1401  ;;  %v1298_v43 = vsel %vm1187_vm5, %v1295_v44, %v1297_v56 }
 0x21b   :  { %v6628_v15 = vpop.permute.xlu0 %1751  ;;  %1365 = vrot.lane.b32.xlu1 %v1252_v42, %s5026_s15  ;;  %v1909_v42 = vsel %vm1896_vm7, %v1850_v33, %v1506_v7 }
 0x21d   :  { %1367 = vrot.lane.b32.xlu0 %v1254_v21, %s5026_s15  ;;  %v1508_v53 = vpop.permute.xlu1 %1507 }
 0x21f   :  { %v6633_v39 = vpop.permute.xlu0 %1399  ;;  %1579 = vrot.lane.b32.xlu1 %v6140_v54, %s5024_s0 }
 0x221   :  { %1759 = vrot.lane.b32.xlu0 %v1294_v60, %s5025_s14  ;;  %v6642_v38 = vpop.permute.xlu1 %1575 }
 0x223   :  { %v1510_v23 = vpop.permute.xlu0 %1509  ;;  %1761 = vrot.lane.b32.xlu1 %v1296_v62, %s5025_s14 }
 0x225   :  { %1403 = vrot.lane.b32.xlu0 %v6401_v57, %s5026_s15  ;;  %v1690_v21 = vpop.permute.xlu1 %1689  ;;  %v1851_v57 = vsel %vm1837_vm6, %v6001_v6, %v6552_v32 }
 0x227   :  { %v6648_v17 = vpop.permute.xlu0 %1577  ;;  %1405 = vrot.lane.b32.xlu1 %v6386_v40, %s5026_s15  ;;  %v1299_v40 = vrot.slane %v6128_v0, 2 }
 0x229   :  { %1581 = vrot.lane.b32.xlu0 %v6072_v31, %s5024_s0  ;;  %v1338_v10 = vpop.permute.xlu1 %1337  ;;  %v1910_v31 = vsel %vm1896_vm7, %v1851_v57, %v1508_v53  ;;  %v1300_v7 = vsel %vm1187_vm5, %v1297_v56, %v1299_v40 }
 0x22a   :  { %v1969_v47 = vsel %vm1955_vm8, %v1910_v31, %v1690_v21  ;;  %v1302_v31 = vsel %vm1187_vm5, %v1299_v40, %v1301_v63 }
 0x22b   :  { %v1688_v61 = vpop.permute.xlu0 %1687  ;;  %1583 = vrot.lane.b32.xlu1 %v6143_v9, %s5024_s0 }
 0x22c   :  { %v1968_v16 = vsel %vm1955_vm8, %v1909_v42, %v1688_v61 }
 0x22d   :  { %1763 = vrot.lane.b32.xlu0 %v1298_v43, %s5025_s14  ;;  %4372 = vmatprep.mubr.msk.f32.mxu1 %vm2029_vm9, %v1968_v16  ;;  %v6672_v6 = vpop.permute.xlu1 %1757  ;;  %v8334_v16 = vrot.slane %v6355_v51, 2 }
 0x22e   :  { %4373 = vmatmul.mubr.msk.f32.gmra.mrb[42].mxu1 %vm2029_vm9, %v1969_v47 }
 0x22f   :  { %v1336_v32 = vpop.permute.xlu0 %1335  ;;  %1765 = vrot.lane.b32.xlu1 %v1300_v7, %s5025_s14  ;;  %v1656_v40 = vsel %vm1187_vm5, %v1301_v63, %v8334_v16 }
 0x231   :  { %1407 = vrot.lane.b32.xlu0 %v1294_v60, %s5026_s15  ;;  %v1512_v53 = vpop.permute.xlu1 %1511  ;;  %v1852_v60 = vsel %vm1837_vm6, %v5995_v59, %v1332_v37 }
 0x232   :  { %v1911_v56 = vsel %vm1896_vm7, %v1852_v60, %v1510_v23 }
 0x233   :  { %v6678_v44 = vpop.permute.xlu0 %1755  ;;  %1409 = vrot.lane.b32.xlu1 %v1296_v62, %s5026_s15  ;;  %v1853_v62 = vsel %vm1837_vm6, %v6053_v2, %v6608_v34 }
 0x234   :  { %v1912_v47 = vsel %vm1896_vm7, %v1853_v62, %v1512_v53 }
 0x235   :  { %1585 = vrot.lane.b32.xlu0 %v6128_v0, %s5024_s0  ;;  %v1694_v21 = vpop.permute.xlu1 %1693 }
 0x236   :  { %v1971_v59 = vsel %vm1955_vm8, %v1912_v47, %v1694_v21 }
 0x237   :  { %v1514_v33 = vpop.permute.xlu0 %1513  ;;  %1587 = vrot.lane.b32.xlu1 %v6374_v20, %s5024_s0 }
 0x239   :  { %1767 = vrot.lane.b32.xlu0 %v1302_v31, %s5025_s14  ;;  %v1342_v42 = vpop.permute.xlu1 %1341 }
 0x23b   :  { %v1692_v61 = vpop.permute.xlu0 %1691  ;;  %1769 = vrot.lane.b32.xlu1 %v1656_v40, %s5025_s14 }
 0x23c   :  { %v1970_v57 = vsel %vm1955_vm8, %v1911_v56, %v1692_v61 }
 0x23d   :  { %1411 = vrot.lane.b32.xlu0 %v1298_v43, %s5026_s15  ;;  %4375 = vmatprep.mubr.msk.f32.mxu1 %vm2029_vm9, %v1970_v57  ;;  %v1516_v37 = vpop.permute.xlu1 %1515  ;;  %v1854_v43 = vsel %vm1837_vm6, %v6062_v36, %v1336_v32  ;;  %v1857_v32 = vsel %vm1837_vm6, %v6109_v3, %v1342_v42  ;;  %v8335_v57 = vrot.slane %v6393_v55, 2 }
 0x23e   :  { %4376 = vmatmul.mubr.msk.f32.gmra.mrb[44].mxu1 %vm2029_vm9, %v1971_v59  ;;  %v1913_v53 = vsel %vm1896_vm7, %v1854_v43, %v1514_v33 }
 0x23f   :  { %v1340_v2 = vpop.permute.xlu0 %1339  ;;  %1413 = vrot.lane.b32.xlu1 %v1300_v7, %s5026_s15  ;;  %v1855_v7 = vsel %vm1837_vm6, %v6099_v28, %v1338_v10 }
 0x240   :  { %v1914_v56 = vsel %vm1896_vm7, %v1855_v7, %v1516_v37 }
 0x241   :  { %1589 = vrot.lane.b32.xlu0 %v6355_v51, %s5024_s0  ;;  %v1698_v34 = vpop.permute.xlu1 %1697 }
 0x243   :  { %v1518_v23 = vpop.permute.xlu0 %1517  ;;  %1591 = vrot.lane.b32.xlu1 %v6415_v11, %s5024_s0  ;;  %v1973_v11 = vsel %vm1955_vm8, %v1914_v56, %v1698_v34 }
 0x245   :  { %1771 = vrot.lane.b32.xlu0 %v6430_v30, %s5025_s14  ;;  %v1346_v21 = vpop.permute.xlu1 %1345 }
 0x246   :  { %v1859_v40 = vsel %vm1837_vm6, %v6122_v19, %v1346_v21 }
 0x247   :  { %v1696_v60 = vpop.permute.xlu0 %1695  ;;  %1773 = vrot.lane.b32.xlu1 %v6433_v12, %s5025_s14  ;;  %v1856_v12 = vsel %vm1837_vm6, %v6094_v46, %v1340_v2 }
 0x248   :  { %v1972_v51 = vsel %vm1955_vm8, %v1913_v53, %v1696_v60 }
 0x249   :  { %1415 = vrot.lane.b32.xlu0 %v1302_v31, %s5026_s15  ;;  %4378 = vmatprep.mubr.msk.f32.mxu1 %vm2029_vm9, %v1972_v51  ;;  %v1520_v36 = vpop.permute.xlu1 %1519  ;;  %v1915_v31 = vsel %vm1896_vm7, %v1856_v12, %v1518_v23 }
 0x24a   :  { %4379 = vmatmul.mubr.msk.f32.gmra.mrb[46].mxu1 %vm2029_vm9, %v1973_v11 }
 0x24b   :  { %v1344_v30 = vpop.permute.xlu0 %1343  ;;  %1417 = vrot.lane.b32.xlu1 %v1301_v63, %s5026_s15 }
 0x24c   :  { %v1858_v16 = vsel %vm1837_vm6, %v8303_v24, %v1344_v30 }
 0x24d   :  { %1593 = vrot.lane.b32.xlu0 %v6405_v52, %s5024_s0  ;;  %v1702_v28 = vpop.permute.xlu1 %1701  ;;  %v1916_v52 = vsel %vm1896_vm7, %v1857_v32, %v1520_v36 }
 0x24e   :  { %v1975_v62 = vsel %vm1955_vm8, %v1916_v52, %v1702_v28 }
 0x24f   :  { %v1522_v10 = vpop.permute.xlu0 %1521  ;;  %1595 = vrot.lane.b32.xlu1 %v6393_v55, %s5024_s0 }
 0x250   :  { %v1917_v47 = vsel %vm1896_vm7, %v1858_v16, %v1522_v10 }
 0x251   :  { %1775 = vrot.lane.b32.xlu0 %v6469_v26, %s5025_s14  ;;  %v1350_v63 = vpop.permute.xlu1 %1349 }
 0x252   :  { %v1861_v21 = vsel %vm1837_vm6, %v6156_v1, %v1350_v63 }
 0x253   :  { %v1700_v33 = vpop.permute.xlu0 %1699  ;;  %1777 = vrot.lane.b32.xlu1 %v8335_v57, %s5025_s14 }
 0x254   :  { %v1974_v61 = vsel %vm1955_vm8, %v1915_v31, %v1700_v33 }
 0x255   :  { %4381 = vmatprep.mubr.msk.f32.mxu1 %vm2029_vm9, %v1974_v61  ;;  %v1524_v46 = vpop.permute.xlu1 %1523 }
 0x256   :  { %4382 = vmatmul.mubr.msk.f32.gmra.mrb[48].mxu1 %vm2029_vm9, %v1975_v62  ;;  %v1918_v55 = vsel %vm1896_vm7, %v1859_v40, %v1524_v46 }
 0x257   :  { %v1348_v3 = vpop.permute.xlu0 %1347 }
 0x258   :  { %v1860_v19 = vsel %vm1837_vm6, %v8309_v35, %v1348_v3 }
 0x259   :  { %v1706_v26 = vpop.permute.xlu1 %1705 }
 0x25a   :  { %v1977_v34 = vsel %vm1955_vm8, %v1918_v55, %v1706_v26  ;;  %v6773_v26 = vld [vmem:[%s8084_s4] ss:$0 sm:$0xff] }
 0x25b   :  { %v1526_v42 = vpop.permute.xlu0 %1525 }
 0x25c   :  { %v1919_v60 = vsel %vm1896_vm7, %v1860_v19, %v1526_v42 }
 0x25d   :  { %v1354_v59 = vpop.permute.xlu1 %1353 }
 0x25e   :  { %v1863_v3 = vsel %vm1837_vm6, %v6170_v8, %v1354_v59 }
 0x25f   :  { %v1704_v37 = vpop.permute.xlu0 %1703 }
 0x260   :  { %v1976_v2 = vsel %vm1955_vm8, %v1917_v47, %v1704_v37 }
 0x261   :  { %4384 = vmatprep.mubr.msk.f32.mxu1 %vm2029_vm9, %v1976_v2  ;;  %v1528_v23 = vpop.permute.xlu1 %1527 }
 0x262   :  { %4385 = vmatmul.mubr.msk.f32.gmra.mrb[50].mxu1 %vm2029_vm9, %v1977_v34  ;;  %v1920_v56 = vsel %vm1896_vm7, %v1861_v21, %v1528_v23 }
 0x263   :  { %v1352_v43 = vpop.permute.xlu0 %1351 }
 0x264   :  { %v1862_v63 = vsel %vm1837_vm6, %v8314_v29, %v1352_v43 }
 0x265   :  { %v1710_v24 = vpop.permute.xlu1 %1709 }
 0x266   :  { %v1979_v36 = vsel %vm1955_vm8, %v1920_v56, %v1710_v24 }
 0x267   :  { %v1530_v53 = vpop.permute.xlu0 %1529 }
 0x268   :  { %v1921_v52 = vsel %vm1896_vm7, %v1862_v63, %v1530_v53 }
 0x269   :  { %v1358_v7 = vpop.permute.xlu1 %1357 }
 0x26b   :  { %v1708_v51 = vpop.permute.xlu0 %1707 }
 0x26c   :  { %v1978_v11 = vsel %vm1955_vm8, %v1919_v60, %v1708_v51 }
 0x26d   :  { %4387 = vmatprep.mubr.msk.f32.mxu1 %vm2029_vm9, %v1978_v11  ;;  %v1540_v30 = vpop.permute.xlu1 %1539 }
 0x26e   :  { %4388 = vmatmul.mubr.msk.f32.gmra.mrb[52].mxu1 %vm2029_vm9, %v1979_v36 }
 0x26f   :  { %v1356_v28 = vpop.permute.xlu0 %1355  ;;  %v4356_v35 = vpop.f32.mrb[30].mxu1 }
 0x270   :  { %v2270_v10 = vpop.f32.mrb[31].mxu1  ;;  %v1864_v29 = vsel %vm1837_vm6, %v5820_v25, %v1356_v28  ;;  %v6781_v55 = vadd.f32 %v4356_v35, %v6773_v26  ;;  %v1865_v25 = vsel %vm1837_vm6, %v6196_v14, %v1358_v7 }
 0x271   :  { %v1532_v12 = vpop.permute.xlu1 %1531  ;;  %v6790_v2 = vadd.f32 %v6773_v26, %v2270_v10 }
 0x272   :  { %v1922_v42 = vsel %vm1896_vm7, %v1863_v3, %v1532_v12 }
 0x273   :  { %v1534_v1 = vpop.permute.xlu0 %1533  ;;  %v2559_v14 = vmax.f32 %v6790_v2, 0.0 }
 0x274   :  { %v1923_v40 = vsel %vm1896_vm7, %v1864_v29, %v1534_v1 }
 0x275   :  { %v1536_v32 = vpop.permute.xlu1 %1535  ;;  %v2671_v10 = vrot.slane %v2559_v14, 2 }
 0x276   :  { %v1924_v34 = vsel %vm1896_vm7, %v1865_v25, %v1536_v32  ;;  %v8343_v25 = vld [vmem:[#allocation21_spill] sm:$0xff] }
 0x277   :  { %v1538_v31 = vpop.permute.xlu0 %1537 }
 0x279   :  { %v1722_v33 = vpop.permute.xlu1 %1721 }
 0x27b   :  { %v1712_v61 = vpop.permute.xlu0 %1711 }
 0x27c   :  { %v1980_v62 = vsel %vm1955_vm8, %v1921_v52, %v1712_v61  ;;  %v8336_v61 = vld [vmem:[#allocation22_spill] sm:$0xff] }
 0x27d   :  { %4390 = vmatprep.mubr.msk.f32.mxu1 %vm2029_vm9, %v1980_v62  ;;  %v1370_v57 = vpop.permute.xlu1 %1369 }
 0x27f   :  { %v1716_v46 = vpop.permute.xlu0 %1715 }
 0x280   :  { %v1982_v8 = vsel %vm1955_vm8, %v1923_v40, %v1716_v46  ;;  %v8338_v46 = vld [vmem:[#allocation24_spill] sm:$0xff]  ;;  %v8340_v40 = vld [vmem:[#allocation25_spill] sm:$0xff] }
 0x281   :  { %v1714_v16 = vpop.permute.xlu1 %1713 }
 0x282   :  { %v1981_v47 = vsel %vm1955_vm8, %v1922_v42, %v1714_v16 }
 0x283   :  { %v1360_v37 = vpop.permute.xlu0 %1359  ;;  %4391 = vmatmul.mubr.msk.f32.gmra.mrb[54].mxu1 %vm2029_vm9, %v1981_v47  ;;  %v8341_v47 = vld [vmem:[#allocation4_spill] sm:$0xff] }
 0x284   :  { %v1866_v59 = vsel %vm1837_vm6, %v5836_v58, %v1360_v37  ;;  %4393 = vmatprep.mubr.msk.f32.mxu1 %vm2029_vm9, %v1982_v8  ;;  %v2560_v58 = vmax.f32 %v6781_v55, 0.0  ;;  %v1872_v37 = vsel %vm1837_vm6, %v8341_v47, %v8340_v40  ;;  %v8342_v8 = vld [vmem:[#allocation26_spill] sm:$0xff] }
 0x285   :  { %v1718_v23 = vpop.permute.xlu1 %1717  ;;  %v1925_v24 = vsel %vm1896_vm7, %v1866_v59, %v1538_v31  ;;  %v1931_v59 = vsel %vm1896_vm7, %v1872_v37, %v8342_v8  ;;  %v8360_v40 = vld [vmem:[#allocation38_spill] sm:$0xff]  ;;  %v8361_v8 = vld [vmem:[#allocation39_spill] sm:$0xff] }
 0x286   :  { %v1983_v43 = vsel %vm1955_vm8, %v1924_v34, %v1718_v23  ;;  %v2672_v36 = vrot.slane %v2560_v58, 2  ;;  %v8344_v23 = vld [vmem:[#allocation41_spill] sm:$0xff] }
 0x287   :  { %v1720_v53 = vpop.permute.xlu0 %1719  ;;  %4394 = vmatmul.mubr.msk.f32.gmra.mrb[56].mxu1 %vm2029_vm9, %v1983_v43  ;;  %v1990_v43 = vsel %vm1955_vm8, %v1931_v59, %v8344_v23  ;;  %v8362_v59 = vld [vmem:[#allocation34_spill] sm:$0xff]  ;;  %v3440_v23 = vld [vmem:[%s8085_s5 + $0x8] sm:$0xff] }
 0x288   :  { %v1984_v19 = vsel %vm1955_vm8, %v1925_v24, %v1720_v53  ;;  %v8345_v53 = vld [vmem:[#allocation29_spill] sm:$0xff] }
 0x289   :  { %v4359_v21 = vpop.f32.mrb[32].mxu1  ;;  %4396 = vmatprep.mubr.msk.f32.mxu1 %vm2029_vm9, %v1984_v19  ;;  %v1362_v7 = vpop.permute.xlu1 %1361  ;;  %v8346_v19 = vld [vmem:[#allocation5_spill] sm:$0xff] }
 0x28a   :  { %v2280_v60 = vpop.f32.mrb[33].mxu1  ;;  %v1867_v56 = vsel %vm1837_vm6, %v6223_v13, %v1362_v7 }
 0x28b   :  { %v6802_v51 = vadd.f32 %v6773_v26, %v2280_v60  ;;  %v1364_v11 = vpop.permute.xlu0 %1363  ;;  %v1926_v28 = vsel %vm1896_vm7, %v1867_v56, %v1540_v30  ;;  %v1871_v30 = vsel %vm1837_vm6, %v5872_v5, %v1370_v57  ;;  %v8337_v57 = vld [vmem:[#allocation17_spill] sm:$0xff]  ;;  %v1873_v60 = vsel %vm1837_vm6, %v8346_v19, %v8345_v53  ;;  %v8347_v56 = vld [vmem:[#allocation23_spill] sm:$0xff] }
 0x28c   :  { %v1868_v35 = vsel %vm1837_vm6, %v8324_v4, %v1364_v11  ;;  %v1985_v32 = vsel %vm1955_vm8, %v1926_v28, %v1722_v33  ;;  %v1930_v3 = vsel %vm1896_vm7, %v1871_v30, %v8338_v46  ;;  %v8348_v11 = vld [vmem:[#allocation6_spill] sm:$0xff]  ;;  %v8349_v28 = vld [vmem:[#allocation32_spill] sm:$0xff]  ;;  %v8358_v46 = vld [vmem:[#allocation47_spill] sm:$0xff] }
 0x28d   :  { %v2561_v12 = vmax.f32 %v6802_v51, 0.0  ;;  %v1927_v1 = vsel %vm1896_vm7, %v1868_v35, %v6181_v45  ;;  %v1366_v13 = vpop.permute.xlu1 %1365  ;;  %4397 = vmatmul.mubr.msk.f32.gmra.mrb[58].mxu1 %vm2029_vm9, %v1985_v32  ;;  %v1989_v34 = vsel %vm1955_vm8, %v1930_v3, %v8343_v25  ;;  %v1932_v35 = vsel %vm1896_vm7, %v1873_v60, %v8349_v28  ;;  %v8351_v32 = vld [vmem:[#allocation36_spill] sm:$0xff]  ;;  %v8364_v53 = vld [vmem:[#allocation37_spill] sm:$0xff]  ;;  %v8365_v60 = vld [vmem:[#allocation35_spill] sm:$0xff] }
 0x28e   :  { %v1986_v31 = vsel %vm1955_vm8, %v1927_v1, %v6210_v22  ;;  %v1869_v63 = vsel %vm1837_vm6, %v6132_v49, %v1366_v13  ;;  %v2673_v22 = vsel %vm1187_vm5, %v2671_v10, %v2672_v36  ;;  %v8350_v10 = vld [vmem:[#allocation33_spill] sm:$0xff]  ;;  %v1991_v13 = vsel %vm1955_vm8, %v1932_v35, %v8351_v32  ;;  %v8367_v35 = vld [vmem:[#allocation8_spill] sm:$0xff] }
 0x28f   :  { %v6824_v4 = vrot.slane %v2561_v12, 2  ;;  %v1368_v52 = vpop.permute.xlu0 %1367  ;;  %4399 = vmatprep.mubr.msk.f32.mxu1 %vm2029_vm9, %v1986_v31  ;;  %v1928_v45 = vsel %vm1896_vm7, %v1869_v63, %v6187_v18  ;;  %v8352_v31 = vld [vmem:[#allocation48_spill] sm:$0xff]  ;;  %v1877_v25 = vsel %vm1837_vm6, %v8362_v59, %v8361_v8 }
 0x290   :  { %v1870_v33 = vsel %vm1837_vm6, %v8327_v50, %v1368_v52  ;;  %v1987_v49 = vsel %vm1955_vm8, %v1928_v45, %v8337_v57  ;;  %v8339_v50 = vld [vmem:[#allocation28_spill] sm:$0xff]  ;;  %v8353_v52 = vld [vmem:[#allocation30_spill] sm:$0xff]  ;;  %v8357_v57 = vld [vmem:[#allocation7_spill] sm:$0xff] }
 0x291   :  { %v2675_v5 = vsel %vm1187_vm5, %v2672_v36, %v6824_v4  ;;  %v1929_v62 = vsel %vm1896_vm7, %v1870_v33, %v8336_v61  ;;  %v6842_v29 = vpop.permute.xlu1 %1579  ;;  %4400 = vmatmul.mubr.msk.f32.gmra.mrb[60].mxu1 %vm2029_vm9, %v1987_v49  ;;  %v1874_v36 = vsel %vm1837_vm6, %v8348_v11, %v8347_v56  ;;  %v8354_v45 = vld [vmem:[#allocation14_spill] sm:$0xff]  ;;  %v8356_v61 = vld [vmem:[#allocation16_spill] sm:$0xff]  ;;  %v1936_v56 = vsel %vm1896_vm7, %v1877_v25, %v8365_v60 }
 0x292   :  { %v4616_v18 = vpack.i.bf16 %v2675_v5, %v2673_v22  ;;  %v1988_v42 = vsel %vm1955_vm8, %v1929_v62, %v8339_v50  ;;  %v1933_v1 = vsel %vm1896_vm7, %v1874_v36, %v8350_v10  ;;  %v1875_v33 = vsel %vm1837_vm6, %v8354_v45, %v8353_v52  ;;  %v8355_v5 = vld [vmem:[#allocation2_spill] sm:$0xff]  ;;  %v8374_v59 = vld [vmem:[#allocation52_spill] sm:$0xff] }
 0x293   :  { %v6847_v16 = vpop.permute.xlu0 %1759  ;;  %4402 = vmatprep.mubr.msk.f32.mxu1 %vm2029_vm9, %v1988_v42  ;;  %v1992_v30 = vsel %vm1955_vm8, %v1933_v1, %v8352_v31  ;;  %v1876_v62 = vsel %vm1837_vm6, %v8356_v61, %v8355_v5  ;;  %v1934_v49 = vsel %vm1896_vm7, %v1875_v33, %v8357_v57  ;;  %v6899_v42 = vadd.f32 %v4359_v21, %v6773_v26  ;;  %v3439_v21 = vld [vmem:[%s8085_s5] sm:$0xff]  ;;  %v8369_v33 = vld [vmem:[#allocation11_spill] sm:$0xff] }
 0x294   :  { %4617 = vrot.lane.b32.xlu0 %v4616_v18, %s5024_s0  ;;  %v1935_v3 = vsel %vm1896_vm7, %v1876_v62, %v8358_v46  ;;  %v8359_v18 = vld [vmem:[#allocation3_spill] sm:$0xff]  ;;  %v4576_v11 = vpack.c.bf16 %v3440_v23, %v3439_v21  ;;  %v8366_v36 = vld [vmem:[#allocation50_spill] sm:$0xff]  ;;  %v1995_v10 = vsel %vm1955_vm8, %v1936_v56, %v8367_v35  ;;  %v8376_v35 = vld [vmem:[#allocation60_spill] sm:$0xff] }
 0x295   :  { %v6860_v24 = vpop.permute.xlu1 %1761  ;;  %4403 = vmatmul.mubr.msk.f32.gmra.mrb[62].mxu1 %vm2029_vm9, %v1989_v34  ;;  %v1993_v50 = vsel %vm1955_vm8, %v1934_v49, %v8359_v18  ;;  %v1994_v47 = vsel %vm1955_vm8, %v1935_v3, %v8360_v40  ;;  %v2562_v1 = vmax.f32 %v6899_v42, 0.0  ;;  %v8370_v5 = vld [vmem:[#allocation43_spill] sm:$0xff]  ;;  %v8372_v57 = vld [vmem:[#allocation42_spill] sm:$0xff]  ;;  %v3441_v18 = vld [vmem:[%s8085_s5 + $0x10] sm:$0xff] }
 0x296   :  { %4405 = vmatprep.mubr.msk.f32.mxu1 %vm2029_vm9, %v1990_v43  ;;  %v8363_v43 = vld [vmem:[#allocation49_spill] sm:$0xff]  ;;  %4577 = vmatprep.subr.bf16.mxu0 %v4576_v11  ;;  %v1879_v61 = vsel %vm1837_vm6, %v8370_v5, %v8369_v33  ;;  %v8371_v62 = vld [vmem:[#allocation51_spill] sm:$0xff]  ;;  %v3443_v40 = vld [vmem:[%s8085_s5 + $0x20] sm:$0xff] }
 0x297   :  { %v6866_v7 = vpop.permute.xlu0 %1403  ;;  %v1878_v19 = vsel %vm1837_vm6, %v8364_v53, %v8363_v43  ;;  %v1880_v49 = vsel %vm1837_vm6, %v8372_v57, %v8371_v62  ;;  %4579 = vmatpush3.bf16.msra.mxu0 %v4576_v11  ;;  %v3444_v43 = vld [vmem:[%s8085_s5 + $0x28] sm:$0xff]  ;;  %v8375_v53 = vld [vmem:[#allocation53_spill] sm:$0xff]  ;;  %v2676_v60 = vrot.slane %v2562_v1, 2  ;;  %v8380_v62 = vld [vmem:[#allocation46_spill] sm:$0xff] }
 0x298   :  { %v1937_v28 = vsel %vm1896_vm7, %v1878_v19, %v8366_v36  ;;  %v1939_v25 = vsel %vm1896_vm7, %v1880_v49, %v8374_v59  ;;  %v4584_v11 = vpack.c.bf16 %v3444_v43, %v3443_v40  ;;  %v3445_v36 = vld [vmem:[%s8085_s5 + $0x30] sm:$0xff]  ;;  %v8381_v49 = vld [vmem:[#allocation57_spill] sm:$0xff] }
 0x299   :  { %v6880_v63 = vpop.permute.xlu1 %1405  ;;  %4406 = vmatmul.mubr.msk.f32.gmra.mrb[64].mxu1 %vm2029_vm9, %v1991_v13  ;;  %v8368_v13 = vld [vmem:[#allocation55_spill] sm:$0xff]  ;;  %v2677_v59 = vsel %vm1187_vm5, %v6824_v4, %v2676_v60 }
 0x29a   :  { %4408 = vmatprep.mubr.msk.f32.mxu1 %vm2029_vm9, %v1992_v30  ;;  %v1996_v31 = vsel %vm1955_vm8, %v1937_v28, %v8368_v13  ;;  %v3446_v28 = vld [vmem:[%s8085_s5 + $0x38] sm:$0xff]  ;;  %v8377_v13 = vld [vmem:[#allocation31_spill] sm:$0xff] }
 0x29b   :  { %v6886_v22 = vpop.permute.xlu0 %1581 }
 0x29d   :  { %v6903_v37 = vpop.permute.xlu1 %1583  ;;  %4409 = vmatmul.mubr.msk.f32.gmra.mrb[66].mxu1 %vm2029_vm9, %v1993_v50  ;;  %v3442_v50 = vld [vmem:[%s8085_s5 + $0x18] sm:$0xff] }
 0x29e   :  { %4411 = vmatprep.mubr.msk.f32.mxu1 %vm2029_vm9, %v1994_v47  ;;  %v8373_v47 = vld [vmem:[#allocation40_spill] sm:$0xff]  ;;  %v4580_v23 = vpack.c.bf16 %v3442_v50, %v3441_v18  ;;  %v4588_v18 = vpack.c.bf16 %v3446_v28, %v3445_v36  ;;  %v8382_v50 = vld [vmem:[#allocation58_spill] sm:$0xff]  ;;  %v8385_v36 = vld [vmem:[#allocation13_spill] sm:$0xff] }
 0x29f   :  { %v6909_v34 = vpop.permute.xlu0 %1763  ;;  %v1938_v8 = vsel %vm1896_vm7, %v1879_v61, %v8373_v47  ;;  %v8379_v61 = vld [vmem:[#allocation56_spill] sm:$0xff]  ;;  %v8383_v47 = vld [vmem:[#allocation59_spill] sm:$0xff] }
 0x2a0   :  { %v1997_v19 = vsel %vm1955_vm8, %v1938_v8, %v8375_v53  ;;  %4581 = vmatprep.subr.bf16.mxu0 %v4580_v23  ;;  %v1882_v57 = vsel %vm1837_vm6, %v8380_v62, %v8379_v61  ;;  %v3447_v62 = vld [vmem:[%s8085_s5 + $0x40] sm:$0xff] }
 0x2a1   :  { %v4362_v32 = vpop.f32.mrb[34].mxu1  ;;  %v6931_v45 = vpop.permute.xlu1 %1765  ;;  %4412 = vmatmul.mubr.msk.f32.gmra.mrb[68].mxu1 %vm2029_vm9, %v1995_v10  ;;  %v1998_v10 = vsel %vm1955_vm8, %v1939_v25, %v8376_v35  ;;  %4583 = vmatpush3.bf16.msra.mxu0 %v4580_v23  ;;  %v1941_v40 = vsel %vm1896_vm7, %v1882_v57, %v8382_v50  ;;  %v8386_v35 = vld [vmem:[#allocation45_spill] sm:$0xff]  ;;  %v3448_v57 = vld [vmem:[%s8085_s5 + $0x48] sm:$0xff] }
 0x2a2   :  { %v2296_v30 = vadd.f32 %v4362_v32, %v6773_v26  ;;  %v2290_v52 = vpop.f32.mrb[35].mxu1  ;;  %4414 = vmatprep.mubr.msk.f32.mxu1 %vm2029_vm9, %v1996_v31  ;;  %v8378_v31 = vld [vmem:[#allocation12_spill] sm:$0xff]  ;;  %4585 = vmatprep.subr.bf16.mxu0 %v4584_v11  ;;  %v2000_v23 = vsel %vm1955_vm8, %v1941_v40, %v6628_v15  ;;  %v4592_v40 = vpack.c.bf16 %v3448_v57, %v3447_v62 }
 0x2a3   :  { %v2291_v46 = vadd.f32 %v6773_v26, %v2290_v52  ;;  %v6941_v3 = vpop.permute.xlu0 %1407 }
 0x2a4   :  { %v6957_v21 = vmax.f32 %v2296_v30, 0.0  ;;  %v1881_v30 = vsel %vm1837_vm6, %v8378_v31, %v8377_v13  ;;  %v8388_v13 = vld [vmem:[#allocation61_spill] sm:$0xff]  ;;  %v8389_v31 = vld [vmem:[#allocation62_spill] sm:$0xff] }
 0x2a5   :  { %v6966_v56 = vmax.f32 %v2291_v46, 0.0  ;;  %v6976_v32 = vpop.permute.xlu1 %1409  ;;  %4415 = vmatmul.mubr.msk.f32.gmra.mrb[70].mxu1 %vm2029_vm9, %v1997_v19  ;;  %v1940_v46 = vsel %vm1896_vm7, %v1881_v30, %v8381_v49  ;;  %v8384_v19 = vld [vmem:[#allocation54_spill] sm:$0xff]  ;;  %4587 = vmatpush3.bf16.msra.mxu0 %v4584_v11  ;;  %v8390_v49 = vld [vmem:[#allocation44_spill] sm:$0xff] }
 0x2a6   :  { %4417 = vmatprep.mubr.msk.f32.mxu1 %vm2029_vm9, %v1998_v10  ;;  %v1999_v8 = vsel %vm1955_vm8, %v1940_v46, %v8383_v47  ;;  %v1883_v28 = vsel %vm1837_vm6, %v8385_v36, %v8384_v19  ;;  %v8387_v10 = vld [vmem:[#allocation15_spill] sm:$0xff]  ;;  %4589 = vmatprep.subr.bf16.mxu0 %v4588_v18  ;;  %v8391_v46 = vld [vmem:[#allocation18_spill] sm:$0xff]  ;;  %v3450_v47 = vld [vmem:[%s8085_s5 + $0x58] sm:$0xff] }
 0x2a7   :  { %v4621_v52 = vpack.i.bf16 %v6957_v21, %v6966_v56  ;;  %v2678_v33 = vrot.slane %v6966_v56, 2  ;;  %v6985_v5 = vpop.permute.xlu0 %1585  ;;  %v1942_v15 = vsel %vm1896_vm7, %v1883_v28, %v8388_v13  ;;  %v8393_v28 = vld [vmem:[#allocation20_spill] sm:$0xff] }
 0x2a9   :  { %4622 = vrot.lane.b32.xlu1 %v4621_v52, %s5027_s26  ;;  %v2679_v25 = vsel %vm1187_vm5, %v2676_v60, %v2678_v33  ;;  %v7005_v43 = vpop.permute.xlu1 %1587  ;;  %4418 = vmatmul.mubr.msk.f32.gmra.mrb[72].mxu1 %vm2029_vm9, %v1999_v8  ;;  %v1884_v60 = vsel %vm1837_vm6, %v8387_v10, %v8386_v35  ;;  %v2001_v52 = vsel %vm1955_vm8, %v1942_v15, %v6622_v41  ;;  %v3449_v41 = vld [vmem:[%s8085_s5 + $0x50] sm:$0xff]  ;;  %v8392_v8 = vld [vmem:[#allocation9_spill] sm:$0xff]  ;;  %v8395_v15 = vld [vmem:[#allocation27_spill] sm:$0xff] }
 0x2aa   :  { %v4626_v53 = vpack.i.bf16 %v2679_v25, %v2677_v59  ;;  %4420 = vmatprep.mubr.msk.f32.mxu1 %vm2029_vm9, %v2000_v23  ;;  %v1943_v30 = vsel %vm1896_vm7, %v1884_v60, %v8389_v31  ;;  %4591 = vmatpush3.bf16.msra.mxu0 %v4588_v18  ;;  %v1886_v59 = vsel %vm1837_vm6, %v8392_v8, %v6633_v39 }
 0x2ab   :  { %v1768_v4 = vpop.permute.xlu0 %1767  ;;  %v2002_v61 = vsel %vm1955_vm8, %v1943_v30, %v6678_v44  ;;  %v1885_v44 = vsel %vm1837_vm6, %v8391_v46, %v8390_v49  ;;  %v4596_v23 = vpack.c.bf16 %v3450_v47, %v3449_v41  ;;  %4593 = vmatprep.subr.bf16.mxu0 %v4592_v40  ;;  %v1887_v39 = vsel %vm1837_vm6, %v8393_v28, %v6626_v48  ;;  %v3452_v48 = vld [vmem:[%s8085_s5 + $0x68] sm:$0xff] }
 0x2ac   :  { %v1944_v25 = vsel %vm1896_vm7, %v1885_v44, %v6642_v38  ;;  %v1946_v38 = vsel %vm1896_vm7, %v1887_v39, %v6842_v29  ;;  %v1889_v31 = vsel %vm1837_vm6, %v8395_v15, %v6880_v63  ;;  %v8396_v46 = vld [vmem:[#allocation19_spill] sm:$0xff]  ;;  %v2680_v47 = vrot.slane %v6957_v21, 2 }
 0x2ad   :  { %4627 = vrot.lane.b32.xlu1 %v4626_v53, %s5024_s0  ;;  %v7024_v11 = vpop.permute.xlu1 %1769  ;;  %4421 = vmatmul.mubr.msk.f32.gmra.mrb[74].mxu1 %vm2029_vm9, %v2001_v52  ;;  %v1945_v53 = vsel %vm1896_vm7, %v1886_v59, %v6648_v17  ;;  %v2003_v19 = vsel %vm1955_vm8, %v1944_v25, %v6672_v6  ;;  %v8394_v17 = vld [vmem:[#allocation10_spill] sm:$0xff]  ;;  %v2005_v10 = vsel %vm1955_vm8, %v1946_v38, %v6860_v24 }
 0x2ae   :  { %4423 = vmatprep.mubr.msk.f32.mxu1 %vm2029_vm9, %v2002_v61  ;;  %v2004_v18 = vsel %vm1955_vm8, %v1945_v53, %v6847_v16  ;;  %4595 = vmatpush3.bf16.msra.mxu0 %v4592_v40  ;;  %v1888_v6 = vsel %vm1837_vm6, %v8394_v17, %v6866_v7  ;;  %v3451_v16 = vld [vmem:[%s8085_s5 + $0x60] sm:$0xff]  ;;  %v1948_v24 = vsel %vm1896_vm7, %v1889_v31, %v6903_v37  ;;  %v3454_v37 = vld [vmem:[%s8085_s5 + $0x78] sm:$0xff] }
 0x2af   :  { %v1412_v50 = vpop.permute.xlu0 %1411  ;;  %4597 = vmatprep.subr.bf16.mxu0 %v4596_v23  ;;  %v1947_v60 = vsel %vm1896_vm7, %v1888_v6, %v6886_v22  ;;  %v4600_v29 = vpack.c.bf16 %v3452_v48, %v3451_v16  ;;  %v1890_v22 = vsel %vm1837_vm6, %v6106_v27, %v6941_v3  ;;  %v3453_v27 = vld [vmem:[%s8085_s5 + $0x70] sm:$0xff]  ;;  %s5028_s5 = smov 96  }
 0x2b0   :  { %v2006_v13 = vsel %vm1955_vm8, %v1947_v60, %v6909_v34  ;;  %v2007_v34 = vsel %vm1955_vm8, %v1948_v24, %v6931_v45  ;;  %v1949_v52 = vsel %vm1896_vm7, %v1890_v22, %v6985_v5  ;;  %v1891_v45 = vsel %vm1837_vm6, %v6140_v54, %v6976_v32 }
 0x2b1   :  { %v1414_v36 = vpop.permute.xlu1 %1413  ;;  %4424 = vmatmul.mubr.msk.f32.gmra.mrb[76].mxu1 %vm2029_vm9, %v2003_v19  ;;  %v2008_v63 = vsel %vm1955_vm8, %v1949_v52, %v1768_v4  ;;  %v4604_v4 = vpack.c.bf16 %v3454_v37, %v3453_v27  ;;  %v1950_v49 = vsel %vm1896_vm7, %v1891_v45, %v7005_v43  ;;  %v1892_v44 = vsel %vm1837_vm6, %v8396_v46, %v1412_v50 }
 0x2b2   :  { %4426 = vmatprep.mubr.msk.f32.mxu1 %vm2029_vm9, %v2004_v18  ;;  %4599 = vmatpush3.bf16.msra.mxu0 %v4596_v23  ;;  %v2009_v54 = vsel %vm1955_vm8, %v1950_v49, %v7024_v11  ;;  %v1893_v43 = vsel %vm1837_vm6, %v6143_v9, %v1414_v36  ;;  %v2681_v18 = vsel %vm1187_vm5, %v2678_v33, %v2680_v47 }
 0x2b3   :  { %v1590_v35 = vpop.permute.xlu0 %1589  ;;  %4601 = vmatprep.subr.bf16.mxu0 %v4600_v29 }
 0x2b4   :  { %v1951_v32 = vsel %vm1896_vm7, %v1892_v44, %v1590_v35 }
 0x2b5   :  { %v1592_v7 = vpop.permute.xlu1 %1591  ;;  %4427 = vmatmul.mubr.msk.f32.gmra.mrb[78].mxu1 %vm2029_vm9, %v2005_v10 }
 0x2b6   :  { %4429 = vmatprep.mubr.msk.f32.mxu1 %vm2029_vm9, %v2006_v13  ;;  %4603 = vmatpush3.bf16.msra.mxu0 %v4600_v29  ;;  %v1952_v11 = vsel %vm1896_vm7, %v1893_v43, %v1592_v7 }
 0x2b7   :  { %v1772_v30 = vpop.permute.xlu0 %1771  ;;  %4605 = vmatprep.subr.bf16.mxu0 %v4604_v4 }
 0x2b8   :  { %v2010_v59 = vsel %vm1955_vm8, %v1951_v32, %v1772_v30 }
 0x2b9   :  { %v4365_v61 = vpop.f32.mrb[36].mxu1  ;;  %v1774_v41 = vpop.permute.xlu1 %1773  ;;  %4430 = vmatmul.mubr.msk.f32.gmra.mrb[80].mxu1 %vm2029_vm9, %v2007_v34 }
 0x2ba   :  { %v2306_v62 = vadd.f32 %v4365_v61, %v6773_v26  ;;  %v2300_v57 = vpop.f32.mrb[37].mxu1  ;;  %4432 = vmatprep.mubr.msk.f32.mxu1 %vm2029_vm9, %v2008_v63  ;;  %4607 = vmatpush3.bf16.msra.mxu0 %v4604_v4  ;;  %v2011_v19 = vsel %vm1955_vm8, %v1952_v11, %v1774_v41 }
 0x2bb   :  { %v2301_v3 = vadd.f32 %v6773_v26, %v2300_v57  ;;  %v1416_v5 = vpop.permute.xlu0 %1415 }
 0x2bc   :  { %v7108_v40 = vmax.f32 %v2306_v62, 0.0  ;;  %v1894_v36 = vsel %vm1837_vm6, %v6128_v0, %v1416_v5 }
 0x2bd   :  { %v7114_v8 = vmax.f32 %v2301_v3, 0.0  ;;  %v1418_v25 = vpop.permute.xlu1 %1417  ;;  %4433 = vmatmul.mubr.msk.f32.gmra.mrb[82].mxu1 %vm2029_vm9, %v2009_v54 }
 0x2be   :  { %4435 = vmatprep.mubr.msk.f32.mxu1 %vm2029_vm9, %v2010_v59  ;;  %v1895_v6 = vsel %vm1837_vm6, %v6374_v20, %v1418_v25  ;;  %v2684_v13 = vrot.slane %v7108_v40, 2 }
 0x2bf   :  { %v4631_v50 = vpack.i.bf16 %v7108_v40, %v7114_v8  ;;  %v2682_v23 = vrot.slane %v7114_v8, 2  ;;  %v1594_v53 = vpop.permute.xlu0 %1593 }
 0x2c0   :  { %v1953_v35 = vsel %vm1896_vm7, %v1894_v36, %v1594_v53 }
 0x2c1   :  { %4632 = vrot.lane.b32.xlu0 %v4631_v50, %s5027_s26  ;;  %v2683_v9 = vsel %vm1187_vm5, %v2680_v47, %v2682_v23  ;;  %v1596_v28 = vpop.permute.xlu1 %1595  ;;  %4436 = vmatmul.mubr.msk.f32.gmra.mrb[84].mxu1 %vm2029_vm9, %v2011_v19  ;;  %v2685_v30 = vsel %vm1187_vm5, %v2682_v23, %v2684_v13 }
 0x2c2   :  { %v4636_v39 = vpack.i.bf16 %v2683_v9, %v2681_v18  ;;  %v1954_v33 = vsel %vm1896_vm7, %v1895_v6, %v1596_v28 }
 0x2c3   :  { %v1776_v38 = vpop.permute.xlu0 %1775 }
 0x2c4   :  { %v2012_v17 = vsel %vm1955_vm8, %v1953_v35, %v1776_v38 }
 0x2c5   :  { %4637 = vrot.lane.b32.xlu0 %v4636_v39, %s5028_s5  ;;  %4438 = vmatprep.mubr.msk.f32.mxu1 %vm2029_vm9, %v2012_v17  ;;  %v1778_v0 = vpop.permute.xlu1 %1777 }
 0x2c6   :  { %v2013_v16 = vsel %vm1955_vm8, %v1954_v33, %v1778_v0 }
 0x2c7   :  { %4439 = vmatmul.mubr.msk.f32.gmra.mrb[86].mxu1 %vm2029_vm9, %v2013_v16 }
 0x2c9   :  { %4642 = vrot.lane.b32.xlu0 %v4636_v39, %s5024_s0 }
 0x2d1   :  { %v4368_v48 = vpop.f32.mrb[38].mxu1 }
 0x2d2   :  { %v2316_v10 = vadd.f32 %v4368_v48, %v6773_v26  ;;  %v2310_v60 = vpop.f32.mrb[39].mxu1 }
 0x2d3   :  { %v2311_v20 = vadd.f32 %v6773_v26, %v2310_v60 }
 0x2d4   :  { %v7146_v29 = vmax.f32 %v2316_v10, 0.0 }
 0x2d5   :  { %v7149_v7 = vmax.f32 %v2311_v20, 0.0 }
 0x2d6   :  { %v2688_v57 = vrot.slane %v7146_v29, 2 }
 0x2d7   :  { %v4646_v15 = vpack.i.bf16 %v7146_v29, %v7149_v7  ;;  %v2686_v31 = vrot.slane %v7149_v7, 2 }
 0x2d9   :  { %4647 = vrot.lane.b32.xlu1 %v4646_v15, %s5027_s26  ;;  %v2687_v24 = vsel %vm1187_vm5, %v2684_v13, %v2686_v31  ;;  %v2689_v45 = vsel %vm1187_vm5, %v2686_v31, %v2688_v57 }
 0x2da   :  { %v4651_v22 = vpack.i.bf16 %v2687_v24, %v2685_v30 }
 0x2dd   :  { %4652 = vrot.lane.b32.xlu1 %v4651_v22, %s5028_s5 }
 0x2e1   :  { %4657 = vrot.lane.b32.xlu1 %v4651_v22, %s5024_s0 }
 0x2e9   :  { %v4371_v34 = vpop.f32.mrb[40].mxu1 }
 0x2ea   :  { %v2326_v52 = vadd.f32 %v4371_v34, %v6773_v26  ;;  %v2320_v61 = vpop.f32.mrb[41].mxu1 }
 0x2eb   :  { %v2321_v63 = vadd.f32 %v6773_v26, %v2320_v61 }
 0x2ec   :  { %v7161_v62 = vmax.f32 %v2326_v52, 0.0 }
 0x2ed   :  { %v7164_v41 = vmax.f32 %v2321_v63, 0.0 }
 0x2ee   :  { %v2692_v54 = vrot.slane %v7161_v62, 2 }
 0x2ef   :  { %v4661_v27 = vpack.i.bf16 %v7161_v62, %v7164_v41  ;;  %v2690_v37 = vrot.slane %v7164_v41, 2 }
 0x2f1   :  { %4662 = vrot.lane.b32.xlu0 %v4661_v27, %s5027_s26  ;;  %v2691_v3 = vsel %vm1187_vm5, %v2688_v57, %v2690_v37  ;;  %v2693_v43 = vsel %vm1187_vm5, %v2690_v37, %v2692_v54 }
 0x2f2   :  { %v4666_v5 = vpack.i.bf16 %v2691_v3, %v2689_v45 }
 0x2f5   :  { %4667 = vrot.lane.b32.xlu0 %v4666_v5, %s5028_s5 }
 0x2f9   :  { %4672 = vrot.lane.b32.xlu0 %v4666_v5, %s5024_s0 }
 0x301   :  { %v4374_v4 = vpop.f32.mrb[42].mxu1 }
 0x302   :  { %v2336_v49 = vadd.f32 %v4374_v4, %v6773_v26  ;;  %v2330_v46 = vpop.f32.mrb[43].mxu1 }
 0x303   :  { %v2331_v44 = vadd.f32 %v6773_v26, %v2330_v46 }
 0x304   :  { %v7176_v47 = vmax.f32 %v2336_v49, 0.0 }
 0x305   :  { %v7179_v32 = vmax.f32 %v2331_v44, 0.0 }
 0x306   :  { %v2696_v36 = vrot.slane %v7176_v47, 2  ;;  %v4618_v3 = vpop.permute.xlu0 %4617 }
 0x307   :  { %v4676_v59 = vpack.i.bf16 %v7176_v47, %v7179_v32  ;;  %v2694_v25 = vrot.slane %v7179_v32, 2  ;;  %v4620_v44 = vunpack.i.h.bf16 %v4618_v3 }
 0x309   :  { %4677 = vrot.lane.b32.xlu1 %v4676_v59, %s5027_s26  ;;  %v2695_v50 = vsel %vm1187_vm5, %v2692_v54, %v2694_v25  ;;  %v2697_v38 = vsel %vm1187_vm5, %v2694_v25, %v2696_v36  ;;  %v4619_v54 = vunpack.i.l.bf16 %v4618_v3 }
 0x30a   :  { %v4681_v23 = vpack.i.bf16 %v2695_v50, %v2693_v43 }
 0x30d   :  { %4682 = vrot.lane.b32.xlu1 %v4681_v23, %s5028_s5 }
 0x311   :  { %4687 = vrot.lane.b32.xlu1 %v4681_v23, %s5024_s0  ;;  %v4377_v53 = vpop.f32.mrb[44].mxu1 }
 0x312   :  { %v2346_v11 = vadd.f32 %v4377_v53, %v6773_v26  ;;  %v2340_v19 = vpop.f32.mrb[45].mxu1 }
 0x313   :  { %v2341_v18 = vadd.f32 %v6773_v26, %v2340_v19  ;;  %v3277_v19 = vsel %vm1896_vm7, %v2560_v58, %v4620_v44 }
 0x314   :  { %v7191_v9 = vmax.f32 %v2346_v11, 0.0 }
 0x315   :  { %v7194_v28 = vmax.f32 %v2341_v18, 0.0 }
 0x316   :  { %v2700_v60 = vrot.slane %v7191_v9, 2 }
 0x317   :  { %v4691_v39 = vpack.i.bf16 %v7191_v9, %v7194_v28  ;;  %v2698_v35 = vrot.slane %v7194_v28, 2 }
 0x319   :  { %4692 = vrot.lane.b32.xlu0 %v4691_v39, %s5027_s26  ;;  %v2699_v17 = vsel %vm1187_vm5, %v2696_v36, %v2698_v35  ;;  %v2701_v31 = vsel %vm1187_vm5, %v2698_v35, %v2700_v60  ;;  %v3276_v39 = vsel %vm1896_vm7, %v2559_v14, %v4619_v54 }
 0x31a   :  { %v4696_v6 = vpack.i.bf16 %v2699_v17, %v2697_v38 }
 0x31b   :  { %v4623_v46 = vpop.permute.xlu1 %4622 }
 0x31c   :  { %v4625_v43 = vunpack.i.h.bf16 %v4623_v46  ;;  %v4624_v50 = vunpack.i.l.bf16 %v4623_v46 }
 0x31d   :  { %4697 = vrot.lane.b32.xlu0 %v4696_v6, %s5028_s5  ;;  %v4380_v33 = vpop.f32.mrb[46].mxu1 }
 0x31e   :  { %v2356_v0 = vadd.f32 %v4380_v33, %v6773_v26  ;;  %v2350_v16 = vpop.f32.mrb[47].mxu1  ;;  %v3331_v55 = vsel %vm2029_vm9, %v3277_v19, %v4625_v43  ;;  %v3330_v58 = vsel %vm2029_vm9, %v3276_v39, %v4624_v50 }
 0x31f   :  { %v2351_v48 = vadd.f32 %v6773_v26, %v2350_v16 }
 0x320   :  { %v7205_v10 = vmax.f32 %v2356_v0, 0.0 }
 0x321   :  { %v7208_v20 = vmax.f32 %v2351_v48, 0.0  ;;  %4702 = vrot.lane.b32.xlu0 %v4696_v6, %s5024_s0 }
 0x322   :  { %v2704_v57 = vrot.slane %v7205_v10, 2 }
 0x323   :  { %v4706_v13 = vpack.i.bf16 %v7205_v10, %v7208_v20  ;;  %v2702_v15 = vrot.slane %v7208_v20, 2 }
 0x325   :  { %4707 = vrot.lane.b32.xlu1 %v4706_v13, %s5027_s26  ;;  %v2703_v30 = vsel %vm1187_vm5, %v2700_v60, %v2702_v15  ;;  %v2705_v5 = vsel %vm1187_vm5, %v2702_v15, %v2704_v57 }
 0x326   :  { %v4711_v24 = vpack.i.bf16 %v2703_v30, %v2701_v31 }
 0x329   :  { %v4383_v22 = vpop.f32.mrb[48].mxu1  ;;  %4712 = vrot.lane.b32.xlu1 %v4711_v24, %s5028_s5 }
 0x32a   :  { %v2366_v34 = vadd.f32 %v4383_v22, %v6773_v26  ;;  %v2360_v52 = vpop.f32.mrb[49].mxu1 }
 0x32b   :  { %v2361_v61 = vadd.f32 %v6773_v26, %v2360_v52 }
 0x32c   :  { %v7220_v63 = vmax.f32 %v2366_v34, 0.0 }
 0x32d   :  { %v7223_v27 = vmax.f32 %v2361_v61, 0.0  ;;  %4717 = vrot.lane.b32.xlu1 %v4711_v24, %s5024_s0 }
 0x32e   :  { %v2708_v35 = vrot.slane %v7220_v63, 2 }
 0x32f   :  { %v4721_v37 = vpack.i.bf16 %v7220_v63, %v7223_v27  ;;  %v2706_v45 = vrot.slane %v7223_v27, 2 }
 0x331   :  { %4722 = vrot.lane.b32.xlu0 %v4721_v37, %s5027_s26  ;;  %v2707_v4 = vsel %vm1187_vm5, %v2704_v57, %v2706_v45  ;;  %v2709_v16 = vsel %vm1187_vm5, %v2706_v45, %v2708_v35  ;;  %v4628_v57 = vpop.permute.xlu1 %4627 }
 0x332   :  { %v4726_v49 = vpack.i.bf16 %v2707_v4, %v2705_v5  ;;  %v4630_v4 = vunpack.i.h.bf16 %v4628_v57 }
 0x333   :  { %v4633_v59 = vpop.permute.xlu0 %4632 }
 0x334   :  { %v4635_v46 = vunpack.i.h.bf16 %v4633_v59  ;;  %v4634_v44 = vunpack.i.l.bf16 %v4633_v59 }
 0x335   :  { %4727 = vrot.lane.b32.xlu0 %v4726_v49, %s5028_s5  ;;  %v4386_v25 = vpop.f32.mrb[50].mxu1 }
 0x336   :  { %v2376_v23 = vadd.f32 %v4386_v25, %v6773_v26  ;;  %v2370_v53 = vpop.f32.mrb[51].mxu1 }
 0x337   :  { %v2371_v11 = vadd.f32 %v6773_v26, %v2370_v53  ;;  %v4638_v36 = vpop.permute.xlu0 %4637 }
 0x338   :  { %v7238_v18 = vmax.f32 %v2376_v23, 0.0  ;;  %v4640_v17 = vunpack.i.h.bf16 %v4638_v36  ;;  %v4639_v6 = vunpack.i.l.bf16 %v4638_v36  ;;  %v3279_v23 = vsel %vm1896_vm7, %v2562_v1, %v4630_v4 }
 0x339   :  { %v7244_v38 = vmax.f32 %v2371_v11, 0.0  ;;  %4732 = vrot.lane.b32.xlu0 %v4726_v49, %s5024_s0  ;;  %v4629_v49 = vunpack.i.l.bf16 %v4628_v57  ;;  %v3333_v11 = vsel %vm2029_vm9, %v3279_v23, %v4635_v46 }
 0x33a   :  { %v3385_v14 = vsel %vm3384_vm10, %v3330_v58, %v4639_v6  ;;  %v3386_v0 = vsel %vm3384_vm10, %v3331_v55, %v4640_v17  ;;  %v2712_v22 = vrot.slane %v7238_v18, 2 }
 0x33b   :  { %v4736_v33 = vpack.i.bf16 %v7238_v18, %v7244_v38  ;;  %v2710_v2 = vrot.slane %v7244_v38, 2  ;;  %4473 = vmatprep.mubr.f32.mxu0 %v3385_v14  ;;  %v3278_v50 = vsel %vm1896_vm7, %v2561_v12, %v4629_v49 }
 0x33c   :  { %4474 = vmatmul.mubr.f32.vlgmr.msra.gmra.mrb[34].mxu0 %v3386_v0  ;;  %v3332_v53 = vsel %vm2029_vm9, %v3278_v50, %v4634_v44  ;;  %v4643_v0 = vpop.permute.xlu0 %4642 }
 0x33d   :  { %4737 = vrot.lane.b32.xlu1 %v4736_v33, %s5027_s26  ;;  %v2711_v48 = vsel %vm1187_vm5, %v2708_v35, %v2710_v2  ;;  %v2713_v37 = vsel %vm1187_vm5, %v2710_v2, %v2712_v22 }
 0x33e   :  { %v4741_v60 = vpack.i.bf16 %v2711_v48, %v2709_v16 }
 0x341   :  { %4742 = vrot.lane.b32.xlu1 %v4741_v60, %s5028_s5  ;;  %v4389_v13 = vpop.f32.mrb[52].mxu1 }
 0x342   :  { %v2386_v15 = vadd.f32 %v4389_v13, %v6773_v26  ;;  %v2380_v31 = vpop.f32.mrb[53].mxu1 }
 0x343   :  { %v2381_v30 = vadd.f32 %v6773_v26, %v2380_v31 }
 0x344   :  { %v7260_v24 = vmax.f32 %v2386_v15, 0.0 }
 0x345   :  { %v7263_v34 = vmax.f32 %v2381_v30, 0.0  ;;  %4747 = vrot.lane.b32.xlu1 %v4741_v60, %s5024_s0 }
 0x346   :  { %v2716_v42 = vrot.slane %v7260_v24, 2 }
 0x347   :  { %v4751_v52 = vpack.i.bf16 %v7260_v24, %v7263_v34  ;;  %v2714_v61 = vrot.slane %v7263_v34, 2 }
 0x349   :  { %4752 = vrot.lane.b32.xlu0 %v4751_v52, %s5027_s26  ;;  %v2715_v45 = vsel %vm1187_vm5, %v2712_v22, %v2714_v61  ;;  %v2717_v60 = vsel %vm1187_vm5, %v2714_v61, %v2716_v42  ;;  %v4645_v52 = vunpack.i.h.bf16 %v4643_v0 }
 0x34a   :  { %v4756_v3 = vpack.i.bf16 %v2715_v45, %v2713_v37  ;;  %v4644_v45 = vunpack.i.l.bf16 %v4643_v0 }
 0x34b   :  { %v7272_v5 = vpop.permute.xlu1 %4647 }
 0x34c   :  { %v4650_v46 = vunpack.i.h.bf16 %v7272_v5  ;;  %v4649_v44 = vunpack.i.l.bf16 %v7272_v5  ;;  %v3280_v5 = vsel %vm1896_vm7, %v6966_v56, %v4644_v45 }
 0x34d   :  { %4757 = vrot.lane.b32.xlu0 %v4756_v3, %s5028_s5 }
 0x34f   :  { %v4653_v54 = vpop.permute.xlu1 %4652 }
 0x350   :  { %v4655_v25 = vunpack.i.h.bf16 %v4653_v54  ;;  %v4654_v43 = vunpack.i.l.bf16 %v4653_v54 }
 0x351   :  { %4762 = vrot.lane.b32.xlu0 %v4756_v3, %s5024_s0 }
 0x352   :  { %v3387_v19 = vsel %vm3384_vm10, %v3332_v53, %v4654_v43  ;;  %v3388_v59 = vsel %vm3384_vm10, %v3333_v11, %v4655_v25 }
 0x353   :  { %4476 = vmatprep.mubr.f32.mxu0 %v3387_v19 }
 0x354   :  { %4477 = vmatmul.mubr.f32.gmra.mrb[36].mxu0 %v3388_v59 }
 0x356   :  { %v4392_v36 = vpop.f32.mrb[54].mxu1 }
 0x357   :  { %v2396_v39 = vadd.f32 %v4392_v36, %v6773_v26  ;;  %v2390_v51 = vpop.f32.mrb[55].mxu1  ;;  %v3281_v36 = vsel %vm1896_vm7, %v6957_v21, %v4645_v52 }
 0x358   :  { %v2391_v12 = vadd.f32 %v6773_v26, %v2390_v51 }
 0x359   :  { %v7288_v35 = vmax.f32 %v2396_v39, 0.0 }
 0x35a   :  { %v7291_v1 = vmax.f32 %v2391_v12, 0.0  ;;  %v4395_v17 = vpop.f32.mrb[56].mxu1  ;;  %v3334_v12 = vsel %vm2029_vm9, %v3280_v5, %v4649_v44 }
 0x35b   :  { %v2406_v6 = vadd.f32 %v4395_v17, %v6773_v26  ;;  %v2400_v55 = vpop.f32.mrb[57].mxu1  ;;  %v2720_v16 = vrot.slane %v7288_v35, 2 }
 0x35c   :  { %v4766_v58 = vpack.i.bf16 %v7288_v35, %v7291_v1  ;;  %v2718_v33 = vrot.slane %v7291_v1, 2  ;;  %v2401_v2 = vadd.f32 %v6773_v26, %v2400_v55 }
 0x35d   :  { %v7298_v14 = vmax.f32 %v2406_v6, 0.0 }
 0x35e   :  { %v7301_v48 = vmax.f32 %v2401_v2, 0.0  ;;  %4767 = vrot.lane.b32.xlu1 %v4766_v58, %s5027_s26  ;;  %v2719_v13 = vsel %vm1187_vm5, %v2716_v42, %v2718_v33  ;;  %v2721_v61 = vsel %vm1187_vm5, %v2718_v33, %v2720_v16  ;;  %v3335_v42 = vsel %vm2029_vm9, %v3281_v36, %v4650_v46 }
 0x35f   :  { %v4771_v15 = vpack.i.bf16 %v2719_v13, %v2717_v60  ;;  %v2724_v17 = vrot.slane %v7298_v14, 2 }
 0x360   :  { %v4781_v31 = vpack.i.bf16 %v7298_v14, %v7301_v48  ;;  %v2722_v30 = vrot.slane %v7301_v48, 2  ;;  %v4398_v22 = vpop.f32.mrb[58].mxu1 }
 0x361   :  { %v2416_v57 = vadd.f32 %v4398_v22, %v6773_v26  ;;  %v2410_v37 = vpop.f32.mrb[59].mxu1 }
 0x362   :  { %v2411_v3 = vadd.f32 %v6773_v26, %v2410_v37  ;;  %4772 = vrot.lane.b32.xlu1 %v4771_v15, %s5028_s5  ;;  %4782 = vrot.lane.b32.xlu0 %v4781_v31, %s5027_s26  ;;  %v2723_v49 = vsel %vm1187_vm5, %v2720_v16, %v2722_v30  ;;  %v2725_v22 = vsel %vm1187_vm5, %v2722_v30, %v2724_v17 }
 0x363   :  { %v7311_v4 = vpop.permute.xlu0 %4662  ;;  %v4786_v54 = vpack.i.bf16 %v2723_v49, %v2721_v61  ;;  %v7321_v50 = vmax.f32 %v2416_v57, 0.0 }
 0x364   :  { %v7319_v25 = vmax.f32 %v2411_v3, 0.0  ;;  %v4401_v43 = vpop.f32.mrb[60].mxu1 }
 0x365   :  { %v2426_v23 = vadd.f32 %v4401_v43, %v6773_v26  ;;  %v2420_v53 = vpop.f32.mrb[61].mxu1  ;;  %v2728_v13 = vrot.slane %v7321_v50, 2 }
 0x366   :  { %v2726_v11 = vrot.slane %v7319_v25, 2  ;;  %v2421_v19 = vadd.f32 %v6773_v26, %v2420_v53  ;;  %4777 = vrot.lane.b32.xlu1 %v4771_v15, %s5024_s0  ;;  %4787 = vrot.lane.b32.xlu0 %v4786_v54, %s5028_s5  ;;  %v4796_v33 = vpack.i.bf16 %v7321_v50, %v7319_v25 }
 0x367   :  { %v4668_v59 = vpop.permute.xlu0 %4667  ;;  %v7335_v6 = vmax.f32 %v2426_v23, 0.0 }
 0x368   :  { %v4670_v39 = vunpack.i.h.bf16 %v4668_v59  ;;  %v4669_v51 = vunpack.i.l.bf16 %v4668_v59  ;;  %v7337_v55 = vmax.f32 %v2421_v19, 0.0  ;;  %v4404_v58 = vpop.f32.mrb[62].mxu1  ;;  %v2727_v60 = vsel %vm1187_vm5, %v2724_v17, %v2726_v11 }
 0x369   :  { %v2430_v56 = vpop.f32.mrb[63].mxu1  ;;  %v2436_v52 = vadd.f32 %v4404_v58, %v6773_v26  ;;  %v4801_v37 = vpack.i.bf16 %v2727_v60, %v2725_v22  ;;  %v2729_v49 = vsel %vm1187_vm5, %v2726_v11, %v2728_v13  ;;  %v2732_v19 = vrot.slane %v7335_v6, 2 }
 0x36a   :  { %v3389_v2 = vsel %vm3384_vm10, %v3334_v12, %v4669_v51  ;;  %v3390_v21 = vsel %vm3384_vm10, %v3335_v42, %v4670_v39  ;;  %v2730_v0 = vrot.slane %v7337_v55, 2  ;;  %v2431_v16 = vadd.f32 %v6773_v26, %v2430_v56  ;;  %4792 = vrot.lane.b32.xlu0 %v4786_v54, %s5024_s0  ;;  %4797 = vrot.lane.b32.xlu1 %v4796_v33, %s5027_s26  ;;  %v4658_v39 = vpop.permute.xlu1 %4657  ;;  %v7377_v51 = vld [vmem:[%s8084_s4] ss:$0 sm:$0xff] }
 0x36b   :  { %4479 = vmatprep.mubr.f32.mxu0 %v3389_v2  ;;  %v4811_v15 = vpack.i.bf16 %v7335_v6, %v7337_v55  ;;  %v7361_v54 = vmax.f32 %v2436_v52, 0.0 }
 0x36c   :  { %4480 = vmatmul.mubr.f32.gmra.mrb[38].mxu0 %v3390_v21  ;;  %v4407_v31 = vpop.f32.mrb[64].mxu1  ;;  %v2731_v45 = vsel %vm1187_vm5, %v2728_v13, %v2730_v0  ;;  %v7354_v3 = vmax.f32 %v2431_v16, 0.0  ;;  %v2733_v2 = vsel %vm1187_vm5, %v2730_v0, %v2732_v19 }
 0x36d   :  { %v2440_v57 = vpop.f32.mrb[65].mxu1  ;;  %v2446_v46 = vadd.f32 %v4407_v31, %v6773_v26  ;;  %v4816_v30 = vpack.i.bf16 %v2731_v45, %v2729_v49  ;;  %v2736_v17 = vrot.slane %v7361_v54, 2  ;;  %v4659_v31 = vunpack.i.l.bf16 %v4658_v39 }
 0x36e   :  { %v2441_v61 = vadd.f32 %v6773_v26, %v2440_v57  ;;  %4812 = vrot.lane.b32.xlu0 %v4811_v15, %s5027_s26  ;;  %4802 = vrot.lane.b32.xlu1 %v4801_v37, %s5028_s5  ;;  %v2734_v53 = vrot.slane %v7354_v3, 2  ;;  %v4826_v26 = vpack.i.bf16 %v7361_v54, %v7354_v3  ;;  %v4660_v15 = vunpack.i.h.bf16 %v4658_v39 }
 0x36f   :  { %v7369_v59 = vmax.f32 %v2446_v46, 0.0  ;;  %v4665_v57 = vunpack.i.h.bf16 %v7311_v4 }
 0x370   :  { %v4410_v44 = vpop.f32.mrb[66].mxu1  ;;  %v7363_v43 = vmax.f32 %v2441_v61, 0.0  ;;  %v2735_v42 = vsel %vm1187_vm5, %v2732_v19, %v2734_v53  ;;  %v2737_v0 = vsel %vm1187_vm5, %v2734_v53, %v2736_v17  ;;  %v3283_v53 = vsel %vm1896_vm7, %v7108_v40, %v4660_v15 }
 0x371   :  { %v2450_v23 = vpop.f32.mrb[67].mxu1  ;;  %v2456_v33 = vadd.f32 %v7377_v51, %v4410_v44  ;;  %v4831_v60 = vpack.i.bf16 %v2735_v42, %v2733_v2  ;;  %v3337_v39 = vsel %vm2029_vm9, %v3283_v53, %v4665_v57 }
 0x372   :  { %4817 = vrot.lane.b32.xlu0 %v4816_v30, %s5028_s5  ;;  %4807 = vrot.lane.b32.xlu1 %v4801_v37, %s5024_s0  ;;  %v2738_v5 = vrot.slane %v7363_v43, 2  ;;  %v2451_v12 = vadd.f32 %v7377_v51, %v2450_v23  ;;  %v4841_v58 = vpack.i.bf16 %v7369_v59, %v7363_v43  ;;  %v4664_v37 = vunpack.i.l.bf16 %v7311_v4 }
 0x373   :  { %v7399_v45 = vmax.f32 %v2456_v33, 0.0  ;;  %v3282_v4 = vsel %vm1896_vm7, %v7114_v8, %v4659_v31 }
 0x374   :  { %v4413_v11 = vpop.f32.mrb[68].mxu1  ;;  %v2739_v13 = vsel %vm1187_vm5, %v2736_v17, %v2738_v5  ;;  %v7390_v22 = vmax.f32 %v2451_v12, 0.0  ;;  %v2740_v12 = vrot.slane %v7369_v59, 2 }
 0x375   :  { %v2460_v36 = vpop.f32.mrb[69].mxu1  ;;  %v2466_v61 = vadd.f32 %v7377_v51, %v4413_v11  ;;  %v4846_v46 = vpack.i.bf16 %v2739_v13, %v2737_v0  ;;  %v3336_v11 = vsel %vm2029_vm9, %v3282_v4, %v4664_v37  ;;  %v2744_v13 = vrot.slane %v7399_v45, 2  ;;  %v4673_v37 = vpop.permute.xlu0 %4672 }
 0x376   :  { %4822 = vrot.lane.b32.xlu0 %v4816_v30, %s5024_s0  ;;  %4827 = vrot.lane.b32.xlu1 %v4826_v26, %s5027_s26  ;;  %v2461_v21 = vadd.f32 %v7377_v51, %v2460_v36  ;;  %v2742_v23 = vrot.slane %v7390_v22, 2  ;;  %v4856_v42 = vpack.i.bf16 %v7399_v45, %v7390_v22  ;;  %v2741_v57 = vsel %vm1187_vm5, %v2738_v5, %v2740_v12 }
 0x377   :  { %v7416_v17 = vmax.f32 %v2466_v61, 0.0 }
 0x378   :  { %v4416_v56 = vpop.f32.mrb[70].mxu1  ;;  %v7402_v44 = vmax.f32 %v2461_v21, 0.0  ;;  %v2745_v53 = vsel %vm1187_vm5, %v2742_v23, %v2744_v13 }
 0x379   :  { %v2470_v16 = vpop.f32.mrb[71].mxu1  ;;  %8397 = vst [vmem:[#allocation22_spill] sm:$0xff] %v7416_v17 }
 0x37a   :  { %4842 = vrot.lane.b32.xlu0 %v4841_v58, %s5027_s26  ;;  %4832 = vrot.lane.b32.xlu1 %v4831_v60, %s5028_s5  ;;  %v2746_v8 = vrot.slane %v7402_v44, 2  ;;  %v2471_v40 = vadd.f32 %v7377_v51, %v2470_v16  ;;  %v4871_v15 = vpack.i.bf16 %v7416_v17, %v7402_v44  ;;  %v2476_v16 = vadd.f32 %v7377_v51, %v4416_v56 }
 0x37b   :  { %v7392_v52 = vpop.permute.xlu1 %4677 }
 0x37c   :  { %v4419_v49 = vpop.f32.mrb[72].mxu1  ;;  %v7430_v0 = vmax.f32 %v2471_v40, 0.0  ;;  %v2747_v4 = vsel %vm1187_vm5, %v2744_v13, %v2746_v8  ;;  %v2748_v40 = vrot.slane %v7416_v17, 2 }
 0x37d   :  { %v2480_v30 = vpop.f32.mrb[73].mxu1  ;;  %v2486_v56 = vadd.f32 %v7377_v51, %v4419_v49  ;;  %v4876_v5 = vpack.i.bf16 %v2747_v4, %v2745_v53  ;;  %v4679_v49 = vunpack.i.l.bf16 %v7392_v52 }
 0x37e   :  { %4847 = vrot.lane.b32.xlu0 %v4846_v46, %s5028_s5  ;;  %4837 = vrot.lane.b32.xlu1 %v4831_v60, %s5024_s0  ;;  %v2743_v60 = vsel %vm1187_vm5, %v2740_v12, %v2742_v23  ;;  %8398 = vst [vmem:[#allocation17_spill] sm:$0xff] %v7430_v0  ;;  %v2481_v61 = vadd.f32 %v7377_v51, %v2480_v30  ;;  %v2750_v30 = vrot.slane %v7430_v0, 2  ;;  %v4680_v23 = vunpack.i.h.bf16 %v7392_v52 }
 0x37f   :  { %v4683_v19 = vpop.permute.xlu1 %4682 }
 0x380   :  { %v4685_v26 = vunpack.i.h.bf16 %v4683_v19  ;;  %v4684_v36 = vunpack.i.l.bf16 %v4683_v19  ;;  %v4422_v58 = vpop.f32.mrb[74].mxu1  ;;  %v4861_v19 = vpack.i.bf16 %v2743_v60, %v2741_v57  ;;  %v7453_v60 = vmax.f32 %v2486_v56, 0.0 }
 0x381   :  { %v2490_v33 = vpop.f32.mrb[75].mxu1  ;;  %v2496_v57 = vadd.f32 %v7377_v51, %v4422_v58 }
 0x382   :  { %v3391_v2 = vsel %vm3384_vm10, %v3336_v11, %v4684_v36  ;;  %v3392_v21 = vsel %vm3384_vm10, %v3337_v39, %v4685_v26  ;;  %4852 = vrot.lane.b32.xlu0 %v4846_v46, %s5024_s0  ;;  %4857 = vrot.lane.b32.xlu1 %v4856_v42, %s5027_s26  ;;  %v4674_v26 = vunpack.i.l.bf16 %v4673_v37  ;;  %v7440_v11 = vmax.f32 %v2476_v16, 0.0  ;;  %8401 = vst [vmem:[#allocation25_spill] sm:$0xff] %v7453_v60 }
 0x383   :  { %4482 = vmatprep.mubr.f32.mxu0 %v3391_v2  ;;  %v7443_v39 = vmax.f32 %v2481_v61, 0.0  ;;  %v4675_v42 = vunpack.i.h.bf16 %v4673_v37  ;;  %v2491_v2 = vadd.f32 %v7377_v51, %v2490_v33  ;;  %v2751_v61 = vsel %vm1187_vm5, %v2748_v40, %v2750_v30 }
 0x384   :  { %4483 = vmatmul.mubr.f32.gmra.mrb[40].mxu0 %v3392_v21  ;;  %v4425_v31 = vpop.f32.mrb[76].mxu1  ;;  %8399 = vst [vmem:[#allocation24_spill] sm:$0xff] %v7440_v11  ;;  %v4886_v33 = vpack.i.bf16 %v7440_v11, %v7430_v0  ;;  %v2752_v52 = vrot.slane %v7440_v11, 2  ;;  %v2756_v11 = vrot.slane %v7453_v60, 2 }
 0x385   :  { %v2500_v46 = vpop.f32.mrb[77].mxu1  ;;  %8400 = vst [vmem:[#allocation28_spill] sm:$0xff] %v7443_v39  ;;  %v2754_v16 = vrot.slane %v7443_v39, 2  ;;  %v3285_v53 = vsel %vm1896_vm7, %v7146_v29, %v4675_v42  ;;  %v4688_v29 = vpop.permute.xlu1 %4687 }
 0x386   :  { %4872 = vrot.lane.b32.xlu0 %v4871_v15, %s5027_s26  ;;  %4862 = vrot.lane.b32.xlu1 %v4861_v19, %s5028_s5  ;;  %v3284_v15 = vsel %vm1896_vm7, %v7149_v7, %v4674_v26  ;;  %v2749_v7 = vsel %vm1187_vm5, %v2746_v8, %v2748_v40  ;;  %v2501_v26 = vadd.f32 %v7377_v51, %v2500_v46  ;;  %v7482_v40 = vmax.f32 %v2496_v57, 0.0 }
 0x387   :  { %v3338_v0 = vsel %vm2029_vm9, %v3284_v15, %v4679_v49  ;;  %v3339_v8 = vsel %vm2029_vm9, %v3285_v53, %v4680_v23  ;;  %v2755_v49 = vsel %vm1187_vm5, %v2752_v52, %v2754_v16  ;;  %v2753_v23 = vsel %vm1187_vm5, %v2750_v30, %v2752_v52 }
 0x388   :  { %v7438_v36 = vpop.f32.mrb[78].mxu1  ;;  %8402 = vst [vmem:[#allocation4_spill] sm:$0xff] %v7482_v40  ;;  %v4690_v57 = vunpack.i.h.bf16 %v4688_v29  ;;  %v4906_v53 = vpack.i.bf16 %v2755_v49, %v2753_v23 }
 0x389   :  { %v2510_v12 = vpop.f32.mrb[79].mxu1 }
 0x38a   :  { %4877 = vrot.lane.b32.xlu0 %v4876_v5, %s5028_s5  ;;  %4867 = vrot.lane.b32.xlu1 %v4861_v19, %s5024_s0  ;;  %v7467_v19 = vmax.f32 %v2491_v2, 0.0  ;;  %v4901_v2 = vpack.i.bf16 %v7453_v60, %v7443_v39 }
 0x38b   :  { %v7447_v21 = vpop.permute.xlu0 %4692 }
 0x38c   :  { %v7455_v13 = vpop.f32.mrb[80].mxu1  ;;  %v8161_v15 = vrot.slane %v7467_v19, 2  ;;  %v4916_v52 = vpack.i.bf16 %v7482_v40, %v7467_v19  ;;  %v4694_v49 = vunpack.i.l.bf16 %v7447_v21 }
 0x38d   :  { %v7463_v37 = vpop.f32.mrb[81].mxu1 }
 0x38e   :  { %4882 = vrot.lane.b32.xlu0 %v4876_v5, %s5024_s0  ;;  %4887 = vrot.lane.b32.xlu1 %v4886_v33, %s5027_s26  ;;  %v4891_v5 = vpack.i.bf16 %v2751_v61, %v2749_v7  ;;  %v7492_v61 = vmax.f32 %v2501_v26, 0.0  ;;  %v2511_v26 = vadd.f32 %v7377_v51, %v2510_v12  ;;  %v2759_v30 = vsel %vm1187_vm5, %v2756_v11, %v8161_v15 }
 0x38f   :  { %v4698_v4 = vpop.permute.xlu0 %4697  ;;  %v4695_v12 = vunpack.i.h.bf16 %v7447_v21  ;;  %v3287_v15 = vsel %vm1896_vm7, %v7161_v62, %v4690_v57 }
 0x390   :  { %v4700_v56 = vunpack.i.h.bf16 %v4698_v4  ;;  %v4699_v58 = vunpack.i.l.bf16 %v4698_v4  ;;  %v7479_v17 = vpop.f32.mrb[82].mxu1  ;;  %v2506_v4 = vadd.f32 %v7377_v51, %v4425_v31  ;;  %v2757_v31 = vsel %vm1187_vm5, %v2754_v16, %v2756_v11 }
 0x391   :  { %v7484_v46 = vpop.f32.mrb[83].mxu1  ;;  %v8403_v57 = vrot.slane %v7492_v61, 2 }
 0x392   :  { %v3393_v42 = vsel %vm3384_vm10, %v3338_v0, %v4699_v58  ;;  %v3394_v33 = vsel %vm3384_vm10, %v3339_v8, %v4700_v56  ;;  %4902 = vrot.lane.b32.xlu0 %v4901_v2, %s5027_s26  ;;  %4892 = vrot.lane.b32.xlu1 %v4891_v5, %s5028_s5  ;;  %v4689_v0 = vunpack.i.l.bf16 %v4688_v29  ;;  %v2760_v56 = vrot.slane %v7482_v40, 2 }
 0x393   :  { %4485 = vmatprep.mubr.f32.mxu0 %v3393_v42  ;;  %v7499_v42 = vmax.f32 %v2506_v4, 0.0 }
 0x394   :  { %4486 = vmatmul.mubr.f32.gmra.mrb[42].mxu0 %v3394_v33  ;;  %v4437_v7 = vpop.f32.mrb[84].mxu1  ;;  %v3286_v23 = vsel %vm1896_vm7, %v7164_v41, %v4689_v0 }
 0x395   :  { %v2546_v58 = vadd.f32 %v7377_v51, %v4437_v7  ;;  %v2540_v8 = vpop.f32.mrb[85].mxu1  ;;  %v2516_v7 = vadd.f32 %v7377_v51, %v7438_v36  ;;  %v2764_v39 = vrot.slane %v7499_v42, 2 }
 0x396   :  { %v2541_v33 = vadd.f32 %v7377_v51, %v2540_v8  ;;  %4907 = vrot.lane.b32.xlu0 %v4906_v53, %s5028_s5  ;;  %4897 = vrot.lane.b32.xlu1 %v4891_v5, %s5024_s0  ;;  %v4921_v8 = vpack.i.bf16 %v2759_v30, %v2757_v31  ;;  %v7523_v5 = vmax.f32 %v2511_v26, 0.0  ;;  %v2763_v26 = vsel %vm1187_vm5, %v2760_v56, %v8403_v57 }
 0x397   :  { %v7502_v2 = vpop.permute.xlu1 %4707  ;;  %v2614_v16 = vmax.f32 %v2546_v58, 0.0  ;;  %v4931_v58 = vpack.i.bf16 %v7499_v42, %v7492_v61 }
 0x398   :  { %v2613_v4 = vmax.f32 %v2541_v33, 0.0 }
 0x399   :  { %v3108_v11 = vrot.slane %v2614_v16, 2 }
 0x39a   :  { %v7525_v29 = vpack.i.bf16 %v2614_v16, %v2613_v4  ;;  %v7527_v21 = vrot.slane %v2613_v4, 2  ;;  %4912 = vrot.lane.b32.xlu0 %v4906_v53, %s5024_s0  ;;  %v4440_v41 = vpop.f32.mrb[86].mxu1  ;;  %4917 = vrot.lane.b32.xlu1 %v4916_v52, %s5027_s26  ;;  %v3340_v53 = vsel %vm2029_vm9, %v3286_v23, %v4694_v49  ;;  %v3341_v4 = vsel %vm2029_vm9, %v3287_v15, %v4695_v12 }
 0x39b   :  { %v4713_v33 = vpop.permute.xlu1 %4712  ;;  %v2556_v31 = vadd.f32 %v7377_v51, %v4440_v41  ;;  %v2550_v62 = vpop.f32.mrb[87].mxu1  ;;  %v2521_v52 = vadd.f32 %v7377_v51, %v7463_v37  ;;  %v8404_v15 = vrot.slane %v7467_v19, 2  ;;  %v2526_v12 = vadd.f32 %v7377_v51, %v7455_v13 }
 0x39c   :  { %v4715_v0 = vunpack.i.h.bf16 %v4713_v33  ;;  %v4714_v36 = vunpack.i.l.bf16 %v4713_v33  ;;  %v7537_v30 = vsel %vm1187_vm5, %v7527_v21, %v3108_v11  ;;  %v2551_v16 = vadd.f32 %v7377_v51, %v2550_v62  ;;  %v4703_v33 = vpop.permute.xlu0 %4702 }
 0x39d   :  { %v2616_v41 = vmax.f32 %v2556_v31, 0.0  ;;  %v2761_v37 = vsel %vm1187_vm5, %v8404_v15, %v2760_v56  ;;  %v4710_v56 = vunpack.i.h.bf16 %v7502_v2 }
 0x39e   :  { %v3395_v40 = vsel %vm3384_vm10, %v3340_v53, %v4714_v36  ;;  %v3396_v60 = vsel %vm3384_vm10, %v3341_v4, %v4715_v0  ;;  %v2615_v57 = vmax.f32 %v2551_v16, 0.0  ;;  %4932 = vrot.lane.b32.xlu0 %v4931_v58, %s5027_s26  ;;  %4922 = vrot.lane.b32.xlu1 %v4921_v8, %s5028_s5  ;;  %v7558_v0 = vmax.f32 %v2516_v7, 0.0 }
 0x39f   :  { %4488 = vmatprep.mubr.f32.mxu0 %v3395_v40  ;;  %v7548_v62 = vrot.slane %v2616_v41, 2  ;;  %v4936_v40 = vpack.i.bf16 %v2763_v26, %v2761_v37  ;;  %v2766_v58 = vrot.slane %v7523_v5, 2  ;;  %v7561_v36 = vmax.f32 %v2521_v52, 0.0 }
 0x3a0   :  { %4489 = vmatmul.mubr.f32.gmra.mrb[44].mxu0 %v3396_v60  ;;  %v7556_v49 = vpack.i.bf16 %v2616_v41, %v2615_v57  ;;  %v3110_v23 = vrot.slane %v2615_v57, 2  ;;  %v4705_v60 = vunpack.i.h.bf16 %v4703_v33  ;;  %v4704_v16 = vunpack.i.l.bf16 %v4703_v33 }
 0x3a1   :  { %v4709_v7 = vunpack.i.l.bf16 %v7502_v2  ;;  %v4946_v52 = vpack.i.bf16 %v7558_v0, %v7523_v5  ;;  %v2770_v33 = vrot.slane %v7561_v36, 2  ;;  %v2531_v41 = vadd.f32 %v7377_v51, %v7484_v46 }
 0x3a2   :  { %v7566_v53 = vsel %vm1187_vm5, %v3108_v11, %v3110_v23  ;;  %v7570_v13 = vsel %vm1187_vm5, %v3110_v23, %v7548_v62  ;;  %4937 = vrot.lane.b32.xlu0 %v4936_v40, %s5028_s5  ;;  %4927 = vrot.lane.b32.xlu1 %v4921_v8, %s5024_s0  ;;  %v7580_v11 = vmax.f32 %v2526_v12, 0.0  ;;  %v2767_v2 = vsel %vm1187_vm5, %v2764_v39, %v2766_v58 }
 0x3a3   :  { %v7563_v31 = vpop.permute.xlu0 %4722  ;;  %v3288_v37 = vsel %vm1896_vm7, %v7179_v32, %v4704_v16  ;;  %v3289_v12 = vsel %vm1896_vm7, %v7176_v47, %v4705_v60  ;;  %v2768_v23 = vrot.slane %v7558_v0, 2  ;;  %v2536_v47 = vadd.f32 %v7377_v51, %v7479_v17 }
 0x3a4   :  { %v3342_v4 = vsel %vm2029_vm9, %v3288_v37, %v4709_v7  ;;  %v3343_v46 = vsel %vm2029_vm9, %v3289_v12, %v4710_v56  ;;  %v4961_v26 = vpack.i.bf16 %v7580_v11, %v7561_v36  ;;  %v7606_v60 = vmax.f32 %v2531_v41, 0.0 }
 0x3a5   :  { %v2771_v56 = vsel %vm1187_vm5, %v2768_v23, %v2770_v33  ;;  %v4725_v37 = vunpack.i.h.bf16 %v7563_v31 }
 0x3a6   :  { %4942 = vrot.lane.b32.xlu0 %v4936_v40, %s5024_s0  ;;  %4947 = vrot.lane.b32.xlu1 %v4946_v52, %s5027_s26  ;;  %v8405_v40 = vrot.slane %v7492_v61, 2  ;;  %v4718_v52 = vpop.permute.xlu1 %4717 }
 0x3a7   :  { %v4728_v57 = vpop.permute.xlu0 %4727  ;;  %v4720_v17 = vunpack.i.h.bf16 %v4718_v52  ;;  %v4719_v41 = vunpack.i.l.bf16 %v4718_v52 }
 0x3a8   :  { %v4730_v8 = vunpack.i.h.bf16 %v4728_v57  ;;  %v4729_v15 = vunpack.i.l.bf16 %v4728_v57  ;;  %v2765_v32 = vsel %vm1187_vm5, %v8405_v40, %v2764_v39 }
 0x3a9   :  { %v4951_v7 = vpack.i.bf16 %v2767_v2, %v2765_v32  ;;  %v2772_v2 = vrot.slane %v7580_v11, 2  ;;  %v3290_v40 = vsel %vm1896_vm7, %v7194_v28, %v4719_v41  ;;  %v3291_v32 = vsel %vm1896_vm7, %v7191_v9, %v4720_v17 }
 0x3aa   :  { %v3397_v57 = vsel %vm3384_vm10, %v3342_v4, %v4729_v15  ;;  %v3398_v16 = vsel %vm3384_vm10, %v3343_v46, %v4730_v8  ;;  %4962 = vrot.lane.b32.xlu0 %v4961_v26, %s5027_s26  ;;  %v2769_v4 = vsel %vm1187_vm5, %v2766_v58, %v2768_v23  ;;  %v7612_v15 = vmax.f32 %v2536_v47, 0.0 }
 0x3ab   :  { %4491 = vmatprep.mubr.f32.mxu0 %v3397_v57  ;;  %4952 = vrot.lane.b32.xlu1 %v4951_v7, %s5028_s5  ;;  %v4966_v39 = vpack.i.bf16 %v2771_v56, %v2769_v4  ;;  %v2774_v8 = vrot.slane %v7606_v60, 2  ;;  %v4724_v26 = vunpack.i.l.bf16 %v7563_v31  ;;  %v3345_v47 = vsel %vm2029_vm9, %v3291_v32, %v4725_v37  ;;  %v4733_v4 = vpop.permute.xlu0 %4732 }
 0x3ac   :  { %4492 = vmatmul.mubr.f32.gmra.mrb[46].mxu0 %v3398_v16  ;;  %v4976_v58 = vpack.i.bf16 %v7612_v15, %v7606_v60  ;;  %v2776_v31 = vrot.slane %v7612_v15, 2  ;;  %v4735_v37 = vunpack.i.h.bf16 %v4733_v4 }
 0x3ad   :  { %v2775_v23 = vsel %vm1187_vm5, %v2772_v2, %v2774_v8  ;;  %v3344_v16 = vsel %vm2029_vm9, %v3290_v40, %v4724_v26 }
 0x3ae   :  { %4967 = vrot.lane.b32.xlu0 %v4966_v39, %s5028_s5  ;;  %v3107_v28 = vsel %vm1187_vm5, %v2776_v31, %v7527_v21 }
 0x3af   :  { %v4738_v51 = vpop.permute.xlu1 %4737  ;;  %4957 = vrot.lane.b32.xlu1 %v4951_v7, %s5024_s0  ;;  %v2773_v7 = vsel %vm1187_vm5, %v2770_v33, %v2772_v2  ;;  %v4734_v33 = vunpack.i.l.bf16 %v4733_v4 }
 0x3b0   :  { %v4981_v9 = vpack.i.bf16 %v2775_v23, %v2773_v7  ;;  %v4740_v2 = vunpack.i.h.bf16 %v4738_v51  ;;  %v4739_v26 = vunpack.i.l.bf16 %v4738_v51 }
 0x3b2   :  { %4972 = vrot.lane.b32.xlu0 %v4966_v39, %s5024_s0  ;;  %v2777_v39 = vsel %vm1187_vm5, %v2774_v8, %v2776_v31  ;;  %v3293_v8 = vsel %vm1896_vm7, %v7205_v10, %v4735_v37 }
 0x3b3   :  { %v4743_v12 = vpop.permute.xlu1 %4742  ;;  %4977 = vrot.lane.b32.xlu1 %v4976_v58, %s5027_s26  ;;  %v4996_v17 = vpack.i.bf16 %v3107_v28, %v2777_v39  ;;  %v5001_v21 = vpack.i.bf16 %v2776_v31, %v2777_v39 }
 0x3b4   :  { %v4745_v46 = vunpack.i.h.bf16 %v4743_v12  ;;  %v4744_v57 = vunpack.i.l.bf16 %v4743_v12 }
 0x3b6   :  { %v3399_v52 = vsel %vm3384_vm10, %v3344_v16, %v4744_v57  ;;  %v3400_v56 = vsel %vm3384_vm10, %v3345_v47, %v4745_v46  ;;  %4992 = vrot.lane.b32.xlu0 %v7525_v29, %s5027_s26  ;;  %v3292_v29 = vsel %vm1896_vm7, %v7208_v20, %v4734_v33  ;;  %v8406_v46 = vpack.i.bf16 %v7566_v53, %v7537_v30 }
 0x3b7   :  { %4494 = vmatprep.mubr.f32.mxu0 %v3399_v52  ;;  %4982 = vrot.lane.b32.xlu1 %v4981_v9, %s5028_s5  ;;  %v3346_v51 = vsel %vm2029_vm9, %v3292_v29, %v4739_v26  ;;  %v3347_v57 = vsel %vm2029_vm9, %v3293_v8, %v4740_v2  ;;  %v8407_v20 = vpack.i.bf16 %v7548_v62, %v7570_v13  ;;  %v4748_v10 = vpop.permute.xlu1 %4747 }
 0x3b8   :  { %4495 = vmatmul.mubr.f32.gmra.mrb[48].mxu0 %v3400_v56  ;;  %v4750_v30 = vunpack.i.h.bf16 %v4748_v10  ;;  %v4749_v53 = vunpack.i.l.bf16 %v4748_v10 }
 0x3ba   :  { %4997 = vrot.lane.b32.xlu0 %v4996_v17, %s5028_s5  ;;  %v3294_v28 = vsel %vm1896_vm7, %v7223_v27, %v4749_v53  ;;  %v3295_v62 = vsel %vm1896_vm7, %v7220_v63, %v4750_v30 }
 0x3bb   :  { %v4753_v41 = vpop.permute.xlu0 %4752  ;;  %4987 = vrot.lane.b32.xlu1 %v4981_v9, %s5024_s0 }
 0x3bc   :  { %v4755_v47 = vunpack.i.h.bf16 %v4753_v41  ;;  %v4754_v52 = vunpack.i.l.bf16 %v4753_v41 }
 0x3be   :  { %5002 = vrot.lane.b32.xlu0 %v5001_v21, %s5024_s0  ;;  %v3348_v37 = vsel %vm2029_vm9, %v3294_v28, %v4754_v52  ;;  %v3349_v33 = vsel %vm2029_vm9, %v3295_v62, %v4755_v47 }
 0x3bf   :  { %v4758_v58 = vpop.permute.xlu0 %4757  ;;  %5007 = vrot.lane.b32.xlu1 %v8406_v46, %s5028_s5 }
 0x3c0   :  { %v4760_v12 = vunpack.i.h.bf16 %v4758_v58  ;;  %v4759_v23 = vunpack.i.l.bf16 %v4758_v58 }
 0x3c2   :  { %v3401_v40 = vsel %vm3384_vm10, %v3346_v51, %v4759_v23  ;;  %v3402_v32 = vsel %vm3384_vm10, %v3347_v57, %v4760_v12  ;;  %5017 = vrot.lane.b32.xlu0 %v8407_v20, %s5028_s5 }
 0x3c3   :  { %4497 = vmatprep.mubr.f32.mxu0 %v3401_v40  ;;  %5012 = vrot.lane.b32.xlu1 %v7556_v49, %s5027_s26  ;;  %v4763_v31 = vpop.permute.xlu0 %4762 }
 0x3c4   :  { %4498 = vmatmul.mubr.f32.gmra.mrb[50].mxu0 %v3402_v32  ;;  %v4765_v13 = vunpack.i.h.bf16 %v4763_v31  ;;  %v4764_v4 = vunpack.i.l.bf16 %v4763_v31 }
 0x3c6   :  { %v3296_v63 = vsel %vm1896_vm7, %v7244_v38, %v4764_v4  ;;  %v3297_v12 = vsel %vm1896_vm7, %v7238_v18, %v4765_v13 }
 0x3d0   :  { %v4768_v16 = vpop.permute.xlu1 %4767 }
 0x3d1   :  { %v4770_v49 = vunpack.i.h.bf16 %v4768_v16  ;;  %v4769_v17 = vunpack.i.l.bf16 %v4768_v16 }
 0x3d3   :  { %v3350_v23 = vsel %vm2029_vm9, %v3296_v63, %v4769_v17  ;;  %v3351_v29 = vsel %vm2029_vm9, %v3297_v12, %v4770_v49 }
 0x3d4   :  { %v4773_v7 = vpop.permute.xlu1 %4772  ;;  %v4783_v56 = vpop.permute.xlu0 %4782 }
 0x3d5   :  { %v4775_v9 = vunpack.i.h.bf16 %v4773_v7  ;;  %v4774_v39 = vunpack.i.l.bf16 %v4773_v7  ;;  %v4785_v53 = vunpack.i.h.bf16 %v4783_v56  ;;  %v4784_v31 = vunpack.i.l.bf16 %v4783_v56 }
 0x3d7   :  { %v3403_v41 = vsel %vm3384_vm10, %v3348_v37, %v4774_v39  ;;  %v3404_v2 = vsel %vm3384_vm10, %v3349_v33, %v4775_v9 }
 0x3d8   :  { %v4778_v26 = vpop.permute.xlu1 %4777  ;;  %v4788_v21 = vpop.permute.xlu0 %4787  ;;  %4500 = vmatprep.mubr.f32.mxu0 %v3403_v41 }
 0x3d9   :  { %v4790_v27 = vunpack.i.h.bf16 %v4788_v21  ;;  %v4789_v58 = vunpack.i.l.bf16 %v4788_v21  ;;  %4501 = vmatmul.mubr.f32.gmra.mrb[52].mxu0 %v3404_v2  ;;  %v4780_v51 = vunpack.i.h.bf16 %v4778_v26  ;;  %v4779_v57 = vunpack.i.l.bf16 %v4778_v26 }
 0x3db   :  { %v3405_v8 = vsel %vm3384_vm10, %v3350_v23, %v4789_v58  ;;  %v3406_v46 = vsel %vm3384_vm10, %v3351_v29, %v4790_v27  ;;  %v3298_v18 = vsel %vm1896_vm7, %v7263_v34, %v4779_v57  ;;  %v3299_v30 = vsel %vm1896_vm7, %v7260_v24, %v4780_v51 }
 0x3dc   :  { %v4793_v40 = vpop.permute.xlu0 %4792  ;;  %4503 = vmatprep.mubr.f32.mxu0 %v3405_v8  ;;  %v4798_v32 = vpop.permute.xlu1 %4797  ;;  %v3352_v62 = vsel %vm2029_vm9, %v3298_v18, %v4784_v31  ;;  %v3353_v13 = vsel %vm2029_vm9, %v3299_v30, %v4785_v53 }
 0x3dd   :  { %4504 = vmatmul.mubr.f32.gmra.mrb[54].mxu0 %v3406_v46  ;;  %v4795_v20 = vunpack.i.h.bf16 %v4793_v40  ;;  %v4794_v10 = vunpack.i.l.bf16 %v4793_v40  ;;  %v4800_v47 = vunpack.i.h.bf16 %v4798_v32  ;;  %v4799_v52 = vunpack.i.l.bf16 %v4798_v32 }
 0x3df   :  { %v3300_v4 = vsel %vm1896_vm7, %v7291_v1, %v4794_v10  ;;  %v3301_v34 = vsel %vm1896_vm7, %v7288_v35, %v4795_v20 }
 0x3e0   :  { %v4813_v38 = vpop.permute.xlu0 %4812  ;;  %v4803_v16 = vpop.permute.xlu1 %4802  ;;  %v3354_v37 = vsel %vm2029_vm9, %v3300_v4, %v4799_v52  ;;  %v3355_v33 = vsel %vm2029_vm9, %v3301_v34, %v4800_v47 }
 0x3e1   :  { %v4805_v7 = vunpack.i.h.bf16 %v4803_v16  ;;  %v4804_v28 = vunpack.i.l.bf16 %v4803_v16  ;;  %v4815_v29 = vunpack.i.h.bf16 %v4813_v38  ;;  %v4814_v8 = vunpack.i.l.bf16 %v4813_v38 }
 0x3e3   :  { %v3407_v24 = vsel %vm3384_vm10, %v3352_v62, %v4804_v28  ;;  %v3408_v56 = vsel %vm3384_vm10, %v3353_v13, %v4805_v7 }
 0x3e4   :  { %v4818_v9 = vpop.permute.xlu0 %4817  ;;  %v4808_v39 = vpop.permute.xlu1 %4807  ;;  %4506 = vmatprep.mubr.f32.mxu0 %v3407_v24 }
 0x3e5   :  { %v4820_v49 = vunpack.i.h.bf16 %v4818_v9  ;;  %v4819_v17 = vunpack.i.l.bf16 %v4818_v9  ;;  %4507 = vmatmul.mubr.f32.gmra.mrb[56].mxu0 %v3408_v56  ;;  %v4810_v2 = vunpack.i.h.bf16 %v4808_v39  ;;  %v4809_v35 = vunpack.i.l.bf16 %v4808_v39 }
 0x3e7   :  { %v3409_v41 = vsel %vm3384_vm10, %v3354_v37, %v4819_v17  ;;  %v3410_v1 = vsel %vm3384_vm10, %v3355_v33, %v4820_v49  ;;  %v3302_v12 = vsel %vm1896_vm7, %v7301_v48, %v4809_v35  ;;  %v3303_v23 = vsel %vm1896_vm7, %v7298_v14, %v4810_v2 }
 0x3e8   :  { %v4823_v26 = vpop.permute.xlu0 %4822  ;;  %4509 = vmatprep.mubr.f32.mxu0 %v3409_v41  ;;  %v4828_v21 = vpop.permute.xlu1 %4827  ;;  %v3356_v20 = vsel %vm2029_vm9, %v3302_v12, %v4814_v8  ;;  %v3357_v10 = vsel %vm2029_vm9, %v3303_v23, %v4815_v29 }
 0x3e9   :  { %4510 = vmatmul.mubr.f32.gmra.mrb[58].mxu0 %v3410_v1  ;;  %v4825_v27 = vunpack.i.h.bf16 %v4823_v26  ;;  %v4824_v58 = vunpack.i.l.bf16 %v4823_v26  ;;  %v4830_v51 = vunpack.i.h.bf16 %v4828_v21  ;;  %v4829_v57 = vunpack.i.l.bf16 %v4828_v21 }
 0x3eb   :  { %v3304_v18 = vsel %vm1896_vm7, %v7319_v25, %v4824_v58  ;;  %v3305_v48 = vsel %vm1896_vm7, %v7321_v50, %v4825_v27 }
 0x3ec   :  { %v4843_v63 = vpop.permute.xlu0 %4842  ;;  %v4833_v46 = vpop.permute.xlu1 %4832  ;;  %v3358_v47 = vsel %vm2029_vm9, %v3304_v18, %v4829_v57  ;;  %v3359_v52 = vsel %vm2029_vm9, %v3305_v48, %v4830_v51 }
 0x3ed   :  { %v4835_v40 = vunpack.i.h.bf16 %v4833_v46  ;;  %v4834_v32 = vunpack.i.l.bf16 %v4833_v46  ;;  %v4845_v39 = vunpack.i.h.bf16 %v4843_v63  ;;  %v4844_v49 = vunpack.i.l.bf16 %v4843_v63 }
 0x3ef   :  { %v3411_v14 = vsel %vm3384_vm10, %v3356_v20, %v4834_v32  ;;  %v3412_v38 = vsel %vm3384_vm10, %v3357_v10, %v4835_v40 }
 0x3f0   :  { %v4848_v30 = vpop.permute.xlu0 %4847  ;;  %v4838_v53 = vpop.permute.xlu1 %4837  ;;  %4512 = vmatprep.mubr.f32.mxu0 %v3411_v14 }
 0x3f1   :  { %v4850_v31 = vunpack.i.h.bf16 %v4848_v30  ;;  %v4849_v16 = vunpack.i.l.bf16 %v4848_v30  ;;  %4513 = vmatmul.mubr.f32.gmra.mrb[60].mxu0 %v3412_v38  ;;  %v4840_v28 = vunpack.i.h.bf16 %v4838_v53  ;;  %v4839_v50 = vunpack.i.l.bf16 %v4838_v53 }
 0x3f3   :  { %v3413_v7 = vsel %vm3384_vm10, %v3358_v47, %v4849_v16  ;;  %v3414_v25 = vsel %vm3384_vm10, %v3359_v52, %v4850_v31  ;;  %v3306_v24 = vsel %vm1896_vm7, %v7337_v55, %v4839_v50  ;;  %v3307_v56 = vsel %vm1896_vm7, %v7335_v6, %v4840_v28 }
 0x3f4   :  { %v4853_v62 = vpop.permute.xlu0 %4852  ;;  %4515 = vmatprep.mubr.f32.mxu0 %v3413_v7  ;;  %v4858_v13 = vpop.permute.xlu1 %4857  ;;  %v3360_v2 = vsel %vm2029_vm9, %v3306_v24, %v4844_v49  ;;  %v3361_v35 = vsel %vm2029_vm9, %v3307_v56, %v4845_v39  ;;  %v7745_v39 = vld [vmem:[%s8086_s6] ss:$0 sm:$0xff] }
 0x3f5   :  { %4516 = vmatmul.mubr.f32.gmra.mrb[62].mxu0 %v3414_v25  ;;  %v4855_v4 = vunpack.i.h.bf16 %v4853_v62  ;;  %v4854_v34 = vunpack.i.l.bf16 %v4853_v62  ;;  %v4860_v37 = vunpack.i.h.bf16 %v4858_v13  ;;  %v4859_v33 = vunpack.i.l.bf16 %v4858_v13 }
 0x3f7   :  { %v3308_v26 = vsel %vm1896_vm7, %v7354_v3, %v4854_v34  ;;  %v3309_v55 = vsel %vm1896_vm7, %v7361_v54, %v4855_v4 }
 0x3f8   :  { %v4873_v9 = vpop.permute.xlu0 %4872  ;;  %v4863_v17 = vpop.permute.xlu1 %4862  ;;  %v3362_v23 = vsel %vm2029_vm9, %v3308_v26, %v4859_v33  ;;  %v3363_v29 = vsel %vm2029_vm9, %v3309_v55, %v4860_v37  ;;  %v8408_v55 = vld [vmem:[#allocation22_spill] sm:$0xff] }
 0x3f9   :  { %v4865_v41 = vunpack.i.h.bf16 %v4863_v17  ;;  %v4864_v1 = vunpack.i.l.bf16 %v4863_v17  ;;  %v4875_v48 = vunpack.i.h.bf16 %v4873_v9  ;;  %v4874_v30 = vunpack.i.l.bf16 %v4873_v9 }
 0x3fb   :  { %v3415_v6 = vsel %vm3384_vm10, %v3360_v2, %v4864_v1  ;;  %v3416_v27 = vsel %vm3384_vm10, %v3361_v35, %v4865_v41 }
 0x3fc   :  { %v4878_v21 = vpop.permute.xlu0 %4877  ;;  %v4868_v58 = vpop.permute.xlu1 %4867  ;;  %4518 = vmatprep.mubr.f32.mxu0 %v3415_v6 }
 0x3fd   :  { %v4880_v63 = vunpack.i.h.bf16 %v4878_v21  ;;  %v4879_v12 = vunpack.i.l.bf16 %v4878_v21  ;;  %4519 = vmatmul.mubr.f32.gmra.mrb[64].mxu0 %v3416_v27  ;;  %v4870_v46 = vunpack.i.h.bf16 %v4868_v58  ;;  %v4869_v54 = vunpack.i.l.bf16 %v4868_v58 }
 0x3ff   :  { %v3417_v8 = vsel %vm3384_vm10, %v3362_v23, %v4879_v12  ;;  %v3418_v3 = vsel %vm3384_vm10, %v3363_v29, %v4880_v63  ;;  %v3310_v10 = vsel %vm1896_vm7, %v7363_v43, %v4869_v54  ;;  %v3311_v18 = vsel %vm1896_vm7, %v7369_v59, %v4870_v46  ;;  %v8409_v54 = vld [vmem:[#allocation17_spill] sm:$0xff] }
 0x400   :  { %v4883_v51 = vpop.permute.xlu0 %4882  ;;  %4521 = vmatprep.mubr.f32.mxu0 %v3417_v8  ;;  %v4888_v57 = vpop.permute.xlu1 %4887  ;;  %v3364_v47 = vsel %vm2029_vm9, %v3310_v10, %v4874_v30  ;;  %v3365_v52 = vsel %vm2029_vm9, %v3311_v18, %v4875_v48 }
 0x401   :  { %4522 = vmatmul.mubr.f32.gmra.mrb[66].mxu0 %v3418_v3  ;;  %v4885_v40 = vunpack.i.h.bf16 %v4883_v51  ;;  %v4884_v32 = vunpack.i.l.bf16 %v4883_v51  ;;  %v4890_v38 = vunpack.i.h.bf16 %v4888_v57  ;;  %v4889_v53 = vunpack.i.l.bf16 %v4888_v57  ;;  %v8410_v57 = vld [vmem:[#allocation24_spill] sm:$0xff] }
 0x403   :  { %v3312_v7 = vsel %vm1896_vm7, %v7390_v22, %v4884_v32  ;;  %v3313_v43 = vsel %vm1896_vm7, %v7399_v45, %v4885_v40 }
 0x404   :  { %v4903_v20 = vpop.permute.xlu0 %4902  ;;  %v4893_v14 = vpop.permute.xlu1 %4892  ;;  %v3366_v4 = vsel %vm2029_vm9, %v3312_v7, %v4889_v53  ;;  %v3367_v34 = vsel %vm2029_vm9, %v3313_v43, %v4890_v38 }
 0x405   :  { %v4895_v31 = vunpack.i.h.bf16 %v4893_v14  ;;  %v4894_v16 = vunpack.i.l.bf16 %v4893_v14  ;;  %v4905_v6 = vunpack.i.h.bf16 %v4903_v20  ;;  %v4904_v27 = vunpack.i.l.bf16 %v4903_v20 }
 0x407   :  { %v3419_v59 = vsel %vm3384_vm10, %v3364_v47, %v4894_v16  ;;  %v3420_v28 = vsel %vm3384_vm10, %v3365_v52, %v4895_v31 }
 0x408   :  { %v4908_v25 = vpop.permute.xlu0 %4907  ;;  %v4898_v50 = vpop.permute.xlu1 %4897  ;;  %4524 = vmatprep.mubr.f32.mxu0 %v3419_v59 }
 0x409   :  { %v4910_v62 = vunpack.i.h.bf16 %v4908_v25  ;;  %v4909_v13 = vunpack.i.l.bf16 %v4908_v25  ;;  %4525 = vmatmul.mubr.f32.gmra.mrb[68].mxu0 %v3420_v28  ;;  %v4900_v24 = vunpack.i.h.bf16 %v4898_v50  ;;  %v4899_v45 = vunpack.i.l.bf16 %v4898_v50  ;;  %v8411_v28 = vld [vmem:[#allocation28_spill] sm:$0xff] }
 0x40b   :  { %v3421_v9 = vsel %vm3384_vm10, %v3366_v4, %v4909_v13  ;;  %v3422_v22 = vsel %vm3384_vm10, %v3367_v34, %v4910_v62  ;;  %v3314_v26 = vsel %vm1896_vm7, %v7402_v44, %v4899_v45  ;;  %v3315_v21 = vsel %vm1896_vm7, %v8408_v55, %v4900_v24  ;;  %v8412_v62 = vld [vmem:[#allocation25_spill] sm:$0xff] }
 0x40c   :  { %v4913_v56 = vpop.permute.xlu0 %4912  ;;  %4527 = vmatprep.mubr.f32.mxu0 %v3421_v9  ;;  %v4918_v49 = vpop.permute.xlu1 %4917  ;;  %v3368_v46 = vsel %vm2029_vm9, %v3314_v26, %v4904_v27  ;;  %v3369_v44 = vsel %vm2029_vm9, %v3315_v21, %v4905_v6 }
 0x40d   :  { %4528 = vmatmul.mubr.f32.gmra.mrb[70].mxu0 %v3422_v22  ;;  %v4915_v37 = vunpack.i.h.bf16 %v4913_v56  ;;  %v4914_v33 = vunpack.i.l.bf16 %v4913_v56  ;;  %v4920_v58 = vunpack.i.h.bf16 %v4918_v49  ;;  %v4919_v23 = vunpack.i.l.bf16 %v4918_v49 }
 0x40f   :  { %v4475_v17 = vpop.f32.mrb[34].mxu0  ;;  %v3316_v51 = vsel %vm1896_vm7, %v8409_v54, %v4914_v33  ;;  %v3317_v40 = vsel %vm1896_vm7, %v8410_v57, %v4915_v37  ;;  %v8413_v33 = vld [vmem:[#allocation4_spill] sm:$0xff] }
 0x410   :  { %v3534_v41 = vadd.f32 %v4475_v17, %v7745_v39  ;;  %v3528_v1 = vpop.f32.mrb[35].mxu0  ;;  %v4933_v35 = vpop.permute.xlu0 %4932  ;;  %v3370_v14 = vsel %vm2029_vm9, %v3316_v51, %v4919_v23  ;;  %v3371_v38 = vsel %vm2029_vm9, %v3317_v40, %v4920_v58 }
 0x411   :  { %v3529_v2 = vadd.f32 %v7745_v39, %v3528_v1  ;;  %v4923_v12 = vpop.permute.xlu1 %4922  ;;  %v4935_v4 = vunpack.i.h.bf16 %v4933_v35  ;;  %v4934_v34 = vunpack.i.l.bf16 %v4933_v35 }
 0x412   :  { %v3798_v63 = vmax.f32 %v3534_v41, 0.0  ;;  %v4925_v8 = vunpack.i.h.bf16 %v4923_v12  ;;  %v4924_v3 = vunpack.i.l.bf16 %v4923_v12 }
 0x413   :  { %v3797_v29 = vmax.f32 %v3529_v2, 0.0 }
 0x414   :  { %3852 = vst.msk [vmem:[%s8087_s7 + $0x8] sm:$0xff] %vm2029_vm9, %v3798_v63  ;;  %v4938_v32 = vpop.permute.xlu0 %4937  ;;  %v3423_v20 = vsel %vm3384_vm10, %v3368_v46, %v4924_v3  ;;  %v3424_v10 = vsel %vm3384_vm10, %v3369_v44, %v4925_v8 }
 0x415   :  { %3851 = vst.msk [vmem:[%s8087_s7] sm:$0xff] %vm2029_vm9, %v3797_v29  ;;  %v4928_v18 = vpop.permute.xlu1 %4927  ;;  %v4940_v48 = vunpack.i.h.bf16 %v4938_v32  ;;  %v4939_v30 = vunpack.i.l.bf16 %v4938_v32  ;;  %4530 = vmatprep.mubr.f32.mxu0 %v3423_v20 }
 0x416   :  { %4531 = vmatmul.mubr.f32.gmra.mrb[72].mxu0 %v3424_v10  ;;  %v4930_v16 = vunpack.i.h.bf16 %v4928_v18  ;;  %v4929_v47 = vunpack.i.l.bf16 %v4928_v18 }
 0x417   :  { %v3425_v53 = vsel %vm3384_vm10, %v3370_v14, %v4939_v30  ;;  %v3426_v31 = vsel %vm3384_vm10, %v3371_v38, %v4940_v48 }
 0x418   :  { %v4943_v52 = vpop.permute.xlu0 %4942  ;;  %4533 = vmatprep.mubr.f32.mxu0 %v3425_v53  ;;  %v3318_v50 = vsel %vm1896_vm7, %v8411_v28, %v4929_v47  ;;  %v3319_v13 = vsel %vm1896_vm7, %v8412_v62, %v4930_v16 }
 0x419   :  { %v4948_v7 = vpop.permute.xlu1 %4947  ;;  %v4945_v43 = vunpack.i.h.bf16 %v4943_v52  ;;  %v4944_v25 = vunpack.i.l.bf16 %v4943_v52  ;;  %v3372_v49 = vsel %vm2029_vm9, %v3318_v50, %v4934_v34  ;;  %v3373_v17 = vsel %vm2029_vm9, %v3319_v13, %v4935_v4 }
 0x41a   :  { %4534 = vmatmul.mubr.f32.gmra.mrb[74].mxu0 %v3426_v31  ;;  %v4950_v22 = vunpack.i.h.bf16 %v4948_v7  ;;  %v4949_v24 = vunpack.i.l.bf16 %v4948_v7 }
 0x41b   :  { %v3320_v37 = vsel %vm1896_vm7, %v7467_v19, %v4944_v25  ;;  %v3321_v41 = vsel %vm1896_vm7, %v8413_v33, %v4945_v43 }
 0x41c   :  { %v4963_v59 = vpop.permute.xlu0 %4962  ;;  %v3374_v6 = vsel %vm2029_vm9, %v3320_v37, %v4949_v24  ;;  %v3375_v27 = vsel %vm2029_vm9, %v3321_v41, %v4950_v22 }
 0x41d   :  { %v4953_v9 = vpop.permute.xlu1 %4952  ;;  %v4965_v20 = vunpack.i.h.bf16 %v4963_v59  ;;  %v4964_v10 = vunpack.i.l.bf16 %v4963_v59 }
 0x41e   :  { %v4955_v45 = vunpack.i.h.bf16 %v4953_v9  ;;  %v4954_v56 = vunpack.i.l.bf16 %v4953_v9 }
 0x420   :  { %v4968_v1 = vpop.permute.xlu0 %4967  ;;  %v3427_v2 = vsel %vm3384_vm10, %v3372_v49, %v4954_v56  ;;  %v3428_v35 = vsel %vm3384_vm10, %v3373_v17, %v4955_v45 }
 0x421   :  { %v4958_v26 = vpop.permute.xlu1 %4957  ;;  %v4970_v55 = vunpack.i.h.bf16 %v4968_v1  ;;  %v4969_v21 = vunpack.i.l.bf16 %v4968_v1  ;;  %4536 = vmatprep.mubr.f32.mxu0 %v3427_v2 }
 0x422   :  { %4537 = vmatmul.mubr.f32.gmra.mrb[76].mxu0 %v3428_v35  ;;  %v4960_v63 = vunpack.i.h.bf16 %v4958_v26  ;;  %v4959_v12 = vunpack.i.l.bf16 %v4958_v26 }
 0x423   :  { %v3429_v58 = vsel %vm3384_vm10, %v3374_v6, %v4969_v21  ;;  %v3430_v19 = vsel %vm3384_vm10, %v3375_v27, %v4970_v55 }
 0x424   :  { %v4973_v23 = vpop.permute.xlu0 %4972  ;;  %4539 = vmatprep.mubr.f32.mxu0 %v3429_v58  ;;  %v3322_v40 = vsel %vm1896_vm7, %v7492_v61, %v4959_v12  ;;  %v3323_v32 = vsel %vm1896_vm7, %v7499_v42, %v4960_v63 }
 0x425   :  { %v4978_v29 = vpop.permute.xlu1 %4977  ;;  %v4975_v3 = vunpack.i.h.bf16 %v4973_v23  ;;  %v4974_v46 = vunpack.i.l.bf16 %v4973_v23  ;;  %v3376_v16 = vsel %vm2029_vm9, %v3322_v40, %v4964_v10  ;;  %v3377_v61 = vsel %vm2029_vm9, %v3323_v32, %v4965_v20 }
 0x426   :  { %4540 = vmatmul.mubr.f32.gmra.mrb[78].mxu0 %v3430_v19  ;;  %v4980_v18 = vunpack.i.h.bf16 %v4978_v29  ;;  %v4979_v14 = vunpack.i.l.bf16 %v4978_v29 }
 0x427   :  { %v4478_v8 = vpop.f32.mrb[36].mxu0  ;;  %v3324_v42 = vsel %vm1896_vm7, %v7523_v5, %v4974_v46  ;;  %v3325_v47 = vsel %vm1896_vm7, %v7558_v0, %v4975_v3 }
 0x428   :  { %v3544_v44 = vadd.f32 %v4478_v8, %v7745_v39  ;;  %v3538_v54 = vpop.f32.mrb[37].mxu0  ;;  %v4993_v57 = vpop.permute.xlu0 %4992  ;;  %v3378_v5 = vsel %vm2029_vm9, %v3324_v42, %v4979_v14  ;;  %v3379_v0 = vsel %vm2029_vm9, %v3325_v47, %v4980_v18 }
 0x429   :  { %v3539_v51 = vadd.f32 %v7745_v39, %v3538_v54  ;;  %v4983_v30 = vpop.permute.xlu1 %4982  ;;  %v4995_v24 = vunpack.i.h.bf16 %v4993_v57  ;;  %v4994_v45 = vunpack.i.l.bf16 %v4993_v57 }
 0x42a   :  { %v3800_v48 = vmax.f32 %v3544_v44, 0.0  ;;  %v4985_v53 = vunpack.i.h.bf16 %v4983_v30  ;;  %v4984_v31 = vunpack.i.l.bf16 %v4983_v30 }
 0x42b   :  { %v3799_v38 = vmax.f32 %v3539_v51, 0.0 }
 0x42c   :  { %3854 = vst.msk [vmem:[%s8087_s7 + $0x18] sm:$0xff] %vm2029_vm9, %v3800_v48  ;;  %v4998_v52 = vpop.permute.xlu0 %4997  ;;  %v3431_v7 = vsel %vm3384_vm10, %v3376_v16, %v4984_v31  ;;  %v3432_v43 = vsel %vm3384_vm10, %v3377_v61, %v4985_v53 }
 0x42d   :  { %3853 = vst.msk [vmem:[%s8087_s7 + $0x10] sm:$0xff] %vm2029_vm9, %v3799_v38  ;;  %v4988_v25 = vpop.permute.xlu1 %4987  ;;  %v5000_v59 = vunpack.i.h.bf16 %v4998_v52  ;;  %v4999_v28 = vunpack.i.l.bf16 %v4998_v52  ;;  %4542 = vmatprep.mubr.f32.mxu0 %v3431_v7 }
 0x42e   :  { %v4990_v50 = vunpack.i.h.bf16 %v4988_v25  ;;  %v4989_v62 = vunpack.i.l.bf16 %v4988_v25  ;;  %4543 = vmatmul.mubr.f32.gmra.mrb[80].mxu0 %v3432_v43 }
 0x42f   :  { %v3433_v13 = vsel %vm3384_vm10, %v3378_v5, %v4999_v28  ;;  %v3434_v4 = vsel %vm3384_vm10, %v3379_v0, %v5000_v59 }
 0x430   :  { %v5003_v34 = vpop.permute.xlu0 %5002  ;;  %4545 = vmatprep.mubr.f32.mxu0 %v3433_v13  ;;  %v3326_v9 = vsel %vm1896_vm7, %v7561_v36, %v4989_v62  ;;  %v3327_v22 = vsel %vm1896_vm7, %v7580_v11, %v4990_v50 }
 0x431   :  { %v5008_v56 = vpop.permute.xlu1 %5007  ;;  %v5005_v37 = vunpack.i.h.bf16 %v5003_v34  ;;  %v5004_v33 = vunpack.i.l.bf16 %v5003_v34  ;;  %v3380_v41 = vsel %vm2029_vm9, %v3326_v9, %v4994_v45  ;;  %v3381_v1 = vsel %vm2029_vm9, %v3327_v22, %v4995_v24 }
 0x432   :  { %v5010_v49 = vunpack.i.h.bf16 %v5008_v56  ;;  %v5009_v17 = vunpack.i.l.bf16 %v5008_v56  ;;  %4546 = vmatmul.mubr.f32.gmra.mrb[82].mxu0 %v3434_v4 }
 0x433   :  { %v3328_v27 = vsel %vm1896_vm7, %v7606_v60, %v5004_v33  ;;  %v3329_v58 = vsel %vm1896_vm7, %v7612_v15, %v5005_v37 }
 0x434   :  { %v5018_v2 = vpop.permute.xlu0 %5017  ;;  %v3435_v35 = vsel %vm3384_vm10, %v3380_v41, %v5009_v17  ;;  %v3436_v36 = vsel %vm3384_vm10, %v3381_v1, %v5010_v49 }
 0x435   :  { %v5013_v26 = vpop.permute.xlu1 %5012  ;;  %v5020_v55 = vunpack.i.h.bf16 %v5018_v2  ;;  %v5019_v11 = vunpack.i.l.bf16 %v5018_v2  ;;  %4548 = vmatprep.mubr.f32.mxu0 %v3435_v35 }
 0x436   :  { %v5015_v21 = vunpack.i.h.bf16 %v5013_v26  ;;  %v5014_v6 = vunpack.i.l.bf16 %v5013_v26  ;;  %4549 = vmatmul.mubr.f32.gmra.mrb[84].mxu0 %v3436_v36 }
 0x438   :  { %v3382_v19 = vsel %vm2029_vm9, %v3328_v27, %v5014_v6  ;;  %v3383_v63 = vsel %vm2029_vm9, %v3329_v58, %v5015_v21 }
 0x439   :  { %v3437_v12 = vsel %vm3384_vm10, %v3382_v19, %v5019_v11  ;;  %v3438_v23 = vsel %vm3384_vm10, %v3383_v63, %v5020_v55 }
 0x43a   :  { %4551 = vmatprep.mubr.f32.mxu0 %v3437_v12 }
 0x43b   :  { %4552 = vmatmul.mubr.f32.gmra.mrb[86].mxu0 %v3438_v23 }
 0x43f   :  { %v4481_v29 = vpop.f32.mrb[38].mxu0 }
 0x440   :  { %v3554_v8 = vadd.f32 %v4481_v29, %v7745_v39  ;;  %v3548_v3 = vpop.f32.mrb[39].mxu0 }
 0x441   :  { %v3549_v46 = vadd.f32 %v7745_v39, %v3548_v3 }
 0x442   :  { %v3802_v60 = vmax.f32 %v3554_v8, 0.0 }
 0x443   :  { %v3801_v44 = vmax.f32 %v3549_v46, 0.0 }
 0x444   :  { %3856 = vst.msk [vmem:[%s8087_s7 + $0x28] sm:$0xff] %vm2029_vm9, %v3802_v60 }
 0x445   :  { %3855 = vst.msk [vmem:[%s8087_s7 + $0x20] sm:$0xff] %vm2029_vm9, %v3801_v44 }
 0x457   :  { %v4484_v15 = vpop.f32.mrb[40].mxu0 }
 0x458   :  { %v3564_v54 = vadd.f32 %v4484_v15, %v7745_v39  ;;  %v3558_v51 = vpop.f32.mrb[41].mxu0 }
 0x459   :  { %v3559_v57 = vadd.f32 %v7745_v39, %v3558_v51 }
 0x45a   :  { %v3804_v40 = vmax.f32 %v3564_v54, 0.0 }
 0x45b   :  { %v3803_v32 = vmax.f32 %v3559_v57, 0.0 }
 0x45c   :  { %3858 = vst.msk [vmem:[%s8087_s7 + $0x38] sm:$0xff] %vm2029_vm9, %v3804_v40 }
 0x45d   :  { %3857 = vst.msk [vmem:[%s8087_s7 + $0x30] sm:$0xff] %vm2029_vm9, %v3803_v32 }
 0x467   :  { %v4487_v20 = vpop.f32.mrb[42].mxu0 }
 0x468   :  { %v3574_v10 = vadd.f32 %v4487_v20, %v7745_v39  ;;  %v3568_v18 = vpop.f32.mrb[43].mxu0 }
 0x469   :  { %v3569_v48 = vadd.f32 %v7745_v39, %v3568_v18 }
 0x46a   :  { %v3806_v30 = vmax.f32 %v3574_v10, 0.0 }
 0x46b   :  { %v3805_v14 = vmax.f32 %v3569_v48, 0.0 }
 0x46c   :  { %3860 = vst.msk [vmem:[%s8087_s7 + $0x48] sm:$0xff] %vm2029_vm9, %v3806_v30 }
 0x46d   :  { %3859 = vst.msk [vmem:[%s8087_s7 + $0x40] sm:$0xff] %vm2029_vm9, %v3805_v14 }
 0x473   :  { %v4490_v38 = vpop.f32.mrb[44].mxu0 }
 0x474   :  { %v3584_v53 = vadd.f32 %v4490_v38, %v7745_v39  ;;  %v3578_v31 = vpop.f32.mrb[45].mxu0 }
 0x475   :  { %v3579_v16 = vadd.f32 %v7745_v39, %v3578_v31 }
 0x476   :  { %v3808_v61 = vmax.f32 %v3584_v53, 0.0 }
 0x477   :  { %v3807_v42 = vmax.f32 %v3579_v16, 0.0 }
 0x478   :  { %3862 = vst.msk [vmem:[%s8087_s7 + $0x58] sm:$0xff] %vm2029_vm9, %v3808_v61 }
 0x479   :  { %3861 = vst.msk [vmem:[%s8087_s7 + $0x50] sm:$0xff] %vm2029_vm9, %v3807_v42 }
 0x47f   :  { %v4493_v47 = vpop.f32.mrb[46].mxu0 }
 0x480   :  { %v3594_v52 = vadd.f32 %v4493_v47, %v7745_v39  ;;  %v3588_v7 = vpop.f32.mrb[47].mxu0 }
 0x481   :  { %v3589_v43 = vadd.f32 %v7745_v39, %v3588_v7 }
 0x482   :  { %v3810_v25 = vmax.f32 %v3594_v52, 0.0 }
 0x483   :  { %v3809_v59 = vmax.f32 %v3589_v43, 0.0 }
 0x484   :  { %3864 = vst.msk [vmem:[%s8087_s7 + $0x68] sm:$0xff] %vm2029_vm9, %v3810_v25 }
 0x485   :  { %3863 = vst.msk [vmem:[%s8087_s7 + $0x60] sm:$0xff] %vm2029_vm9, %v3809_v59 }
 0x48b   :  { %v4496_v28 = vpop.f32.mrb[48].mxu0 }
 0x48c   :  { %v3604_v50 = vadd.f32 %v4496_v28, %v7745_v39  ;;  %v3598_v62 = vpop.f32.mrb[49].mxu0 }
 0x48d   :  { %v3599_v5 = vadd.f32 %v7745_v39, %v3598_v62 }
 0x48e   :  { %v3812_v0 = vmax.f32 %v3604_v50, 0.0 }
 0x48f   :  { %v3811_v13 = vmax.f32 %v3599_v5, 0.0 }
 0x490   :  { %3866 = vst.msk [vmem:[%s8087_s7 + $0x78] sm:$0xff] %vm2029_vm9, %v3812_v0 }
 0x491   :  { %3865 = vst.msk [vmem:[%s8087_s7 + $0x70] sm:$0xff] %vm2029_vm9, %v3811_v13 }
 0x497   :  { %v4499_v4 = vpop.f32.mrb[50].mxu0 }
 0x498   :  { %v3614_v34 = vadd.f32 %v4499_v4, %v7745_v39  ;;  %v3608_v9 = vpop.f32.mrb[51].mxu0 }
 0x499   :  { %v3609_v22 = vadd.f32 %v7745_v39, %v3608_v9 }
 0x49a   :  { %v3814_v24 = vmax.f32 %v3614_v34, 0.0 }
 0x49b   :  { %v3813_v45 = vmax.f32 %v3609_v22, 0.0 }
 0x49c   :  { %3868 = vst.msk [vmem:[%s8087_s7 + $0x88] sm:$0xff] %vm2029_vm9, %v3814_v24 }
 0x49d   :  { %3867 = vst.msk [vmem:[%s8087_s7 + $0x80] sm:$0xff] %vm2029_vm9, %v3813_v45 }
 0x4ac   :  { %v4502_v56 = vpop.f32.mrb[52].mxu0 }
 0x4ad   :  { %v3624_v49 = vadd.f32 %v4502_v56, %v7745_v39  ;;  %v3618_v17 = vpop.f32.mrb[53].mxu0 }
 0x4ae   :  { %v3619_v37 = vadd.f32 %v7745_v39, %v3618_v17 }
 0x4af   :  { %v3816_v33 = vmax.f32 %v3624_v49, 0.0 }
 0x4b0   :  { %v3815_v41 = vmax.f32 %v3619_v37, 0.0  ;;  %v4505_v1 = vpop.f32.mrb[54].mxu0 }
 0x4b1   :  { %3870 = vst.msk [vmem:[%s8087_s7 + $0x98] sm:$0xff] %vm2029_vm9, %v3816_v33  ;;  %v3634_v2 = vadd.f32 %v4505_v1, %v7745_v39  ;;  %v3628_v35 = vpop.f32.mrb[55].mxu0 }
 0x4b2   :  { %3869 = vst.msk [vmem:[%s8087_s7 + $0x90] sm:$0xff] %vm2029_vm9, %v3815_v41  ;;  %v3629_v36 = vadd.f32 %v7745_v39, %v3628_v35 }
 0x4b3   :  { %v3818_v26 = vmax.f32 %v3634_v2, 0.0 }
 0x4b4   :  { %v3817_v55 = vmax.f32 %v3629_v36, 0.0 }
 0x4b5   :  { %3872 = vst.msk [vmem:[%s8087_s7 + $0xa8] sm:$0xff] %vm2029_vm9, %v3818_v26 }
 0x4b6   :  { %3871 = vst.msk [vmem:[%s8087_s7 + $0xa0] sm:$0xff] %vm2029_vm9, %v3817_v55 }
 0x4b8   :  { %v4508_v11 = vpop.f32.mrb[56].mxu0 }
 0x4b9   :  { %v3644_v21 = vadd.f32 %v4508_v11, %v7745_v39  ;;  %v3638_v6 = vpop.f32.mrb[57].mxu0 }
 0x4ba   :  { %v3639_v27 = vadd.f32 %v7745_v39, %v3638_v6 }
 0x4bb   :  { %v3820_v58 = vmax.f32 %v3644_v21, 0.0 }
 0x4bc   :  { %v3819_v19 = vmax.f32 %v3639_v27, 0.0  ;;  %v4511_v63 = vpop.f32.mrb[58].mxu0 }
 0x4bd   :  { %3874 = vst.msk [vmem:[%s8087_s7 + $0xb8] sm:$0xff] %vm2029_vm9, %v3820_v58  ;;  %v3654_v12 = vadd.f32 %v4511_v63, %v7745_v39  ;;  %v3648_v23 = vpop.f32.mrb[59].mxu0 }
 0x4be   :  { %3873 = vst.msk [vmem:[%s8087_s7 + $0xb0] sm:$0xff] %vm2029_vm9, %v3819_v19  ;;  %v3649_v29 = vadd.f32 %v7745_v39, %v3648_v23 }
 0x4bf   :  { %v3822_v8 = vmax.f32 %v3654_v12, 0.0 }
 0x4c0   :  { %v3821_v3 = vmax.f32 %v3649_v29, 0.0 }
 0x4c1   :  { %3876 = vst.msk [vmem:[%s8087_s7 + $0xc8] sm:$0xff] %vm2029_vm9, %v3822_v8 }
 0x4c2   :  { %3875 = vst.msk [vmem:[%s8087_s7 + $0xc0] sm:$0xff] %vm2029_vm9, %v3821_v3 }
 0x4c4   :  { %v4514_v46 = vpop.f32.mrb[60].mxu0 }
 0x4c5   :  { %v3664_v60 = vadd.f32 %v4514_v46, %v7745_v39  ;;  %v3658_v44 = vpop.f32.mrb[61].mxu0 }
 0x4c6   :  { %v3659_v15 = vadd.f32 %v7745_v39, %v3658_v44 }
 0x4c7   :  { %v3824_v54 = vmax.f32 %v3664_v60, 0.0 }
 0x4c8   :  { %v3823_v51 = vmax.f32 %v3659_v15, 0.0  ;;  %v4517_v57 = vpop.f32.mrb[62].mxu0 }
 0x4c9   :  { %3878 = vst.msk [vmem:[%s8087_s7 + $0xd8] sm:$0xff] %vm2029_vm9, %v3824_v54  ;;  %v3674_v40 = vadd.f32 %v4517_v57, %v7745_v39  ;;  %v3668_v32 = vpop.f32.mrb[63].mxu0 }
 0x4ca   :  { %3877 = vst.msk [vmem:[%s8087_s7 + $0xd0] sm:$0xff] %vm2029_vm9, %v3823_v51  ;;  %v3669_v20 = vadd.f32 %v7745_v39, %v3668_v32 }
 0x4cb   :  { %v3826_v10 = vmax.f32 %v3674_v40, 0.0 }
 0x4cc   :  { %v3825_v18 = vmax.f32 %v3669_v20, 0.0 }
 0x4cd   :  { %3880 = vst.msk [vmem:[%s8087_s7 + $0xe8] sm:$0xff] %vm2029_vm9, %v3826_v10 }
 0x4ce   :  { %3879 = vst.msk [vmem:[%s8087_s7 + $0xe0] sm:$0xff] %vm2029_vm9, %v3825_v18 }
 0x4d0   :  { %v4520_v48 = vpop.f32.mrb[64].mxu0 }
 0x4d1   :  { %v3684_v30 = vadd.f32 %v4520_v48, %v7745_v39  ;;  %v3678_v14 = vpop.f32.mrb[65].mxu0 }
 0x4d2   :  { %v3679_v38 = vadd.f32 %v7745_v39, %v3678_v14 }
 0x4d3   :  { %v3828_v53 = vmax.f32 %v3684_v30, 0.0 }
 0x4d4   :  { %v3827_v31 = vmax.f32 %v3679_v38, 0.0  ;;  %v4523_v16 = vpop.f32.mrb[66].mxu0 }
 0x4d5   :  { %3882 = vst.msk [vmem:[%s8087_s7 + $0xf8] sm:$0xff] %vm2029_vm9, %v3828_v53  ;;  %v3694_v61 = vadd.f32 %v4523_v16, %v7745_v39  ;;  %v3688_v42 = vpop.f32.mrb[67].mxu0 }
 0x4d6   :  { %3881 = vst.msk [vmem:[%s8087_s7 + $0xf0] sm:$0xff] %vm2029_vm9, %v3827_v31  ;;  %v3689_v47 = vadd.f32 %v7745_v39, %v3688_v42 }
 0x4d7   :  { %v3830_v52 = vmax.f32 %v3694_v61, 0.0 }
 0x4d8   :  { %v3829_v7 = vmax.f32 %v3689_v47, 0.0 }
 0x4d9   :  { %3884 = vst.msk [vmem:[%s8087_s7 + $0x108] sm:$0xff] %vm2029_vm9, %v3830_v52 }
 0x4da   :  { %3883 = vst.msk [vmem:[%s8087_s7 + $0x100] sm:$0xff] %vm2029_vm9, %v3829_v7 }
 0x4dc   :  { %v4526_v43 = vpop.f32.mrb[68].mxu0 }
 0x4dd   :  { %v3704_v25 = vadd.f32 %v4526_v43, %v7745_v39  ;;  %v3698_v59 = vpop.f32.mrb[69].mxu0 }
 0x4de   :  { %v3699_v28 = vadd.f32 %v7745_v39, %v3698_v59 }
 0x4df   :  { %v3832_v50 = vmax.f32 %v3704_v25, 0.0 }
 0x4e0   :  { %v3831_v62 = vmax.f32 %v3699_v28, 0.0  ;;  %v4529_v5 = vpop.f32.mrb[70].mxu0 }
 0x4e1   :  { %3886 = vst.msk [vmem:[%s8087_s7 + $0x118] sm:$0xff] %vm2029_vm9, %v3832_v50  ;;  %v3714_v0 = vadd.f32 %v4529_v5, %v7745_v39  ;;  %v3708_v13 = vpop.f32.mrb[71].mxu0 }
 0x4e2   :  { %3885 = vst.msk [vmem:[%s8087_s7 + $0x110] sm:$0xff] %vm2029_vm9, %v3831_v62  ;;  %v3709_v4 = vadd.f32 %v7745_v39, %v3708_v13 }
 0x4e3   :  { %v3834_v34 = vmax.f32 %v3714_v0, 0.0 }
 0x4e4   :  { %v3833_v9 = vmax.f32 %v3709_v4, 0.0 }
 0x4e5   :  { %3888 = vst.msk [vmem:[%s8087_s7 + $0x128] sm:$0xff] %vm2029_vm9, %v3834_v34 }
 0x4e6   :  { %3887 = vst.msk [vmem:[%s8087_s7 + $0x120] sm:$0xff] %vm2029_vm9, %v3833_v9 }
 0x4e9   :  { %v4532_v22 = vpop.f32.mrb[72].mxu0 }
 0x4ea   :  { %v3724_v24 = vadd.f32 %v4532_v22, %v7745_v39  ;;  %v3718_v45 = vpop.f32.mrb[73].mxu0 }
 0x4eb   :  { %v3719_v56 = vadd.f32 %v7745_v39, %v3718_v45 }
 0x4ec   :  { %v3836_v49 = vmax.f32 %v3724_v24, 0.0 }
 0x4ed   :  { %v3835_v17 = vmax.f32 %v3719_v56, 0.0  ;;  %v4535_v37 = vpop.f32.mrb[74].mxu0 }
 0x4ee   :  { %3890 = vst.msk [vmem:[%s8087_s7 + $0x138] sm:$0xff] %vm2029_vm9, %v3836_v49  ;;  %v3734_v33 = vadd.f32 %v4535_v37, %v7745_v39  ;;  %v3728_v41 = vpop.f32.mrb[75].mxu0 }
 0x4ef   :  { %3889 = vst.msk [vmem:[%s8087_s7 + $0x130] sm:$0xff] %vm2029_vm9, %v3835_v17  ;;  %v3729_v1 = vadd.f32 %v7745_v39, %v3728_v41 }
 0x4f0   :  { %v3838_v2 = vmax.f32 %v3734_v33, 0.0 }
 0x4f1   :  { %v3837_v35 = vmax.f32 %v3729_v1, 0.0 }
 0x4f2   :  { %3892 = vst.msk [vmem:[%s8087_s7 + $0x148] sm:$0xff] %vm2029_vm9, %v3838_v2 }
 0x4f3   :  { %3891 = vst.msk [vmem:[%s8087_s7 + $0x140] sm:$0xff] %vm2029_vm9, %v3837_v35 }
 0x4f5   :  { %v4538_v36 = vpop.f32.mrb[76].mxu0 }
 0x4f6   :  { %v3744_v26 = vadd.f32 %v4538_v36, %v7745_v39  ;;  %v3738_v55 = vpop.f32.mrb[77].mxu0 }
 0x4f7   :  { %v3739_v11 = vadd.f32 %v7745_v39, %v3738_v55 }
 0x4f8   :  { %v3840_v21 = vmax.f32 %v3744_v26, 0.0 }
 0x4f9   :  { %v3839_v6 = vmax.f32 %v3739_v11, 0.0  ;;  %v4541_v27 = vpop.f32.mrb[78].mxu0 }
 0x4fa   :  { %3894 = vst.msk [vmem:[%s8087_s7 + $0x158] sm:$0xff] %vm2029_vm9, %v3840_v21  ;;  %v3754_v58 = vadd.f32 %v4541_v27, %v7745_v39  ;;  %v3748_v19 = vpop.f32.mrb[79].mxu0 }
 0x4fb   :  { %3893 = vst.msk [vmem:[%s8087_s7 + $0x150] sm:$0xff] %vm2029_vm9, %v3839_v6  ;;  %v3749_v63 = vadd.f32 %v7745_v39, %v3748_v19 }
 0x4fc   :  { %v3842_v12 = vmax.f32 %v3754_v58, 0.0 }
 0x4fd   :  { %v3841_v23 = vmax.f32 %v3749_v63, 0.0 }
 0x4fe   :  { %3896 = vst.msk [vmem:[%s8087_s7 + $0x168] sm:$0xff] %vm2029_vm9, %v3842_v12 }
 0x4ff   :  { %3895 = vst.msk [vmem:[%s8087_s7 + $0x160] sm:$0xff] %vm2029_vm9, %v3841_v23 }
 0x501   :  { %v4544_v29 = vpop.f32.mrb[80].mxu0 }
 0x502   :  { %v3764_v8 = vadd.f32 %v4544_v29, %v7745_v39  ;;  %v3758_v3 = vpop.f32.mrb[81].mxu0 }
 0x503   :  { %v3759_v46 = vadd.f32 %v7745_v39, %v3758_v3 }
 0x504   :  { %v3844_v60 = vmax.f32 %v3764_v8, 0.0 }
 0x505   :  { %v3843_v44 = vmax.f32 %v3759_v46, 0.0  ;;  %v4547_v15 = vpop.f32.mrb[82].mxu0 }
 0x506   :  { %3898 = vst.msk [vmem:[%s8087_s7 + $0x178] sm:$0xff] %vm2029_vm9, %v3844_v60  ;;  %v3774_v54 = vadd.f32 %v4547_v15, %v7745_v39  ;;  %v3768_v51 = vpop.f32.mrb[83].mxu0 }
 0x507   :  { %3897 = vst.msk [vmem:[%s8087_s7 + $0x170] sm:$0xff] %vm2029_vm9, %v3843_v44  ;;  %v3769_v57 = vadd.f32 %v7745_v39, %v3768_v51 }
 0x508   :  { %v3846_v40 = vmax.f32 %v3774_v54, 0.0 }
 0x509   :  { %v3845_v32 = vmax.f32 %v3769_v57, 0.0  ;;  %v4550_v20 = vpop.f32.mrb[84].mxu0 }
 0x50a   :  { %3900 = vst.msk [vmem:[%s8087_s7 + $0x188] sm:$0xff] %vm2029_vm9, %v3846_v40  ;;  %v3784_v10 = vadd.f32 %v4550_v20, %v7745_v39  ;;  %v3778_v18 = vpop.f32.mrb[85].mxu0 }
 0x50b   :  { %3899 = vst.msk [vmem:[%s8087_s7 + $0x180] sm:$0xff] %vm2029_vm9, %v3845_v32  ;;  %v3779_v48 = vadd.f32 %v7745_v39, %v3778_v18 }
 0x50c   :  { %v3848_v30 = vmax.f32 %v3784_v10, 0.0 }
 0x50d   :  { %v3847_v14 = vmax.f32 %v3779_v48, 0.0 }
 0x50e   :  { %3902 = vst.msk [vmem:[%s8087_s7 + $0x198] sm:$0xff] %vm2029_vm9, %v3848_v30  ;;  %v4553_v38 = vpop.f32.mrb[86].mxu0 }
 0x50f   :  { %3901 = vst.msk [vmem:[%s8087_s7 + $0x190] sm:$0xff] %vm2029_vm9, %v3847_v14  ;;  %v3794_v53 = vadd.f32 %v4553_v38, %v7745_v39  ;;  %v3788_v31 = vpop.f32.mrb[87].mxu0 }
 0x510   :  { %v3789_v16 = vadd.f32 %v7745_v39, %v3788_v31 }
 0x511   :  { %v3850_v61 = vmax.f32 %v3794_v53, 0.0 }
 0x512   :  { %v3849_v42 = vmax.f32 %v3789_v16, 0.0 }
 0x513   :  { %3905 = vst.msk [vmem:[%s8087_s7 + $0x1a8] sm:$0x7] %vm3904_vm11, %v3850_v61 }
 0x514   :  { %3903 = vst.msk [vmem:[%s8087_s7 + $0x1a0] sm:$0xff] %vm2029_vm9, %v3849_v42 }

</bundles_post_ra>
